<compile_context>
chip_gen: v7x
topology: tpu7x:2x2x1
jax: 0.10.0
libtpu: 0.0.40
codegen_flags: <defaults>
</compile_context>

<pallas_src>
import functools

import jax
import jax.numpy as jnp
from jax import lax
from jax.experimental import pallas as pl
from jax.experimental.pallas import tpu as pltpu

EPS = 1e-5          # PyTorch BatchNorm2d default eps
NEG_SLOPE = 1.0     # nn.LeakyReLU(True): negative_slope=True -> 1.0 (identity activation)

_VMEM_LIMIT = 32 * 1024 * 1024   # safe on v5e (128 MiB), v6e (128 MiB), v7x (64 MiB)


# ----------------------------- Pallas kernels ------------------------------

def _conv3x3_kernel(*refs, H, W, reflect, slope, fuse_norm, has_bias):
    """Per-batch-element fused kernel: [BN+act] -> halo pad -> 3x3 conv -> stats.

    refs (in order):
      x_ref                     (1, H, W, C)   unpadded input block (f32 or bf16)
      [scale_ref, shift_ref]    (1, C) each    folded BN1 scale/shift   -- only if fuse_norm
      w_ref                     (9*C, N) bf16  tap-major conv weight matrix
      [bias_ref]                (1, N)                                  -- only if has_bias
      y_ref                     (1, H, W, N)   conv output (bf16, pre-norm)
      st_ref                    (1, 2, N)      per-batch [sum, sum_sq] of conv out, f32
    """
    it = iter(refs)
    x_ref = next(it)
    scale_ref = next(it) if fuse_norm else None
    shift_ref = next(it) if fuse_norm else None
    w_ref = next(it)
    bias_ref = next(it) if has_bias else None
    y_ref = next(it)
    st_ref = next(it)

    C = x_ref.shape[-1]
    M = H * W

    h = x_ref[0]                                            # (H, W, C)
    if fuse_norm:
        # Fold the previous BatchNorm (precomputed scale/shift) + LeakyReLU into the
        # input path.  Pointwise per-channel, so it commutes with reflect/replicate pad.
        h = h.astype(jnp.float32) * scale_ref[...].reshape(1, 1, C) \
            + shift_ref[...].reshape(1, 1, C)
        if slope != 1.0:                                    # LeakyReLU (slope==1 -> identity)
            h = jnp.where(h > 0, h, slope * h)
    h = h.astype(jnp.bfloat16)                              # MXU operand dtype (once, hoisted)

    # ---- in-kernel halo: vertical pad (rows), then three horizontally shifted slabs ----
    top = h[1:2] if reflect else h[0:1]
    bot = h[H - 2:H - 1] if reflect else h[H - 1:H]
    hv = jnp.concatenate([top, h, bot], axis=0)             # (H+2, W, C)

    lcol = hv[:, 1:2] if reflect else hv[:, 0:1]
    rcol = hv[:, W - 2:W - 1] if reflect else hv[:, W - 1:W]
    slab_l = jnp.concatenate([lcol, hv[:, :W - 1]], axis=1)  # j = 0 (left tap)
    slab_c = hv                                               # j = 1 (center tap)
    slab_r = jnp.concatenate([hv[:, 1:], rcol], axis=1)       # j = 2 (right tap)

    HP = H + 2
    cols = jnp.concatenate(
        [s.reshape(HP * W, C) for s in (slab_l, slab_c, slab_r)], axis=-1)   # (HP*W, 3C)

    # K-stack the three row offsets (i = 0..2): aligned sublane slices since W % 8 == 0.
    patches = jnp.concatenate(
        [cols[i * W:i * W + M] for i in range(3)], axis=-1)                  # (M, 9C) bf16

    # Single MXU matmul, K = 9*C, f32 accumulation.
    acc = jnp.dot(patches, w_ref[...], preferred_element_type=jnp.float32)   # (M, N) f32
    if bias_ref is not None:
        acc = acc + bias_ref[...]

    # Per-batch partial statistics for the following BatchNorm (from the f32 accumulator).
    st_ref[0, 0:1, :] = jnp.sum(acc, axis=0, keepdims=True)
    st_ref[0, 1:2, :] = jnp.sum(acc * acc, axis=0, keepdims=True)

    y_ref[0] = acc.reshape(H, W, -1).astype(y_ref.dtype)


def _bn_residual_kernel(x_ref, y_ref, scale_ref, shift_ref, o_ref):
    """out = x + BN2(y), with BN2 already folded to (scale, shift)."""
    C = x_ref.shape[-1]
    y = y_ref[0].astype(jnp.float32)
    o_ref[0] = x_ref[0] + y * scale_ref[...].reshape(1, 1, C) \
        + shift_ref[...].reshape(1, 1, C)


# ----------------------------- pallas_call wrappers -------------------------

def _conv3x3(x_img, w_mat, *, scale=None, shift=None, bias=None, slope=1.0, reflect=True):
    """Fused (optional BN+act) + in-kernel-padded 3x3 conv.

    Returns (y [B,H,W,N] bf16, stats [B,2,N] f32)."""
    B, H, W, C = x_img.shape
    K9, n_out = w_mat.shape
    fuse_norm = scale is not None
    has_bias = bias is not None

    in_specs = [pl.BlockSpec((1, H, W, C), lambda b: (b, 0, 0, 0))]
    inputs = [x_img]
    if fuse_norm:
        in_specs += [pl.BlockSpec((1, C), lambda b: (0, 0)),
                     pl.BlockSpec((1, C), lambda b: (0, 0))]
        inputs += [scale, shift]
    in_specs.append(pl.BlockSpec((K9, n_out), lambda b: (0, 0)))
    inputs.append(w_mat)
    if has_bias:
        in_specs.append(pl.BlockSpec((1, n_out), lambda b: (0, 0)))
        inputs.append(bias)

    kernel = functools.partial(_conv3x3_kernel, H=H, W=W, reflect=reflect, slope=slope,
                               fuse_norm=fuse_norm, has_bias=has_bias)
    y, st = pl.pallas_call(
        kernel,
        grid=(B,),
        in_specs=in_specs,
        out_specs=(pl.BlockSpec((1, H, W, n_out), lambda b: (b, 0, 0, 0)),
                   pl.BlockSpec((1, 2, n_out), lambda b: (b, 0, 0))),
        out_shape=(jax.ShapeDtypeStruct((B, H, W, n_out), jnp.bfloat16),
                   jax.ShapeDtypeStruct((B, 2, n_out), jnp.float32)),
        compiler_params=pltpu.CompilerParams(dimension_semantics=("parallel",),
                                             vmem_limit_bytes=_VMEM_LIMIT),
    )(*inputs)
    return y, st


def _bn_residual(x_img, y, scale, shift):
    B, H, W, C = x_img.shape
    return pl.pallas_call(
        _bn_residual_kernel,
        grid=(B,),
        in_specs=[pl.BlockSpec((1, H, W, C), lambda b: (b, 0, 0, 0)),
                  pl.BlockSpec((1, H, W, C), lambda b: (b, 0, 0, 0)),
                  pl.BlockSpec((1, C), lambda b: (0, 0)),
                  pl.BlockSpec((1, C), lambda b: (0, 0))],
        out_specs=pl.BlockSpec((1, H, W, C), lambda b: (b, 0, 0, 0)),
        out_shape=jax.ShapeDtypeStruct((B, H, W, C), jnp.float32),
        compiler_params=pltpu.CompilerParams(dimension_semantics=("parallel",),
                                             vmem_limit_bytes=_VMEM_LIMIT),
    )(x_img, y, scale, shift)


# ------------------------------- JAX glue -----------------------------------

def conv_w_to_mat(w):
    """PyTorch Conv2d weight [Cout, Cin, 3, 3] -> tap-major K matrix [9*Cin, Cout] bf16."""
    cout, cin, kh, kw = w.shape
    return jnp.transpose(w, (2, 3, 1, 0)).reshape(kh * kw * cin, cout).astype(jnp.bfloat16)


def _bn_fold(stats, gamma, beta, count):
    """Reduce per-batch [sum, sum^2] stats -> folded (scale, shift), each (1, C) f32."""
    s = jnp.sum(stats.astype(jnp.float32), axis=0)          # (2, C)
    mean = s[0] / count
    var = jnp.maximum(s[1] / count - mean * mean, 0.0)       # guard cancellation
    inv = lax.rsqrt(var + EPS)
    scale = gamma * inv
    shift = beta - mean * scale
    return scale.reshape(1, -1), shift.reshape(1, -1)


def resnet_block_forward(x_nchw, params, *, padding_type="reflect",
                         use_dropout=False, use_bias=False, negative_slope=NEG_SLOPE):
    """ResnetBlock forward: x + conv_block(x). Input/output NCHW like PyTorch."""
    # TODO(synk): Dropout(0.5) (use_dropout=True) and padding_type='zero' (BN must be applied
    # before zero padding, breaking the fused pre-norm path) are not implemented here.
    assert not use_dropout
    assert padding_type in ("reflect", "replicate")
    reflect = padding_type == "reflect"

    B, C, H, W = x_nchw.shape
    x = jnp.transpose(x_nchw, (0, 2, 3, 1)).astype(jnp.float32)          # NCHW -> NHWC
    w1 = conv_w_to_mat(params["w1"])                                     # (9C, C) bf16
    w2 = conv_w_to_mat(params["w2"])
    g1 = params["g1"].astype(jnp.float32)
    b1 = params["b1"].astype(jnp.float32)
    g2 = params["g2"].astype(jnp.float32)
    b2 = params["b2"].astype(jnp.float32)
    bias1 = params["bias1"].reshape(1, C).astype(jnp.float32) if use_bias else None
    bias2 = params["bias2"].reshape(1, C).astype(jnp.float32) if use_bias else None
    count = float(B * H * W)

    # conv1 (in-kernel halo pad) -> bf16 y1 + per-batch BN1 statistics.
    y1, st1 = _conv3x3(x, w1, bias=bias1, reflect=reflect)
    # Fold BN1 once (tiny XLA reduction), outside the grid.
    scale1, shift1 = _bn_fold(st1, g1, b1, count)
    # conv2 with BN1 + LeakyReLU folded into its input path (per-channel affine + pointwise
    # activation commute with reflect/replicate padding of the pre-norm tensor).
    y2, st2 = _conv3x3(y1, w2, scale=scale1, shift=shift1, bias=bias2,
                       slope=negative_slope, reflect=reflect)
    # Fold BN2 once, then fuse it with the residual add.
    scale2, shift2 = _bn_fold(st2, g2, b2, count)
    out = _bn_residual(x, y2, scale2, shift2)
    return jnp.transpose(out, (0, 3, 1, 2))                              # NHWC -> NCHW


# ------------------------- plain-JAX reference (test) -----------------------

def resnet_block_ref(x_nchw, params, *, padding_type="reflect", negative_slope=NEG_SLOPE):
    mode = "reflect" if padding_type == "reflect" else "edge"
    x = jnp.transpose(x_nchw, (0, 2, 3, 1)).astype(jnp.float32)

    def conv(h, w):
        hp = jnp.pad(h, ((0, 0), (1, 1), (1, 1), (0, 0)), mode=mode)
        k = jnp.transpose(w, (2, 3, 1, 0))                       # HWIO
        return lax.conv_general_dilated(hp, k, (1, 1), "VALID",
                                        dimension_numbers=("NHWC", "HWIO", "NHWC"),
                                        precision=lax.Precision.HIGHEST)

    def bn(h, g, b):
        mean = jnp.mean(h, axis=(0, 1, 2), keepdims=True)
        var = jnp.mean(jnp.square(h - mean), axis=(0, 1, 2), keepdims=True)
        return (h - mean) * lax.rsqrt(var + EPS) * g + b

    h = bn(conv(x, params["w1"]), params["g1"], params["b1"])
    h = jnp.where(h > 0, h, negative_slope * h)
    h = bn(conv(h, params["w2"]), params["g2"], params["b2"])
    return jnp.transpose(x + h, (0, 3, 1, 2))


# ---------------------------------- main ------------------------------------

if __name__ == "__main__":
    # dim=128 keeps the channel (lane) dimension dense (multiple of 128); W=16 keeps the
    # in-kernel row slices 8-sublane aligned. Shapes stay small (a few hundred KB).
    B, C, H, W = 2, 128, 16, 16

    key = jax.random.PRNGKey(0)
    kx, k1, k2, k3, k4 = jax.random.split(key, 5)
    x = jax.random.normal(kx, (B, C, H, W), jnp.float32)          # NCHW like PyTorch
    params = {
        "w1": 0.02 * jax.random.normal(k1, (C, C, 3, 3), jnp.float32),
        "w2": 0.02 * jax.random.normal(k2, (C, C, 3, 3), jnp.float32),
        "g1": 1.0 + 0.02 * jax.random.normal(k3, (C,), jnp.float32),
        "b1": jnp.zeros((C,), jnp.float32),
        "g2": 1.0 + 0.02 * jax.random.normal(k4, (C,), jnp.float32),
        "b2": jnp.zeros((C,), jnp.float32),
    }

    fwd = jax.jit(lambda inp: resnet_block_forward(inp, params))
    out = jax.block_until_ready(fwd(x))

    assert out.shape == (B, C, H, W), out.shape
    assert bool(jnp.all(jnp.isfinite(out)))

    ref = jax.block_until_ready(jax.jit(lambda inp: resnet_block_ref(inp, params))(x))
    max_err = float(jnp.max(jnp.abs(out - ref)))
    assert max_err < 1e-1, f"mismatch vs reference: {max_err}"     # bf16 MXU/intermediate tol

    print("KERNEL_OK")
</pallas_src>

<mosaic_0001>
module attributes {stable_mosaic.version = 11 : i64} {
  func.func @_conv3x3_kernel(%arg0: i32, %arg1: memref<1x16x16x128xbf16, #tpu.memory_space<vmem>>, %arg2: memref<1x128xf32, #tpu.memory_space<vmem>>, %arg3: memref<1x128xf32, #tpu.memory_space<vmem>>, %arg4: memref<1152x128xbf16, #tpu.memory_space<vmem>>, %arg5: memref<1x16x16x128xbf16, #tpu.memory_space<vmem>>, %arg6: memref<1x2x128xf32, #tpu.memory_space<vmem>>) attributes {dimension_semantics = [#tpu.dimension_semantics<parallel>], iteration_bounds = array<i64: 2>, scalar_prefetch = 0 : i64, scratch_operands = 0 : i64, tpu.core_type = #tpu.core_type<tc>, window_params = [{transform_indices = @transform_0, window_bounds = array<i64: 1, 16, 16, 128>}, {pipeline_mode = #tpu.pipeline_mode<synchronous>, transform_indices = @transform_1, window_bounds = array<i64: 1, 128>}, {pipeline_mode = #tpu.pipeline_mode<synchronous>, transform_indices = @transform_2, window_bounds = array<i64: 1, 128>}, {pipeline_mode = #tpu.pipeline_mode<synchronous>, transform_indices = @transform_3, window_bounds = array<i64: 1152, 128>}, {transform_indices = @transform_4, window_bounds = array<i64: 1, 16, 16, 128>}, {transform_indices = @transform_5, window_bounds = array<i64: 1, 2, 128>}]} {
    %c0 = arith.constant 0 : index
    %c0_0 = arith.constant 0 : index
    %c0_1 = arith.constant 0 : index
    %c0_2 = arith.constant 0 : index
    %0 = vector.load %arg1[%c0, %c0_0, %c0_1, %c0_2] : memref<1x16x16x128xbf16, #tpu.memory_space<vmem>>, vector<1x16x16x128xbf16>
    %1 = vector.shape_cast %0 : vector<1x16x16x128xbf16> to vector<16x16x128xbf16>
    %2 = arith.extf %1 : vector<16x16x128xbf16> to vector<16x16x128xf32>
    %c0_3 = arith.constant 0 : index
    %c0_4 = arith.constant 0 : index
    %3 = vector.load %arg2[%c0_3, %c0_4] : memref<1x128xf32, #tpu.memory_space<vmem>>, vector<1x128xf32>
    %4 = vector.shape_cast %3 : vector<1x128xf32> to vector<1x1x128xf32>
    %5 = vector.broadcast %4 : vector<1x1x128xf32> to vector<16x16x128xf32>
    %6 = arith.mulf %2, %5 : vector<16x16x128xf32>
    %c0_5 = arith.constant 0 : index
    %c0_6 = arith.constant 0 : index
    %7 = vector.load %arg3[%c0_5, %c0_6] : memref<1x128xf32, #tpu.memory_space<vmem>>, vector<1x128xf32>
    %8 = vector.shape_cast %7 : vector<1x128xf32> to vector<1x1x128xf32>
    %9 = vector.broadcast %8 : vector<1x1x128xf32> to vector<16x16x128xf32>
    %10 = arith.addf %6, %9 : vector<16x16x128xf32>
    %11 = arith.truncf %10 : vector<16x16x128xf32> to vector<16x16x128xbf16>
    %12 = vector.extract_strided_slice %11 {offsets = [1, 0, 0], sizes = [1, 16, 128], strides = [1, 1, 1]} : vector<16x16x128xbf16> to vector<1x16x128xbf16>
    %13 = vector.extract_strided_slice %11 {offsets = [14, 0, 0], sizes = [1, 16, 128], strides = [1, 1, 1]} : vector<16x16x128xbf16> to vector<1x16x128xbf16>
    %14 = tpu.concatenate %12, %11, %13 in 0 : vector<1x16x128xbf16>, vector<16x16x128xbf16>, vector<1x16x128xbf16> -> vector<18x16x128xbf16>
    %15 = vector.extract_strided_slice %14 {offsets = [0, 1, 0], sizes = [18, 1, 128], strides = [1, 1, 1]} : vector<18x16x128xbf16> to vector<18x1x128xbf16>
    %16 = vector.extract_strided_slice %14 {offsets = [0, 14, 0], sizes = [18, 1, 128], strides = [1, 1, 1]} : vector<18x16x128xbf16> to vector<18x1x128xbf16>
    %17 = vector.extract_strided_slice %14 {offsets = [0, 0, 0], sizes = [18, 15, 128], strides = [1, 1, 1]} : vector<18x16x128xbf16> to vector<18x15x128xbf16>
    %18 = tpu.concatenate %15, %17 in 1 : vector<18x1x128xbf16>, vector<18x15x128xbf16> -> vector<18x16x128xbf16>
    %19 = vector.extract_strided_slice %14 {offsets = [0, 1, 0], sizes = [18, 15, 128], strides = [1, 1, 1]} : vector<18x16x128xbf16> to vector<18x15x128xbf16>
    %20 = tpu.concatenate %19, %16 in 1 : vector<18x15x128xbf16>, vector<18x1x128xbf16> -> vector<18x16x128xbf16>
    %21 = vector.shape_cast %18 : vector<18x16x128xbf16> to vector<288x128xbf16>
    %22 = vector.shape_cast %14 : vector<18x16x128xbf16> to vector<288x128xbf16>
    %23 = vector.shape_cast %20 : vector<18x16x128xbf16> to vector<288x128xbf16>
    %24 = tpu.concatenate %21, %22, %23 in 1 : vector<288x128xbf16>, vector<288x128xbf16>, vector<288x128xbf16> -> vector<288x384xbf16>
    %25 = vector.extract_strided_slice %24 {offsets = [0, 0], sizes = [256, 384], strides = [1, 1]} : vector<288x384xbf16> to vector<256x384xbf16>
    %26 = vector.extract_strided_slice %24 {offsets = [16, 0], sizes = [256, 384], strides = [1, 1]} : vector<288x384xbf16> to vector<256x384xbf16>
    %27 = vector.extract_strided_slice %24 {offsets = [32, 0], sizes = [256, 384], strides = [1, 1]} : vector<288x384xbf16> to vector<256x384xbf16>
    %28 = tpu.concatenate %25, %26, %27 in 1 : vector<256x384xbf16>, vector<256x384xbf16>, vector<256x384xbf16> -> vector<256x1152xbf16>
    %c0_7 = arith.constant 0 : index
    %c0_8 = arith.constant 0 : index
    %29 = vector.load %arg4[%c0_7, %c0_8] : memref<1152x128xbf16, #tpu.memory_space<vmem>>, vector<1152x128xbf16>
    %cst = arith.constant dense<0.000000e+00> : vector<256x128xf32>
    %30 = tpu.matmul %28, %29, %cst {dimension_numbers = #tpu.dot_dimension_numbers<[1], [0], [0], [1], [0, 0, 1, 1], [], []>} : vector<256x1152xbf16>, vector<1152x128xbf16>, vector<256x128xf32> -> vector<256x128xf32>
    %cst_9 = arith.constant dense<0.000000e+00> : vector<128xf32>
    %31 = vector.multi_reduction <add>, %30, %cst_9 [0] : vector<256x128xf32> to vector<128xf32>
    %32 = vector.shape_cast %31 : vector<128xf32> to vector<1x128xf32>
    %c0_10 = arith.constant 0 : index
    %c0_11 = arith.constant 0 : index
    %c0_12 = arith.constant 0 : index
    %33 = vector.load %arg6[%c0_10, %c0_11, %c0_12] : memref<1x2x128xf32, #tpu.memory_space<vmem>>, vector<1x1x128xf32>
    %34 = vector.shape_cast %33 : vector<1x1x128xf32> to vector<1x128xf32>
    %35 = vector.shape_cast %32 : vector<1x128xf32> to vector<1x1x128xf32>
    tpu.vector_store %arg6[%c0_10, %c0_11, %c0_12], %35 {strides = array<i32>} : memref<1x2x128xf32, #tpu.memory_space<vmem>>, vector<1x1x128xf32>,
    %36 = arith.mulf %30, %30 : vector<256x128xf32>
    %cst_13 = arith.constant dense<0.000000e+00> : vector<128xf32>
    %37 = vector.multi_reduction <add>, %36, %cst_13 [0] : vector<256x128xf32> to vector<128xf32>
    %38 = vector.shape_cast %37 : vector<128xf32> to vector<1x128xf32>
    %c0_14 = arith.constant 0 : index
    %c1 = arith.constant 1 : index
    %c0_15 = arith.constant 0 : index
    %39 = vector.load %arg6[%c0_14, %c1, %c0_15] : memref<1x2x128xf32, #tpu.memory_space<vmem>>, vector<1x1x128xf32>
    %40 = vector.shape_cast %39 : vector<1x1x128xf32> to vector<1x128xf32>
    %41 = vector.shape_cast %38 : vector<1x128xf32> to vector<1x1x128xf32>
    tpu.vector_store %arg6[%c0_14, %c1, %c0_15], %41 {strides = array<i32>} : memref<1x2x128xf32, #tpu.memory_space<vmem>>, vector<1x1x128xf32>,
    %42 = vector.shape_cast %30 : vector<256x128xf32> to vector<16x16x128xf32>
    %43 = arith.truncf %42 : vector<16x16x128xf32> to vector<16x16x128xbf16>
    %c0_16 = arith.constant 0 : index
    %c0_17 = arith.constant 0 : index
    %c0_18 = arith.constant 0 : index
    %c0_19 = arith.constant 0 : index
    %44 = vector.load %arg5[%c0_16, %c0_17, %c0_18, %c0_19] : memref<1x16x16x128xbf16, #tpu.memory_space<vmem>>, vector<1x16x16x128xbf16>
    %45 = vector.shape_cast %44 : vector<1x16x16x128xbf16> to vector<16x16x128xbf16>
    %46 = vector.shape_cast %43 : vector<16x16x128xbf16> to vector<1x16x16x128xbf16>
    tpu.vector_store %arg5[%c0_16, %c0_17, %c0_18, %c0_19], %46 {strides = array<i32>} : memref<1x16x16x128xbf16, #tpu.memory_space<vmem>>, vector<1x16x16x128xbf16>,
    return
  }
  func.func @transform_0(%arg0: i32) -> (i32, i32, i32, i32) {
    %c0_i32 = arith.constant 0 : i32
    %c0_i32_0 = arith.constant 0 : i32
    %c0_i32_1 = arith.constant 0 : i32
    %c0_i32_2 = arith.constant 0 : i32
    return %arg0, %c0_i32, %c0_i32_0, %c0_i32_1 : i32, i32, i32, i32
  }
  func.func @transform_1(%arg0: i32) -> (i32, i32) {
    %c0_i32 = arith.constant 0 : i32
    %c0_i32_0 = arith.constant 0 : i32
    %c0_i32_1 = arith.constant 0 : i32
    return %c0_i32, %c0_i32_0 : i32, i32
  }
  func.func @transform_2(%arg0: i32) -> (i32, i32) {
    %c0_i32 = arith.constant 0 : i32
    %c0_i32_0 = arith.constant 0 : i32
    %c0_i32_1 = arith.constant 0 : i32
    return %c0_i32, %c0_i32_0 : i32, i32
  }
  func.func @transform_3(%arg0: i32) -> (i32, i32) {
    %c0_i32 = arith.constant 0 : i32
    %c0_i32_0 = arith.constant 0 : i32
    %c0_i32_1 = arith.constant 0 : i32
    return %c0_i32, %c0_i32_0 : i32, i32
  }
  func.func @transform_4(%arg0: i32) -> (i32, i32, i32, i32) {
    %c0_i32 = arith.constant 0 : i32
    %c0_i32_0 = arith.constant 0 : i32
    %c0_i32_1 = arith.constant 0 : i32
    %c0_i32_2 = arith.constant 0 : i32
    return %arg0, %c0_i32, %c0_i32_0, %c0_i32_1 : i32, i32, i32, i32
  }
  func.func @transform_5(%arg0: i32) -> (i32, i32, i32) {
    %c0_i32 = arith.constant 0 : i32
    %c0_i32_0 = arith.constant 0 : i32
    %c0_i32_1 = arith.constant 0 : i32
    return %arg0, %c0_i32, %c0_i32_0 : i32, i32, i32
  }
}

module attributes {stable_mosaic.version = 11 : i64} {
  func.func @_conv3x3_kernel(%arg0: i32, %arg1: memref<1x16x16x128xf32, #tpu.memory_space<vmem>>, %arg2: memref<1152x128xbf16, #tpu.memory_space<vmem>>, %arg3: memref<1x16x16x128xbf16, #tpu.memory_space<vmem>>, %arg4: memref<1x2x128xf32, #tpu.memory_space<vmem>>) attributes {dimension_semantics = [#tpu.dimension_semantics<parallel>], iteration_bounds = array<i64: 2>, scalar_prefetch = 0 : i64, scratch_operands = 0 : i64, tpu.core_type = #tpu.core_type<tc>, window_params = [{transform_indices = @transform_0, window_bounds = array<i64: 1, 16, 16, 128>}, {pipeline_mode = #tpu.pipeline_mode<synchronous>, transform_indices = @transform_1, window_bounds = array<i64: 1152, 128>}, {transform_indices = @transform_2, window_bounds = array<i64: 1, 16, 16, 128>}, {transform_indices = @transform_3, window_bounds = array<i64: 1, 2, 128>}]} {
    %c0 = arith.constant 0 : index
    %c0_0 = arith.constant 0 : index
    %c0_1 = arith.constant 0 : index
    %c0_2 = arith.constant 0 : index
    %0 = vector.load %arg1[%c0, %c0_0, %c0_1, %c0_2] : memref<1x16x16x128xf32, #tpu.memory_space<vmem>>, vector<1x16x16x128xf32>
    %1 = vector.shape_cast %0 : vector<1x16x16x128xf32> to vector<16x16x128xf32>
    %2 = arith.truncf %1 : vector<16x16x128xf32> to vector<16x16x128xbf16>
    %3 = vector.extract_strided_slice %2 {offsets = [1, 0, 0], sizes = [1, 16, 128], strides = [1, 1, 1]} : vector<16x16x128xbf16> to vector<1x16x128xbf16>
    %4 = vector.extract_strided_slice %2 {offsets = [14, 0, 0], sizes = [1, 16, 128], strides = [1, 1, 1]} : vector<16x16x128xbf16> to vector<1x16x128xbf16>
    %5 = tpu.concatenate %3, %2, %4 in 0 : vector<1x16x128xbf16>, vector<16x16x128xbf16>, vector<1x16x128xbf16> -> vector<18x16x128xbf16>
    %6 = vector.extract_strided_slice %5 {offsets = [0, 1, 0], sizes = [18, 1, 128], strides = [1, 1, 1]} : vector<18x16x128xbf16> to vector<18x1x128xbf16>
    %7 = vector.extract_strided_slice %5 {offsets = [0, 14, 0], sizes = [18, 1, 128], strides = [1, 1, 1]} : vector<18x16x128xbf16> to vector<18x1x128xbf16>
    %8 = vector.extract_strided_slice %5 {offsets = [0, 0, 0], sizes = [18, 15, 128], strides = [1, 1, 1]} : vector<18x16x128xbf16> to vector<18x15x128xbf16>
    %9 = tpu.concatenate %6, %8 in 1 : vector<18x1x128xbf16>, vector<18x15x128xbf16> -> vector<18x16x128xbf16>
    %10 = vector.extract_strided_slice %5 {offsets = [0, 1, 0], sizes = [18, 15, 128], strides = [1, 1, 1]} : vector<18x16x128xbf16> to vector<18x15x128xbf16>
    %11 = tpu.concatenate %10, %7 in 1 : vector<18x15x128xbf16>, vector<18x1x128xbf16> -> vector<18x16x128xbf16>
    %12 = vector.shape_cast %9 : vector<18x16x128xbf16> to vector<288x128xbf16>
    %13 = vector.shape_cast %5 : vector<18x16x128xbf16> to vector<288x128xbf16>
    %14 = vector.shape_cast %11 : vector<18x16x128xbf16> to vector<288x128xbf16>
    %15 = tpu.concatenate %12, %13, %14 in 1 : vector<288x128xbf16>, vector<288x128xbf16>, vector<288x128xbf16> -> vector<288x384xbf16>
    %16 = vector.extract_strided_slice %15 {offsets = [0, 0], sizes = [256, 384], strides = [1, 1]} : vector<288x384xbf16> to vector<256x384xbf16>
    %17 = vector.extract_strided_slice %15 {offsets = [16, 0], sizes = [256, 384], strides = [1, 1]} : vector<288x384xbf16> to vector<256x384xbf16>
    %18 = vector.extract_strided_slice %15 {offsets = [32, 0], sizes = [256, 384], strides = [1, 1]} : vector<288x384xbf16> to vector<256x384xbf16>
    %19 = tpu.concatenate %16, %17, %18 in 1 : vector<256x384xbf16>, vector<256x384xbf16>, vector<256x384xbf16> -> vector<256x1152xbf16>
    %c0_3 = arith.constant 0 : index
    %c0_4 = arith.constant 0 : index
    %20 = vector.load %arg2[%c0_3, %c0_4] : memref<1152x128xbf16, #tpu.memory_space<vmem>>, vector<1152x128xbf16>
    %cst = arith.constant dense<0.000000e+00> : vector<256x128xf32>
    %21 = tpu.matmul %19, %20, %cst {dimension_numbers = #tpu.dot_dimension_numbers<[1], [0], [0], [1], [0, 0, 1, 1], [], []>} : vector<256x1152xbf16>, vector<1152x128xbf16>, vector<256x128xf32> -> vector<256x128xf32>
    %cst_5 = arith.constant dense<0.000000e+00> : vector<128xf32>
    %22 = vector.multi_reduction <add>, %21, %cst_5 [0] : vector<256x128xf32> to vector<128xf32>
    %23 = vector.shape_cast %22 : vector<128xf32> to vector<1x128xf32>
    %c0_6 = arith.constant 0 : index
    %c0_7 = arith.constant 0 : index
    %c0_8 = arith.constant 0 : index
    %24 = vector.load %arg4[%c0_6, %c0_7, %c0_8] : memref<1x2x128xf32, #tpu.memory_space<vmem>>, vector<1x1x128xf32>
    %25 = vector.shape_cast %24 : vector<1x1x128xf32> to vector<1x128xf32>
    %26 = vector.shape_cast %23 : vector<1x128xf32> to vector<1x1x128xf32>
    tpu.vector_store %arg4[%c0_6, %c0_7, %c0_8], %26 {strides = array<i32>} : memref<1x2x128xf32, #tpu.memory_space<vmem>>, vector<1x1x128xf32>,
    %27 = arith.mulf %21, %21 : vector<256x128xf32>
    %cst_9 = arith.constant dense<0.000000e+00> : vector<128xf32>
    %28 = vector.multi_reduction <add>, %27, %cst_9 [0] : vector<256x128xf32> to vector<128xf32>
    %29 = vector.shape_cast %28 : vector<128xf32> to vector<1x128xf32>
    %c0_10 = arith.constant 0 : index
    %c1 = arith.constant 1 : index
    %c0_11 = arith.constant 0 : index
    %30 = vector.load %arg4[%c0_10, %c1, %c0_11] : memref<1x2x128xf32, #tpu.memory_space<vmem>>, vector<1x1x128xf32>
    %31 = vector.shape_cast %30 : vector<1x1x128xf32> to vector<1x128xf32>
    %32 = vector.shape_cast %29 : vector<1x128xf32> to vector<1x1x128xf32>
    tpu.vector_store %arg4[%c0_10, %c1, %c0_11], %32 {strides = array<i32>} : memref<1x2x128xf32, #tpu.memory_space<vmem>>, vector<1x1x128xf32>,
    %33 = vector.shape_cast %21 : vector<256x128xf32> to vector<16x16x128xf32>
    %34 = arith.truncf %33 : vector<16x16x128xf32> to vector<16x16x128xbf16>
    %c0_12 = arith.constant 0 : index
    %c0_13 = arith.constant 0 : index
    %c0_14 = arith.constant 0 : index
    %c0_15 = arith.constant 0 : index
    %35 = vector.load %arg3[%c0_12, %c0_13, %c0_14, %c0_15] : memref<1x16x16x128xbf16, #tpu.memory_space<vmem>>, vector<1x16x16x128xbf16>
    %36 = vector.shape_cast %35 : vector<1x16x16x128xbf16> to vector<16x16x128xbf16>
    %37 = vector.shape_cast %34 : vector<16x16x128xbf16> to vector<1x16x16x128xbf16>
    tpu.vector_store %arg3[%c0_12, %c0_13, %c0_14, %c0_15], %37 {strides = array<i32>} : memref<1x16x16x128xbf16, #tpu.memory_space<vmem>>, vector<1x16x16x128xbf16>,
    return
  }
  func.func @transform_0(%arg0: i32) -> (i32, i32, i32, i32) {
    %c0_i32 = arith.constant 0 : i32
    %c0_i32_0 = arith.constant 0 : i32
    %c0_i32_1 = arith.constant 0 : i32
    %c0_i32_2 = arith.constant 0 : i32
    return %arg0, %c0_i32, %c0_i32_0, %c0_i32_1 : i32, i32, i32, i32
  }
  func.func @transform_1(%arg0: i32) -> (i32, i32) {
    %c0_i32 = arith.constant 0 : i32
    %c0_i32_0 = arith.constant 0 : i32
    %c0_i32_1 = arith.constant 0 : i32
    return %c0_i32, %c0_i32_0 : i32, i32
  }
  func.func @transform_2(%arg0: i32) -> (i32, i32, i32, i32) {
    %c0_i32 = arith.constant 0 : i32
    %c0_i32_0 = arith.constant 0 : i32
    %c0_i32_1 = arith.constant 0 : i32
    %c0_i32_2 = arith.constant 0 : i32
    return %arg0, %c0_i32, %c0_i32_0, %c0_i32_1 : i32, i32, i32, i32
  }
  func.func @transform_3(%arg0: i32) -> (i32, i32, i32) {
    %c0_i32 = arith.constant 0 : i32
    %c0_i32_0 = arith.constant 0 : i32
    %c0_i32_1 = arith.constant 0 : i32
    return %arg0, %c0_i32, %c0_i32_0 : i32, i32, i32
  }
}

module attributes {stable_mosaic.version = 11 : i64} {
  func.func @_bn_residual_kernel(%arg0: i32, %arg1: memref<1x16x16x128xf32, #tpu.memory_space<vmem>>, %arg2: memref<1x16x16x128xbf16, #tpu.memory_space<vmem>>, %arg3: memref<1x128xf32, #tpu.memory_space<vmem>>, %arg4: memref<1x128xf32, #tpu.memory_space<vmem>>, %arg5: memref<1x16x16x128xf32, #tpu.memory_space<vmem>>) attributes {dimension_semantics = [#tpu.dimension_semantics<parallel>], iteration_bounds = array<i64: 2>, scalar_prefetch = 0 : i64, scratch_operands = 0 : i64, tpu.core_type = #tpu.core_type<tc>, window_params = [{transform_indices = @transform_0, window_bounds = array<i64: 1, 16, 16, 128>}, {transform_indices = @transform_1, window_bounds = array<i64: 1, 16, 16, 128>}, {pipeline_mode = #tpu.pipeline_mode<synchronous>, transform_indices = @transform_2, window_bounds = array<i64: 1, 128>}, {pipeline_mode = #tpu.pipeline_mode<synchronous>, transform_indices = @transform_3, window_bounds = array<i64: 1, 128>}, {transform_indices = @transform_4, window_bounds = array<i64: 1, 16, 16, 128>}]} {
    %c0 = arith.constant 0 : index
    %c0_0 = arith.constant 0 : index
    %c0_1 = arith.constant 0 : index
    %c0_2 = arith.constant 0 : index
    %0 = vector.load %arg2[%c0, %c0_0, %c0_1, %c0_2] : memref<1x16x16x128xbf16, #tpu.memory_space<vmem>>, vector<1x16x16x128xbf16>
    %1 = vector.shape_cast %0 : vector<1x16x16x128xbf16> to vector<16x16x128xbf16>
    %2 = arith.extf %1 : vector<16x16x128xbf16> to vector<16x16x128xf32>
    %c0_3 = arith.constant 0 : index
    %c0_4 = arith.constant 0 : index
    %c0_5 = arith.constant 0 : index
    %c0_6 = arith.constant 0 : index
    %3 = vector.load %arg1[%c0_3, %c0_4, %c0_5, %c0_6] : memref<1x16x16x128xf32, #tpu.memory_space<vmem>>, vector<1x16x16x128xf32>
    %4 = vector.shape_cast %3 : vector<1x16x16x128xf32> to vector<16x16x128xf32>
    %c0_7 = arith.constant 0 : index
    %c0_8 = arith.constant 0 : index
    %5 = vector.load %arg3[%c0_7, %c0_8] : memref<1x128xf32, #tpu.memory_space<vmem>>, vector<1x128xf32>
    %6 = vector.shape_cast %5 : vector<1x128xf32> to vector<1x1x128xf32>
    %7 = vector.broadcast %6 : vector<1x1x128xf32> to vector<16x16x128xf32>
    %8 = arith.mulf %2, %7 : vector<16x16x128xf32>
    %9 = arith.addf %4, %8 : vector<16x16x128xf32>
    %c0_9 = arith.constant 0 : index
    %c0_10 = arith.constant 0 : index
    %10 = vector.load %arg4[%c0_9, %c0_10] : memref<1x128xf32, #tpu.memory_space<vmem>>, vector<1x128xf32>
    %11 = vector.shape_cast %10 : vector<1x128xf32> to vector<1x1x128xf32>
    %12 = vector.broadcast %11 : vector<1x1x128xf32> to vector<16x16x128xf32>
    %13 = arith.addf %9, %12 : vector<16x16x128xf32>
    %c0_11 = arith.constant 0 : index
    %c0_12 = arith.constant 0 : index
    %c0_13 = arith.constant 0 : index
    %c0_14 = arith.constant 0 : index
    %14 = vector.load %arg5[%c0_11, %c0_12, %c0_13, %c0_14] : memref<1x16x16x128xf32, #tpu.memory_space<vmem>>, vector<1x16x16x128xf32>
    %15 = vector.shape_cast %14 : vector<1x16x16x128xf32> to vector<16x16x128xf32>
    %16 = vector.shape_cast %13 : vector<16x16x128xf32> to vector<1x16x16x128xf32>
    tpu.vector_store %arg5[%c0_11, %c0_12, %c0_13, %c0_14], %16 {strides = array<i32>} : memref<1x16x16x128xf32, #tpu.memory_space<vmem>>, vector<1x16x16x128xf32>,
    return
  }
  func.func @transform_0(%arg0: i32) -> (i32, i32, i32, i32) {
    %c0_i32 = arith.constant 0 : i32
    %c0_i32_0 = arith.constant 0 : i32
    %c0_i32_1 = arith.constant 0 : i32
    %c0_i32_2 = arith.constant 0 : i32
    return %arg0, %c0_i32, %c0_i32_0, %c0_i32_1 : i32, i32, i32, i32
  }
  func.func @transform_1(%arg0: i32) -> (i32, i32, i32, i32) {
    %c0_i32 = arith.constant 0 : i32
    %c0_i32_0 = arith.constant 0 : i32
    %c0_i32_1 = arith.constant 0 : i32
    %c0_i32_2 = arith.constant 0 : i32
    return %arg0, %c0_i32, %c0_i32_0, %c0_i32_1 : i32, i32, i32, i32
  }
  func.func @transform_2(%arg0: i32) -> (i32, i32) {
    %c0_i32 = arith.constant 0 : i32
    %c0_i32_0 = arith.constant 0 : i32
    %c0_i32_1 = arith.constant 0 : i32
    return %c0_i32, %c0_i32_0 : i32, i32
  }
  func.func @transform_3(%arg0: i32) -> (i32, i32) {
    %c0_i32 = arith.constant 0 : i32
    %c0_i32_0 = arith.constant 0 : i32
    %c0_i32_1 = arith.constant 0 : i32
    return %c0_i32, %c0_i32_0 : i32, i32
  }
  func.func @transform_4(%arg0: i32) -> (i32, i32, i32, i32) {
    %c0_i32 = arith.constant 0 : i32
    %c0_i32_0 = arith.constant 0 : i32
    %c0_i32_1 = arith.constant 0 : i32
    %c0_i32_2 = arith.constant 0 : i32
    return %arg0, %c0_i32, %c0_i32_0, %c0_i32_1 : i32, i32, i32, i32
  }
}

</mosaic_0001>

<bundles_post_ra>
// kernel: _lambda_.5
= control target key start
LH: loop header
LB: loop body
LE: loop exit
PB: predicated region body
PF: predicated region fallthrough
CT: control target
= control target key end

     0   :  { %9 = vsyncpa [#allocation3], 0  ;;  %s1047_s0 = inlined_call_operand.vmem [shape: f32[2,16,16,128], index: 0, kind: input, shape index: {}]   ;;  %s1048_s1 = inlined_call_operand.vmem [shape: bf16[2,16,16,128], index: 1, kind: input, shape index: {}]   ;;  %s1049_s2 = inlined_call_operand.vmem [shape: f32[1,128], index: 2, kind: input, shape index: {}]   ;;  %s1050_s3 = inlined_call_operand.vmem [shape: f32[1,128], index: 3, kind: input, shape index: {}]   ;;  %s1051_s4 = inlined_call_operand.hbm [shape: f32[2,16,16,128], index: 4, kind: output, shape index: {}]  }
   0x1   :  { %11 = vsyncpa [#allocation3 + $0x1], 0  ;;  %s773_s15 = smov 0   ;;  %s775_s16 = smov 0  }
   0x2   :  { %s777_s17 = smov 0   ;;  %s779_s18 = smov 0  }
   0x3 LB: > { %s794_s19 = sadd.s32 4294967295, %s743_s18   ;;  %s542_s20 = sadd.s32 4294967294, %s743_s18   ;;  %s743_s18 = sphi %s779_s18, %s1057_s18   ;;  %s739_s17 = sphi %s777_s17, %s1056_s17   ;;  %s735_s16 = sphi %s775_s16, %s1055_s16   ;;  %s731_s15 = sphi %s773_s15, %s1054_s15  }
   0x4   : > { %s798_s21 = sadd.s32 1, %s743_s18   ;;  %s118_s22 = sadd.s32 1, %s739_s17 }
   0x5   : > { %s115_s23 = ssub.s32 %s743_s18, %s798_s21  ;;  %p128_p0 = scmp.ne.s32.totalorder %s739_s17, %s735_s16 }
   0x6   : > { %p116_p1 = scmp.eq.s32.totalorder %s115_s23, 0  ;;  %p129_p2 = scmp.eq.s32.totalorder %s794_s19, 1 }
   0x7   : > { %p134_p3 = scmp.ne.s32.totalorder %s735_s16, %s731_s15  ;;  %p135_p4 = scmp.eq.s32.totalorder %s542_s20, 1 }
   0x8   : > { %s809_s24 = scalar_select %p116_p1, %s739_s17, %s118_s22  }
   0x9   : > { %p811_p5 = por %p129_p2, %p128_p0  ;;  %p815_p6 = por %p135_p4, %p134_p3 }
   0xa   : > { %p545_p7 = scmp.ge.s32.totalorder %s743_s18, 1  ;;  %p175_p8 = scmp.lt.s32.totalorder %s743_s18, 3 }
   0xc   : > { %p176_p9 = pnand %p545_p7, %p175_p8 }
   0xd   : > { %p206_p10 = scmp.lt.s32.totalorder (!%p176_p9), %s794_s19, 1  ;;  %s203_s10 = sand.u32 (!%p176_p9), 1, %s735_s16   ;;  %v838_v1 = vld [vmem:[%s1049_s2] ss:$0 sm:$0xff] (!%p176_p9) }
   0xe   : > { %179 = sbr.rel (%p176_p9) target bundleno = 76 (0x4c), region = 36  ;;  %s846_s13 = sshll.u32 (!%p176_p9), %s203_s10, 8  ;;  %v856_v17 = vld [vmem:[%s1050_s3] ss:$0 sm:$0xff] (!%p176_p9) }
   0xf   : > { %s876_s22 = scalar_lea.vmem (!%p176_p9), [#allocation2], %s846_s13  ;;  %s560_s23 = sshll.u32 (!%p176_p9), %s794_s19, 12 }
  0x10   : > { %s1006_s30 = scalar_lea.sflag (!%p176_p9), [#allocation3], %s203_s10 }
  0x15   : > { %s207_s27 = scalar_select %p206_p10, %s794_s19, 1 }
  0x17   : > { %s558_s28 = sshll.u32 %s207_s27, 8  ;;  %s559_s29 = sshll.u32 %s207_s27, 7 }
  0x18   : > { %s826_s6 = scalar_lea.vmem %s1047_s0, %s558_s28  ;;  %s831_s9 = scalar_lea.vmem %s1048_s1, %s559_s29 }
  0x19   : > { %v562_v0 = vld [vmem:[%s831_s9] sm:$0xff]   ;;  %v625_v4 = vld [vmem:[%s831_s9 + $0x8] sm:$0xff]   ;;  %v626_v9 = vld [vmem:[%s831_s9 + $0x10] sm:$0xff]   ;;  %s468_s27 = sshll.u32 %s876_s22, 4  ;;  %s992_s29 = scalar_lea.hbm %s1051_s4, %s560_s23  ;;  %s994_s27 = int_to_ptr.vmem [resolvable:$true] %s468_s27 }
  0x1a   : > { %v563_v2 = vunpack.c.l.bf16 %v562_v0  ;;  %v564_v3 = vunpack.c.h.bf16 %v562_v0  ;;  %v280_v5 = vld [vmem:[%s826_s6] sm:$0xff]  ;;  %v281_v6 = vld [vmem:[%s826_s6 + $0x8] sm:$0xff]  ;;  %v567_v7 = vunpack.c.l.bf16 %v625_v4  ;;  %v568_v8 = vunpack.c.h.bf16 %v625_v4  ;;  %v282_v12 = vld [vmem:[%s826_s6 + $0x10] sm:$0xff]  ;;  %s681_s5 = scalar_lea.vmem %s994_s27, 4096 }
  0x1b   : > { %v283_v13 = vld [vmem:[%s826_s6 + $0x18] sm:$0xff]  ;;  %v571_v14 = vunpack.c.l.bf16 %v626_v9  ;;  %v572_v15 = vunpack.c.h.bf16 %v626_v9  ;;  %v284_v20 = vld [vmem:[%s826_s6 + $0x20] sm:$0xff]  ;;  %v285_v21 = vld [vmem:[%s826_s6 + $0x28] sm:$0xff]  ;;  %p682_p11 = scmp.ne.s32.totalorder %s994_s27, %s681_s5 }
  0x1c   : > { %v319_v10 = vmul.f32 %v563_v2, %v838_v1  ;;  %v320_v11 = vmul.f32 %v564_v3, %v838_v1  ;;  %v627_v16 = vld [vmem:[%s831_s9 + $0x18] sm:$0xff]   ;;  %v321_v18 = vmul.f32 %v567_v7, %v838_v1  ;;  %v322_v19 = vmul.f32 %v568_v8, %v838_v1  ;;  %v286_v28 = vld [vmem:[%s826_s6 + $0x30] sm:$0xff]  ;;  %v628_v34 = vld [vmem:[%s831_s9 + $0x20] sm:$0xff]  }
  0x1d   : > { %v575_v22 = vunpack.c.l.bf16 %v627_v16  ;;  %v576_v23 = vunpack.c.h.bf16 %v627_v16  ;;  %v323_v26 = vmul.f32 %v571_v14, %v838_v1  ;;  %v324_v27 = vmul.f32 %v572_v15, %v838_v1  ;;  %v287_v29 = vld [vmem:[%s826_s6 + $0x38] sm:$0xff]  ;;  %v629_v39 = vld [vmem:[%s831_s9 + $0x28] sm:$0xff]   ;;  %v630_v44 = vld [vmem:[%s831_s9 + $0x30] sm:$0xff]   ;;  %p683_p12 = pnand %p682_p11, %p811_p5 }
  0x1e   : > { %v351_v24 = vadd.f32 %v319_v10, %v280_v5  ;;  %v352_v25 = vadd.f32 %v320_v11, %v281_v6  ;;  %v353_v30 = vadd.f32 %v321_v18, %v282_v12  ;;  %v354_v31 = vadd.f32 %v322_v19, %v283_v13  ;;  %v631_v49 = vld [vmem:[%s831_s9 + $0x38] sm:$0xff]   ;;  %v288_v52 = vld [vmem:[%s826_s6 + $0x40] sm:$0xff]  ;;  %v289_v53 = vld [vmem:[%s826_s6 + $0x48] sm:$0xff] }
  0x1f   : > { %v325_v32 = vmul.f32 %v575_v22, %v838_v1  ;;  %v326_v33 = vmul.f32 %v576_v23, %v838_v1  ;;  %v355_v37 = vadd.f32 %v323_v26, %v284_v20  ;;  %v356_v38 = vadd.f32 %v324_v27, %v285_v21  ;;  %v290_v58 = vld [vmem:[%s826_s6 + $0x50] sm:$0xff]  ;;  %v291_v59 = vld [vmem:[%s826_s6 + $0x58] sm:$0xff]  ;;  %v292_v0 = vld [vmem:[%s826_s6 + $0x60] sm:$0xff]  ;;  %p684_p13 = pneg %p683_p12 }
  0x20   : > { %v390_v35 = vadd.f32 %v856_v17, %v351_v24  ;;  %v391_v36 = vadd.f32 %v856_v17, %v352_v25  ;;  %v392_v40 = vadd.f32 %v856_v17, %v353_v30  ;;  %v393_v41 = vadd.f32 %v856_v17, %v354_v31  ;;  %v293_v2 = vld [vmem:[%s826_s6 + $0x68] sm:$0xff]  ;;  %v294_v9 = vld [vmem:[%s826_s6 + $0x70] sm:$0xff]  ;;  %v295_v10 = vld [vmem:[%s826_s6 + $0x78] sm:$0xff] }
  0x21   : > { %v357_v42 = vadd.f32 %v325_v32, %v286_v28  ;;  %v358_v43 = vadd.f32 %v326_v33, %v287_v29  ;;  %v394_v45 = vadd.f32 %v856_v17, %v355_v37  ;;  %v395_v46 = vadd.f32 %v856_v17, %v356_v38  ;;  %v632_v15 = vld [vmem:[%s831_s9 + $0x40] sm:$0xff]   ;;  %v633_v21 = vld [vmem:[%s831_s9 + $0x48] sm:$0xff]   ;;  %v634_v26 = vld [vmem:[%s831_s9 + $0x50] sm:$0xff]  }
  0x22   : > { %422 = vst [vmem:[%s876_s22] sm:$0xff] %v390_v35  ;;  %423 = vst [vmem:[%s876_s22 + $0x8] sm:$0xff] %v391_v36  ;;  %v579_v47 = vunpack.c.l.bf16 %v628_v34  ;;  %v580_v48 = vunpack.c.h.bf16 %v628_v34  ;;  %v583_v54 = vunpack.c.l.bf16 %v629_v39  ;;  %v584_v55 = vunpack.c.h.bf16 %v629_v39  ;;  %v635_v31 = vld [vmem:[%s831_s9 + $0x58] sm:$0xff]   ;;  %v296_v34 = vld [vmem:[%s826_s6 + $0x80] sm:$0xff] }
  0x23   : > { %424 = vst [vmem:[%s876_s22 + $0x10] sm:$0xff] %v392_v40  ;;  %425 = vst [vmem:[%s876_s22 + $0x18] sm:$0xff] %v393_v41  ;;  %v396_v50 = vadd.f32 %v856_v17, %v357_v42  ;;  %v397_v51 = vadd.f32 %v856_v17, %v358_v43  ;;  %v587_v60 = vunpack.c.l.bf16 %v630_v44  ;;  %v588_v61 = vunpack.c.h.bf16 %v630_v44  ;;  %v297_v35 = vld [vmem:[%s826_s6 + $0x88] sm:$0xff]  ;;  %v298_v40 = vld [vmem:[%s826_s6 + $0x90] sm:$0xff] }
  0x24   : > { %426 = vst [vmem:[%s876_s22 + $0x20] sm:$0xff] %v394_v45  ;;  %427 = vst [vmem:[%s876_s22 + $0x28] sm:$0xff] %v395_v46  ;;  %v327_v56 = vmul.f32 %v579_v47, %v838_v1  ;;  %v328_v57 = vmul.f32 %v580_v48, %v838_v1  ;;  %v329_v62 = vmul.f32 %v583_v54, %v838_v1  ;;  %v591_v3 = vunpack.c.l.bf16 %v631_v49  ;;  %v299_v41 = vld [vmem:[%s826_s6 + $0x98] sm:$0xff]  ;;  %v300_v46 = vld [vmem:[%s826_s6 + $0xa0] sm:$0xff] }
  0x25   : > { %428 = vst [vmem:[%s876_s22 + $0x30] sm:$0xff] %v396_v50  ;;  %429 = vst [vmem:[%s876_s22 + $0x38] sm:$0xff] %v397_v51  ;;  %v330_v63 = vmul.f32 %v584_v55, %v838_v1  ;;  %v592_v4 = vunpack.c.h.bf16 %v631_v49  ;;  %v331_v7 = vmul.f32 %v587_v60, %v838_v1  ;;  %v332_v8 = vmul.f32 %v588_v61, %v838_v1  ;;  %v301_v47 = vld [vmem:[%s826_s6 + $0xa8] sm:$0xff]  ;;  %v302_v54 = vld [vmem:[%s826_s6 + $0xb0] sm:$0xff] }
  0x26   : > { %v359_v5 = vadd.f32 %v327_v56, %v288_v52  ;;  %v360_v6 = vadd.f32 %v328_v57, %v289_v53  ;;  %v361_v11 = vadd.f32 %v329_v62, %v290_v58  ;;  %v333_v13 = vmul.f32 %v591_v3, %v838_v1  ;;  %v303_v55 = vld [vmem:[%s826_s6 + $0xb8] sm:$0xff]  ;;  %v636_v60 = vld [vmem:[%s831_s9 + $0x60] sm:$0xff]  }
  0x27   : > { %v362_v12 = vadd.f32 %v330_v63, %v291_v59  ;;  %v334_v14 = vmul.f32 %v592_v4, %v838_v1  ;;  %v363_v19 = vadd.f32 %v331_v7, %v292_v0  ;;  %v364_v20 = vadd.f32 %v332_v8, %v293_v2  ;;  %v637_v2 = vld [vmem:[%s831_s9 + $0x68] sm:$0xff]   ;;  %v638_v7 = vld [vmem:[%s831_s9 + $0x70] sm:$0xff]  }
  0x28   : > { %v398_v16 = vadd.f32 %v856_v17, %v359_v5  ;;  %v399_v18 = vadd.f32 %v856_v17, %v360_v6  ;;  %v400_v22 = vadd.f32 %v856_v17, %v361_v11  ;;  %v365_v24 = vadd.f32 %v333_v13, %v294_v9 }
  0x29   : > { %v401_v23 = vadd.f32 %v856_v17, %v362_v12  ;;  %v366_v25 = vadd.f32 %v334_v14, %v295_v10  ;;  %v402_v27 = vadd.f32 %v856_v17, %v363_v19  ;;  %v403_v28 = vadd.f32 %v856_v17, %v364_v20  ;;  %v639_v12 = vld [vmem:[%s831_s9 + $0x78] sm:$0xff]  }
  0x2a   : > { %430 = vst [vmem:[%s876_s22 + $0x40] sm:$0xff] %v398_v16  ;;  %431 = vst [vmem:[%s876_s22 + $0x48] sm:$0xff] %v399_v18  ;;  %v595_v29 = vunpack.c.l.bf16 %v632_v15  ;;  %v596_v30 = vunpack.c.h.bf16 %v632_v15  ;;  %v404_v32 = vadd.f32 %v856_v17, %v365_v24  ;;  %v599_v36 = vunpack.c.l.bf16 %v633_v21  ;;  %v304_v15 = vld [vmem:[%s826_s6 + $0xc0] sm:$0xff]  ;;  %v305_v16 = vld [vmem:[%s826_s6 + $0xc8] sm:$0xff] }
  0x2b   : > { %432 = vst [vmem:[%s876_s22 + $0x50] sm:$0xff] %v400_v22  ;;  %433 = vst [vmem:[%s876_s22 + $0x58] sm:$0xff] %v401_v23  ;;  %v405_v33 = vadd.f32 %v856_v17, %v366_v25  ;;  %v600_v37 = vunpack.c.h.bf16 %v633_v21  ;;  %v603_v42 = vunpack.c.l.bf16 %v634_v26  ;;  %v604_v43 = vunpack.c.h.bf16 %v634_v26  ;;  %v306_v22 = vld [vmem:[%s826_s6 + $0xd0] sm:$0xff]  ;;  %v307_v23 = vld [vmem:[%s826_s6 + $0xd8] sm:$0xff] }
  0x2c   : > { %434 = vst [vmem:[%s876_s22 + $0x60] sm:$0xff] %v402_v27  ;;  %435 = vst [vmem:[%s876_s22 + $0x68] sm:$0xff] %v403_v28  ;;  %v335_v38 = vmul.f32 %v595_v29, %v838_v1  ;;  %v336_v39 = vmul.f32 %v596_v30, %v838_v1  ;;  %v337_v44 = vmul.f32 %v599_v36, %v838_v1  ;;  %v607_v48 = vunpack.c.l.bf16 %v635_v31  ;;  %v308_v28 = vld [vmem:[%s826_s6 + $0xe0] sm:$0xff]  ;;  %v309_v29 = vld [vmem:[%s826_s6 + $0xe8] sm:$0xff] }
  0x2d   : > { %436 = vst [vmem:[%s876_s22 + $0x70] sm:$0xff] %v404_v32  ;;  %437 = vst [vmem:[%s876_s22 + $0x78] sm:$0xff] %v405_v33  ;;  %v338_v45 = vmul.f32 %v600_v37, %v838_v1  ;;  %v608_v49 = vunpack.c.h.bf16 %v635_v31  ;;  %v339_v52 = vmul.f32 %v603_v42, %v838_v1  ;;  %v340_v53 = vmul.f32 %v604_v43, %v838_v1  ;;  %v310_v36 = vld [vmem:[%s826_s6 + $0xf0] sm:$0xff]  ;;  %v311_v37 = vld [vmem:[%s826_s6 + $0xf8] sm:$0xff]  ;;  %s745_s6 = smov [#allocation2]  }
  0x2e   : > { %v367_v50 = vadd.f32 %v335_v38, %v296_v34  ;;  %v368_v51 = vadd.f32 %v336_v39, %v297_v35  ;;  %v369_v56 = vadd.f32 %v337_v44, %v298_v40  ;;  %v341_v58 = vmul.f32 %v607_v48, %v838_v1  ;;  %s685_s7 = sshll.u32 %s745_s6, 4  ;;  %s686_s7 = int_to_ptr.vmem [resolvable:$false] %s685_s7 }
  0x2f   : > { %v370_v57 = vadd.f32 %v338_v45, %v299_v41  ;;  %v342_v59 = vmul.f32 %v608_v49, %v838_v1  ;;  %v371_v63 = vadd.f32 %v339_v52, %v300_v46  ;;  %v372_v0 = vadd.f32 %v340_v53, %v301_v47  ;;  %s687_s8 = scalar_lea.vmem %s686_s7, 8192  ;;  %p688_p0 = scmp.lt.s32.totalorder %s994_s27, %s686_s7 }
  0x30   : > { %v406_v61 = vadd.f32 %v856_v17, %v367_v50  ;;  %v407_v62 = vadd.f32 %v856_v17, %v368_v51  ;;  %v408_v3 = vadd.f32 %v856_v17, %v369_v56  ;;  %v373_v5 = vadd.f32 %v341_v58, %v302_v54  ;;  %p689_p1 = scmp.lt.s32.totalorder %s687_s8, %s681_s5 }
  0x31   : > { %v409_v4 = vadd.f32 %v856_v17, %v370_v57  ;;  %v374_v6 = vadd.f32 %v342_v59, %v303_v55  ;;  %v410_v8 = vadd.f32 %v856_v17, %v371_v63  ;;  %v411_v9 = vadd.f32 %v856_v17, %v372_v0 }
  0x32   : > { %438 = vst [vmem:[%s876_s22 + $0x80] sm:$0xff] %v406_v61  ;;  %439 = vst [vmem:[%s876_s22 + $0x88] sm:$0xff] %v407_v62  ;;  %v611_v10 = vunpack.c.l.bf16 %v636_v60  ;;  %v612_v11 = vunpack.c.h.bf16 %v636_v60  ;;  %v412_v13 = vadd.f32 %v856_v17, %v373_v5  ;;  %v615_v18 = vunpack.c.l.bf16 %v637_v2  ;;  %p690_p2 = por %p689_p1, %p688_p0 }
  0x33   : > { %440 = vst [vmem:[%s876_s22 + $0x90] sm:$0xff] %v408_v3  ;;  %441 = vst [vmem:[%s876_s22 + $0x98] sm:$0xff] %v409_v4  ;;  %v413_v14 = vadd.f32 %v856_v17, %v374_v6  ;;  %v616_v19 = vunpack.c.h.bf16 %v637_v2  ;;  %v619_v24 = vunpack.c.l.bf16 %v638_v7  ;;  %v620_v25 = vunpack.c.h.bf16 %v638_v7 }
  0x34   : > { %442 = vst [vmem:[%s876_s22 + $0xa0] sm:$0xff] %v410_v8  ;;  %443 = vst [vmem:[%s876_s22 + $0xa8] sm:$0xff] %v411_v9  ;;  %v343_v20 = vmul.f32 %v611_v10, %v838_v1  ;;  %v344_v21 = vmul.f32 %v612_v11, %v838_v1  ;;  %v345_v26 = vmul.f32 %v615_v18, %v838_v1  ;;  %v623_v30 = vunpack.c.l.bf16 %v639_v12  ;;  %p691_p3 = pnand %p690_p2, %p684_p13 }
  0x35   : > { %444 = vst [vmem:[%s876_s22 + $0xb0] sm:$0xff] %v412_v13  ;;  %445 = vst [vmem:[%s876_s22 + $0xb8] sm:$0xff] %v413_v14  ;;  %v346_v27 = vmul.f32 %v616_v19, %v838_v1  ;;  %v624_v31 = vunpack.c.h.bf16 %v639_v12  ;;  %v347_v34 = vmul.f32 %v619_v24, %v838_v1  ;;  %v348_v35 = vmul.f32 %v620_v25, %v838_v1 }
  0x36   : > { %v375_v32 = vadd.f32 %v343_v20, %v304_v15  ;;  %v376_v33 = vadd.f32 %v344_v21, %v305_v16  ;;  %v377_v38 = vadd.f32 %v345_v26, %v306_v22  ;;  %v349_v40 = vmul.f32 %v623_v30, %v838_v1 }
  0x37   : > { %v378_v39 = vadd.f32 %v346_v27, %v307_v23  ;;  %v350_v41 = vmul.f32 %v624_v31, %v838_v1  ;;  %v379_v44 = vadd.f32 %v347_v34, %v308_v28  ;;  %v380_v45 = vadd.f32 %v348_v35, %v309_v29 }
  0x38   : > { %v414_v42 = vadd.f32 %v856_v17, %v375_v32  ;;  %v415_v43 = vadd.f32 %v856_v17, %v376_v33  ;;  %v416_v46 = vadd.f32 %v856_v17, %v377_v38  ;;  %v381_v48 = vadd.f32 %v349_v40, %v310_v36 }
  0x39   : > { %v417_v47 = vadd.f32 %v856_v17, %v378_v39  ;;  %v382_v1 = vadd.f32 %v350_v41, %v311_v37  ;;  %v418_v49 = vadd.f32 %v856_v17, %v379_v44  ;;  %v419_v50 = vadd.f32 %v856_v17, %v380_v45 }
  0x3a   : > { %446 = vst [vmem:[%s876_s22 + $0xc0] sm:$0xff] %v414_v42  ;;  %447 = vst [vmem:[%s876_s22 + $0xc8] sm:$0xff] %v415_v43  ;;  %v420_v51 = vadd.f32 %v856_v17, %v381_v48 }
  0x3b   : > { %448 = vst [vmem:[%s876_s22 + $0xd0] sm:$0xff] %v416_v46  ;;  %449 = vst [vmem:[%s876_s22 + $0xd8] sm:$0xff] %v417_v47  ;;  %v421_v52 = vadd.f32 %v856_v17, %v382_v1 }
  0x3c   : > { %450 = vst [vmem:[%s876_s22 + $0xe0] sm:$0xff] %v418_v49  ;;  %451 = vst [vmem:[%s876_s22 + $0xe8] sm:$0xff] %v419_v50 }
  0x3d   : > { %452 = vst [vmem:[%s876_s22 + $0xf0] sm:$0xff] %v420_v51  ;;  %453 = vst [vmem:[%s876_s22 + $0xf8] sm:$0xff] %v421_v52 }
  0x3e   : > { %694 = shalt.err (!%p691_p3)
}
  0x3f   : > { %s695_s9 = scalar_lea.hbm %s992_s29, 4096  ;;  %s699_s12 = scalar_lea.hbm %s1051_s4, 8192 }
  0x40   : > { %p696_p4 = scmp.ne.s32.totalorder %s992_s29, %s695_s9  ;;  %p700_p9 = scmp.lt.u32.totalorder %s992_s29, %s1051_s4 }
  0x41   : > { %p701_p10 = scmp.lt.u32.totalorder %s699_s12, %s695_s9  ;;  %p703_p12 = scmp.lt.u32.totalorder %s695_s9, %s992_s29 }
  0x42   : > { %p697_p7 = pnand %p696_p4, %p811_p5 }
  0x43   : > { %p702_p11 = por %p701_p10, %p700_p9 }
  0x44   : > { %p698_p8 = pneg %p697_p7 }
  0x45   : > { %p704_p13 = por %p703_p12, %p702_p11 }
  0x47   : > { %p705_p0 = pnand %p704_p13, %p698_p8 }
  0x49   : > { %708 = shalt.err (!%p705_p0)
}
  0x4a   : > { %s746_s20 = smov 128   ;;  %s747_s22 = smov 8  }
  0x4b   : > { %640 = dma.vmem_to_hbm [thread:$0]  (%p811_p5), %s994_s27, 4096, %s992_s29, %s1006_s30, %s746_s20, %s746_s20, %s747_s22  }
  0x4c PF: > { %p646_p1 = scmp.ge.s32.totalorder %s743_s18, 2  ;;  %s483_s23 = sand.u32 1, %s731_s15  }
  0x4d   : > { %s484_s19 = scalar_lea.sflag [#allocation3], %s483_s23 }
  0x4e   : > { %p643_p2 = pnand %p646_p1, %p815_p6 }
  0x50   : > { %726 = dma.done.wait (!%p643_p2), %s484_s19, 4096  }
  0x51   : > { %728 = vsyncadd (!%p643_p2), %s484_s19, 4294963200  ;;  %p14_p3 = scmp.ge.s32.totalorder %s798_s21, 4   ;;  %s1054_s15 = smov %s735_s16 }
  0x52   : > { %s1055_s16 = smov %s739_s17  ;;  %s1056_s17 = smov %s809_s24 }
  0x53   : > { %s1057_s18 = smov %s798_s21  ;;  %16 = sbr.rel (!%p14_p3) target bundleno = 3 (0x3), region = 74 }
  0x5a   :  { %489 = vsyncpa [#allocation3], 1 }
  0x5b   :  { %491 = vsyncpa [#allocation3 + $0x1], 1 }

// kernel: _lambda_.3
= control target key start
LH: loop header
LB: loop body
LE: loop exit
PB: predicated region body
PF: predicated region fallthrough
CT: control target
= control target key end

     0   :  { %9 = vsyncpa [#allocation3], 0  ;;  %s4309_s0 = inlined_call_operand.hbm [shape: f32[2,16,16,128], index: 0, kind: input, shape index: {}]   ;;  %s4310_s1 = inlined_call_operand.hbm [shape: bf16[1152,128], index: 1, kind: input, shape index: {}]   ;;  %s4311_s2 = inlined_call_operand.vmem [shape: bf16[2,16,16,128], index: 2, kind: output, shape index: {0}]   ;;  %s4312_s3 = inlined_call_operand.vmem [shape: f32[2,2,128], index: 3, kind: output, shape index: {1}]  }
   0x1   :  { %11 = vsyncpa [#allocation3 + $0x1], 0 }
   0x2   :  { %12 = vsyncpa [#allocation5], 0  ;;  %s3303_s12 = smov 0   ;;  %s3305_s13 = smov 0  }
   0x3   :  { %s3307_s14 = smov 0   ;;  %s3309_s15 = smov 0  }
   0x4 LB: > { %s3322_s16 = sadd.s32 4294967295, %s3275_s15   ;;  %p38_p0 = scmp.ne.s32.totalorder %s3267_s13, %s3263_s12  ;;  %s3275_s15 = sphi %s3309_s15, %s4331_s15   ;;  %s3271_s14 = sphi %s3307_s14, %s4330_s14   ;;  %s3267_s13 = sphi %s3305_s13, %s4329_s13   ;;  %s3263_s12 = sphi %s3303_s12, %s4328_s12  }
   0x5   : > { %p4313_p1 = scmp.eq.s32.totalorder %s3322_s16, 0  ;;  %p2270_p2 = scmp.ge.s32.totalorder %s3275_s15, 1 }
   0x6   : > { %p122_p3 = scmp.lt.s32.totalorder %s3275_s15, 3  ;;  %s3277_s19 = smov [#allocation4]  }
   0x7   : > { %p3330_p4 = por %p4313_p1, %p38_p0  ;;  %s134_s20 = sshll.u32 %s3277_s19, 4  ;;  %s135_s20 = int_to_ptr.vmem [resolvable:$true] %s134_s20 }
   0x8   : > { %p3334_p5 = pnand %p2270_p2, %p122_p3  ;;  %s3347_s22 = sadd.s32 1, %s3275_s15  }
   0x9   : > { %s4316_s17 = scalar_select %p3330_p4, 1, 0 }
   0xa   : > { %s4317_s18 = scalar_select %p3334_p5, 1, 0 }
   0xb   : > { %p3059_p6 = pneg %p3334_p5  ;;  %s25_s23 = sadd.s32 1, %s3271_s14 }
   0xc   : > { %s22_s24 = ssub.s32 %s3275_s15, %s3347_s22  ;;  %s3179_s27 = scalar_lea.hbm %s4310_s1, 9216 }
   0xd   : > { %p3342_p7 = pnand %p3059_p6, %p4313_p1  ;;  %p3180_p8 = scmp.ne.s32.totalorder %s4310_s1, %s3179_s27 }
   0xe   : > { %p3186_p12 = scmp.lt.u32.totalorder %s3179_s27, %s4310_s1 }
   0xf   : > { %p3181_p9 = pneg %p3342_p7 }
  0x11   : > { %p3182_p10 = pnand %p3181_p9, %p3180_p8 }
  0x13   : > { %p3183_p11 = pneg %p3182_p10 }
  0x15   : > { %p3188_p13 = pnand %p3186_p12, %p3183_p11 }
  0x17   : > { %3191 = shalt.err (!%p3188_p13)
}
  0x18   : > { %s3192_s5 = scalar_lea.vmem %s135_s20, 9216  ;;  %p3200_p6 = scmp.lt.s32.totalorder %s135_s20, %s135_s20 }
  0x19   : > { %p3193_p0 = scmp.ne.s32.totalorder %s135_s20, %s3192_s5  ;;  %p3201_p1 = scmp.lt.s32.totalorder %s3192_s5, %s3192_s5 }
  0x1b   : > { %p3195_p2 = pnand %p3193_p0, %p3181_p9  ;;  %p3202_p4 = por %p3201_p1, %p3200_p6 }
  0x1d   : > { %p3196_p3 = pneg %p3195_p2 }
  0x1f   : > { %p3203_p5 = pnand %p3202_p4, %p3196_p3 }
  0x21   : > { %3206 = shalt.err (!%p3203_p5)
}
  0x22   : > { %s3278_s6 = smov 64   ;;  %s3279_s7 = smov 4  }
  0x23   : > { %3062 = dma.hbm_to_vmem [thread:$0]  (!%p3342_p7), %s4310_s1, 9216, %s135_s20, [#allocation5], %s3278_s6, %s3278_s6, %s3279_s7  }
  0x24   : > { %p23_p8 = scmp.eq.s32.totalorder %s22_s24, 0  ;;  %p32_p9 = scmp.ne.s32.totalorder %s3271_s14, %s3267_s13 }
  0x25   : > { %p33_p1 = scmp.eq.s32.totalorder %s3275_s15, 0  ;;  %p3068_p4 = scmp.lt.s32.totalorder %s3275_s15, 2 }
  0x26   : > { %s3373_s10 = scalar_select %p23_p8, %s3271_s14, %s25_s23  }
  0x27   : > { %p34_p5 = por %p33_p1, %p32_p9  ;;  %s148_s11 = sand.u32 1, %s3271_s14  }
  0x28   : > { %s2273_s12 = sshll.u32 %s148_s11, 8  ;;  %s2388_s19 = sshll.u32 %s3275_s15, 12 }
  0x29   : > { %s3380_s27 = scalar_lea.hbm %s4309_s0, %s2388_s19  ;;  %s152_s20 = scalar_lea.vmem [#allocation2], %s2273_s12 }
  0x2a   : > { %s159_s21 = sshll.u32 %s152_s20, 4  ;;  %p3384_p7 = pnand %p3068_p4, %p34_p5  ;;  %s3382_s21 = int_to_ptr.vmem [resolvable:$true] %s159_s21 }
  0x2b   : > { %s3388_s15 = scalar_lea.sflag [#allocation3], %s148_s11  ;;  %s3207_s24 = scalar_lea.hbm %s3380_s27, 4096 }
  0x2c   : > { %p3208_p10 = scmp.ne.s32.totalorder %s3380_s27, %s3207_s24  ;;  %p3209_p11 = pneg %p3384_p7 }
  0x2d   : > { %s3212_s30 = scalar_lea.hbm %s4309_s0, 8192  ;;  %p3213_p0 = scmp.lt.u32.totalorder %s3380_s27, %s4309_s0 }
  0x2e   : > { %p3210_p12 = pnand %p3209_p11, %p3208_p10  ;;  %p3214_p2 = scmp.lt.u32.totalorder %s3212_s30, %s3207_s24 }
  0x2f   : > { %p3216_p6 = scmp.lt.u32.totalorder %s3207_s24, %s3380_s27 }
  0x30   : > { %p3211_p13 = pneg %p3210_p12  ;;  %p3215_p3 = por %p3214_p2, %p3213_p0 }
  0x32   : > { %p3217_p8 = por %p3216_p6, %p3215_p3 }
  0x34   : > { %p3218_p9 = pnand %p3217_p8, %p3211_p13 }
  0x36   : > { %3221 = shalt.err (!%p3218_p9)
}
  0x37   : > { %s3222_s6 = scalar_lea.vmem %s3382_s21, 4096  ;;  %s3280_s7 = smov [#allocation2]  }
  0x38   : > { %p3223_p1 = scmp.ne.s32.totalorder %s3382_s21, %s3222_s6  ;;  %s3227_s8 = sshll.u32 %s3280_s7, 4  ;;  %s3228_s8 = int_to_ptr.vmem [resolvable:$false] %s3227_s8 }
  0x39   : > { %s3229_s9 = scalar_lea.vmem %s3228_s8, 8192  ;;  %p3230_p10 = scmp.lt.s32.totalorder %s3382_s21, %s3228_s8 }
  0x3a   : > { %p3225_p4 = pnand %p3223_p1, %p3209_p11  ;;  %p3231_p12 = scmp.lt.s32.totalorder %s3229_s9, %s3222_s6 }
  0x3c   : > { %p3226_p5 = pneg %p3225_p4  ;;  %p3232_p0 = por %p3231_p12, %p3230_p10 }
  0x3e   : > { %p3233_p2 = pnand %p3232_p0, %p3226_p5 }
  0x40   : > { %3236 = shalt.err (!%p3233_p2)
}
  0x41   : > { %s3281_s11 = smov 128   ;;  %s3282_s12 = smov 8  }
  0x42   : > { %3066 = dma.hbm_to_vmem [thread:$0]  (!%p3384_p7), %s3380_s27, 4096, %s3382_s21, %s3388_s15, %s3281_s11, %s3281_s11, %s3282_s12  }
  0x43   : > { %p4320_p11 = scmp.ne.s32.totalorder %s4317_s18, 0 }
  0x44   : > { %s173_s19 = sand.u32 (!%p4320_p11), 1, %s3267_s13   ;;  %p4321_p13 = scmp.ne.s32.totalorder (!%p4320_p11), %s4316_s17, 0 }
  0x45   : > { %171 = sbr.rel (%p4320_p11) target bundleno = 632 (0x278), region = 28  ;;  %s2277_s25 = sshll.u32 (!%p4320_p11), %s173_s19, 8 }
  0x46   : > { %s174_s26 = scalar_lea.sflag (!%p4320_p11), [#allocation3], %s173_s19  ;;  %s3419_s20 = scalar_lea.vmem (!%p4320_p11), [#allocation2], %s2277_s25 }
  0x4c   : > { %3254 = dma.done.wait (%p4321_p13), %s174_s26, 4096  }
  0x4d   : > { %3256 = vsyncadd (%p4321_p13), %s174_s26, 4294963200  ;;  %p4322_p3 = scmp.eq.s32.totalorder %s3322_s16, 0 }
  0x4f   : > { %3258 = dma.done.wait (%p4322_p3), [#allocation5], 9216   ;;  %p4323_p7 = pmov %p4322_p3 }
  0x50   : > { %v3107_v0 = vld [vmem:[#allocation4 + $0x40] sm:$0xff]   ;;  %v3109_v2 = vld [vmem:[#allocation4 + $0x48] sm:$0xff]   ;;  %v3111_v4 = vld [vmem:[#allocation4 + $0x50] sm:$0xff]   ;;  %vm411_vm0 = vsmask.f32 256  ;;  %vm410_vm1 = vcmask 1040384  }
  0x51   : > { %3260 = vsyncadd (%p4323_p7), [#allocation5], 4294958080  ;;  %v3108_v1 = vld [vmem:[#allocation4] sm:$0xff]   ;;  %2517 = vmatprep.subr.bf16.mxu0 %v3107_v0  ;;  %3037 = vmatprep.subr.bf16.mxu1 %v3107_v0  ;;  %v3110_v3 = vld [vmem:[#allocation4 + $0x8] sm:$0xff]   ;;  %vm493_vm2 = vcmask 1047552   ;;  %p208_p6 = scmp.lt.s32.totalorder %s3322_s16, 1 }
  0x52   : > { %2518 = vmatpush3.bf16.msra.mxu0 %v3108_v1  ;;  %3045 = vmatpush3.bf16.msra.mxu1 %v3108_v1  ;;  %v3112_v5 = vld [vmem:[#allocation4 + $0x10] sm:$0xff]   ;;  %v3113_v6 = vld [vmem:[#allocation4 + $0x58] sm:$0xff]   ;;  %v3115_v8 = vld [vmem:[#allocation4 + $0x60] sm:$0xff]   ;;  %vm494_vm4 = vsmask.f32 7424 }
  0x53   : > { %2519 = vmatprep.subr.bf16.mxu0 %v3109_v2  ;;  %3038 = vmatprep.subr.bf16.mxu1 %v3109_v2  ;;  %v3114_v7 = vld [vmem:[#allocation4 + $0x18] sm:$0xff]   ;;  %v3116_v9 = vld [vmem:[#allocation4 + $0x20] sm:$0xff]   ;;  %v3117_v10 = vld [vmem:[#allocation4 + $0x68] sm:$0xff]   ;;  %s4333_s16 = smov (!%p208_p6, %s3322_s16), 1 }
  0x54   : > { %v220_v11 = vld [vmem:[%s3419_s20 + $0x10] sm:$0xff]  ;;  %v221_v12 = vld [vmem:[%s3419_s20 + $0x18] sm:$0xff]  ;;  %v3118_v17 = vld [vmem:[#allocation4 + $0x28] sm:$0xff]   ;;  %s2389_s17 = sshll.u32 %s4333_s16, 7  ;;  %s2281_s23 = sshll.u32 %s4333_s16, 1 }
  0x55   : > { %v240_v13 = vld [vmem:[%s3419_s20 + $0xb0] sm:$0xff]  ;;  %v3432_v14 = vpack.c.bf16 %v221_v12, %v220_v11  ;;  %v241_v15 = vld [vmem:[%s3419_s20 + $0xb8] sm:$0xff]  ;;  %v218_v27 = vld [vmem:[%s3419_s20] sm:$0xff]  ;;  %s4227_s21 = scalar_lea.vmem %s4311_s2, %s2389_s17  ;;  %s216_s28 = scalar_lea.vmem %s4312_s3, %s2281_s23 }
  0x56   : > { %2520 = vmatpush3.bf16.msra.mxu0 %v3110_v3  ;;  %3046 = vmatpush3.bf16.msra.mxu1 %v3110_v3  ;;  %v3435_v16 = vpack.c.bf16 %v241_v15, %v240_v13  ;;  %v3119_v19 = vld [vmem:[#allocation4 + $0x70] sm:$0xff]   ;;  %v3121_v24 = vld [vmem:[#allocation4 + $0x78] sm:$0xff]   ;;  %v219_v28 = vld [vmem:[%s3419_s20 + $0x8] sm:$0xff] }
  0x57   : > { %2521 = vmatprep.subr.bf16.mxu0 %v3111_v4  ;;  %3039 = vmatprep.subr.bf16.mxu1 %v3111_v4  ;;  %v3438_v18 = vshrl.u32 %v3432_v14, 16  ;;  %v3120_v21 = vld [vmem:[#allocation4 + $0x30] sm:$0xff]   ;;  %v3445_v23 = vshll.u32 %v3432_v14, 16  ;;  %v242_v29 = vld [vmem:[%s3419_s20 + $0xc0] sm:$0xff]  ;;  %v243_v30 = vld [vmem:[%s3419_s20 + $0xc8] sm:$0xff]  ;;  %v3452_v31 = vpack.c.bf16 %v219_v28, %v218_v27 }
  0x58   : > { %v300_v20 = vshrl.u32 %v3435_v16, 16  ;;  %1120 = vmatprep.mubr.bf16.mxu0 %v3432_v14  ;;  %1216 = vmatprep.mubr.bf16.mxu1 %v3435_v16  ;;  %v375_v26 = vshll.u32 %v3435_v16, 16  ;;  %v3454_v32 = vpack.c.bf16 %v243_v30, %v242_v29  ;;  %vm3459_vm3 = vmand %vm410_vm1, %vm411_vm0  ;;  %v3122_v35 = vld [vmem:[#allocation4 + $0x38] sm:$0xff]   ;;  %v3123_v37 = vld [vmem:[#allocation4 + $0xc0] sm:$0xff]  }
  0x59   : > { %v330_v22 = vrot.slane %v3438_v18, 7  ;;  %v3464_v38 = vshrl.u32 %v3452_v31, 16  ;;  %v3124_v40 = vld [vmem:[#allocation4 + $0x140] sm:$0xff]   ;;  %v3468_v44 = vshll.u32 %v3452_v31, 16  ;;  %v3127_v46 = vld [vmem:[#allocation4 + $0xc8] sm:$0xff]   ;;  %v244_v52 = vld [vmem:[%s3419_s20 + $0xd0] sm:$0xff] }
  0x5a   : > { %2522 = vmatpush3.bf16.msra.mxu0 %v3112_v5  ;;  %3047 = vmatpush3.bf16.msra.mxu1 %v3112_v5  ;;  %v374_v25 = vrot.slane %v300_v20, 7  ;;  %v303_v39 = vshrl.u32 %v3454_v32, 16  ;;  %v451_v41 = vrot.slane %v375_v26, 1  ;;  %v3125_v42 = vld [vmem:[#allocation4 + $0x80] sm:$0xff]   ;;  %v379_v51 = vshll.u32 %v3454_v32, 16  ;;  %vm3484_vm5 = vmand %vm493_vm2, %vm494_vm4  ;;  %v245_v54 = vld [vmem:[%s3419_s20 + $0xd8] sm:$0xff] }
  0x5b   : > { %2523 = vmatprep.subr.bf16.mxu0 %v3113_v6  ;;  %3040 = vmatprep.subr.bf16.mxu1 %v3113_v6  ;;  %v333_v33 = vor.u32 %v3445_v23, %v330_v22  ;;  %v3126_v43 = vld [vmem:[#allocation4 + $0x100] sm:$0xff]   ;;  %v334_v49 = vrot.slane %v3464_v38, 7  ;;  %v3132_v56 = vld [vmem:[#allocation4 + $0x148] sm:$0xff]   ;;  %v3493_v57 = vpack.c.bf16 %v245_v54, %v244_v52  ;;  %v3129_v61 = vld [vmem:[#allocation4 + $0xd0] sm:$0xff]  }
  0x5c   : > { %v377_v36 = vor.u32 %v375_v26, %v374_v25  ;;  %v452_v47 = vor.u32 %v451_v41, %v300_v20  ;;  %v378_v50 = vrot.slane %v303_v39, 7  ;;  %v3128_v58 = vld [vmem:[#allocation4 + $0x88] sm:$0xff]   ;;  %v222_v0 = vld [vmem:[%s3419_s20 + $0x20] sm:$0xff]  ;;  %v453_v2 = vrot.slane %v379_v51, 1  ;;  %v3140_v13 = vld [vmem:[#allocation4 + $0x150] sm:$0xff]  }
  0x5d   : > { %v3473_v45 = vsel %vm3459_vm3, %v3438_v18, %v333_v33  ;;  %v337_v59 = vor.u32 %v3468_v44, %v334_v49  ;;  %v3134_v62 = vld [vmem:[#allocation4 + $0x108] sm:$0xff]   ;;  %v306_v63 = vshrl.u32 %v3493_v57, 16  ;;  %v246_v3 = vld [vmem:[%s3419_s20 + $0xe0] sm:$0xff]  ;;  %v383_v12 = vshll.u32 %v3493_v57, 16  ;;  %v3131_v15 = vld [vmem:[#allocation4 + $0xd8] sm:$0xff]  }
  0x5e   : > { %2524 = vmatpush3.bf16.msra.mxu0 %v3114_v7  ;;  %3048 = vmatpush3.bf16.msra.mxu1 %v3114_v7  ;;  %v3477_v48 = vsel %vm3459_vm3, %v300_v20, %v377_v36  ;;  %v3491_v55 = vsel %vm3484_vm5, %v452_v47, %v375_v26  ;;  %v381_v60 = vor.u32 %v379_v51, %v378_v50  ;;  %v223_v1 = vld [vmem:[%s3419_s20 + $0x28] sm:$0xff]  ;;  %v3142_v20 = vld [vmem:[#allocation4 + $0x110] sm:$0xff]   ;;  %v3135_v25 = vld [vmem:[#allocation4 + $0xe0] sm:$0xff]  }
  0x5f   : > { %2525 = vmatprep.subr.bf16.mxu0 %v3115_v8  ;;  %3041 = vmatprep.subr.bf16.mxu1 %v3115_v8  ;;  %v247_v4 = vld [vmem:[%s3419_s20 + $0xe8] sm:$0xff]  ;;  %v3505_v5 = vpack.c.bf16 %v223_v1, %v222_v0  ;;  %v454_v7 = vor.u32 %v453_v2, %v303_v39  ;;  %v3512_v8 = vsel %vm3459_vm3, %v3464_v38, %v337_v59  ;;  %v382_v11 = vrot.slane %v306_v63, 7  ;;  %v224_v26 = vld [vmem:[%s3419_s20 + $0x30] sm:$0xff]  ;;  %v225_v27 = vld [vmem:[%s3419_s20 + $0x38] sm:$0xff] }
  0x60   : > { %v3507_v6 = vpack.c.bf16 %v247_v4, %v246_v3  ;;  %v455_v28 = vrot.slane %v383_v12, 1  ;;  %v3147_v41 = vld [vmem:[#allocation4 + $0x158] sm:$0xff]   ;;  %v3149_v52 = vld [vmem:[#allocation4 + $0x160] sm:$0xff]   ;;  %v227_v59 = vld [vmem:[%s3419_s20 + $0x48] sm:$0xff]  ;;  %v429_v1 = vrot.slane %v3445_v23, 1 }
  0x61   : > { %v3534_v29 = vshll.u32 %v3505_v5, 16  ;;  %v3148_v47 = vld [vmem:[#allocation4 + $0x118] sm:$0xff]   ;;  %v3141_v0 = vld [vmem:[#allocation4 + $0xb0] sm:$0xff]  }
  0x62   : > { %2526 = vmatpush3.bf16.msra.mxu0 %v3116_v9  ;;  %3049 = vmatpush3.bf16.msra.mxu1 %v3116_v9  ;;  %v3516_v9 = vsel %vm3459_vm3, %v303_v39, %v381_v60  ;;  %v309_v22 = vshrl.u32 %v3507_v6, 16  ;;  %v387_v30 = vshll.u32 %v3507_v6, 16  ;;  %v456_v36 = vor.u32 %v455_v28, %v306_v63  ;;  %v3136_v39 = vld [vmem:[#allocation4 + $0xa0] sm:$0xff]  }
  0x63   : > { %2527 = vmatprep.subr.bf16.mxu0 %v3117_v10  ;;  %3042 = vmatprep.subr.bf16.mxu1 %v3117_v10  ;;  %v3130_v10 = vld [vmem:[#allocation4 + $0x90] sm:$0xff]   ;;  %v3151_v60 = vld [vmem:[#allocation4 + $0x120] sm:$0xff]  }
  0x66   : > { %2528 = vmatpush3.bf16.msra.mxu0 %v3118_v17  ;;  %3050 = vmatpush3.bf16.msra.mxu1 %v3118_v17  ;;  %v3521_v17 = vsel %vm3484_vm5, %v454_v7, %v379_v51  ;;  %v3139_v51 = vld [vmem:[#allocation4 + $0xf0] sm:$0xff]  }
  0x67   : > { %2529 = vmatprep.subr.bf16.mxu0 %v3119_v19  ;;  %3043 = vmatprep.subr.bf16.mxu1 %v3119_v19  ;;  %v3133_v19 = vld [vmem:[#allocation4 + $0x98] sm:$0xff]  }
  0x6a   : > { %2530 = vmatpush3.bf16.msra.mxu0 %v3120_v21  ;;  %3051 = vmatpush3.bf16.msra.mxu1 %v3120_v21  ;;  %v3526_v21 = vshrl.u32 %v3505_v5, 16 }
  0x6b   : > { %2531 = vmatprep.subr.bf16.mxu0 %v3121_v24  ;;  %3044 = vmatprep.subr.bf16.mxu1 %v3121_v24  ;;  %v385_v24 = vor.u32 %v383_v12, %v382_v11  ;;  %v3153_v11 = vld [vmem:[#allocation4 + $0x168] sm:$0xff]  }
  0x6c   : > { %v338_v33 = vrot.slane %v3526_v21, 7 }
  0x6e   : > { %2532 = vmatpush3.bf16.msra.mxu0 %v3122_v35  ;;  %3052 = vmatpush3.bf16.msra.mxu1 %v3122_v35  ;;  %v386_v35 = vrot.slane %v309_v22, 7  ;;  %v341_v49 = vor.u32 %v3534_v29, %v338_v33 }
  0x6f   : > { %2629 = vmatprep.subr.bf16.mxu1 %v3123_v37  ;;  %2741 = vmatprep.subr.bf16.mxu0 %v3124_v40  ;;  %v3540_v37 = vsel %vm3459_vm3, %v306_v63, %v385_v24  ;;  %v3542_v40 = vpack.c.bf16 %v225_v27, %v224_v26  ;;  %v228_v24 = vld [vmem:[%s3419_s20 + $0x50] sm:$0xff]  ;;  %v431_v26 = vrot.slane %v3468_v44, 1 }
  0x70   : > { %v389_v50 = vor.u32 %v387_v30, %v386_v35  ;;  %v3157_v27 = vld [vmem:[#allocation4 + $0x170] sm:$0xff]  }
  0x71   : > { %1121 = vmatmul.mubr.bf16.vlgmr.msra.gmra.mrb[0].mxu0 %v3473_v45  ;;  %1217 = vmatmul.mubr.bf16.vlgmr.msra.gmra.mrb[0].mxu1 %v3477_v48  ;;  %v3553_v54 = vshrl.u32 %v3542_v40, 16  ;;  %v3570_v3 = vshll.u32 %v3542_v40, 16 }
  0x72   : > { %2630 = vmatpush3.bf16.msra.mxu1 %v3125_v42  ;;  %2742 = vmatpush3.bf16.msra.mxu0 %v3126_v43  ;;  %v3137_v42 = vld [vmem:[#allocation4 + $0xe8] sm:$0xff]   ;;  %v3546_v43 = vsel %vm3484_vm5, %v456_v36, %v383_v12  ;;  %v3565_v63 = vsel %vm3459_vm3, %v309_v22, %v389_v50  ;;  %v430_v12 = vor.u32 %v429_v1, %v3438_v18  ;;  %v3158_v36 = vld [vmem:[#allocation4 + $0x130] sm:$0xff]   ;;  %v3159_v1 = vld [vmem:[#allocation4 + $0x1d8] sm:$0xff]  }
  0x73   : > { %2631 = vmatprep.subr.bf16.mxu1 %v3127_v46  ;;  %1128 = vmatprep.mubr.bf16.mxu0 %v3452_v31  ;;  %v3138_v46 = vld [vmem:[#allocation4 + $0xa8] sm:$0xff]   ;;  %v342_v2 = vrot.slane %v3553_v54, 7 }
  0x74   : > { %1224 = vmatprep.mubr.bf16.mxu1 %v3454_v32  ;;  %2743 = vmatprep.subr.bf16.mxu0 %v3132_v56  ;;  %v457_v56 = vrot.slane %v387_v30, 1  ;;  %v3592_v18 = vsel %vm3484_vm5, %v430_v12, %v3445_v23  ;;  %v3150_v23 = vld [vmem:[#allocation4 + $0x1c8] sm:$0xff]   ;;  %v3160_v12 = vld [vmem:[#allocation4 + $0x198] sm:$0xff]  }
  0x75   : > { %v231_v50 = vld [vmem:[%s3419_s20 + $0x68] sm:$0xff] }
  0x76   : > { %2632 = vmatpush3.bf16.msra.mxu1 %v3128_v58  ;;  %2744 = vmatpush3.bf16.msra.mxu0 %v3134_v62  ;;  %v226_v58 = vld [vmem:[%s3419_s20 + $0x40] sm:$0xff]  ;;  %v3561_v62 = vsel %vm3459_vm3, %v3526_v21, %v341_v49 }
  0x77   : > { %2633 = vmatprep.subr.bf16.mxu1 %v3129_v61  ;;  %2745 = vmatprep.subr.bf16.mxu0 %v3140_v13  ;;  %v458_v61 = vor.u32 %v457_v56, %v309_v22  ;;  %v3572_v4 = vpack.c.bf16 %v227_v59, %v226_v58  ;;  %v3154_v13 = vld [vmem:[#allocation4 + $0x128] sm:$0xff]   ;;  %v3145_v22 = vld [vmem:[#allocation4 + $0x1c0] sm:$0xff]  }
  0x78   : > { %v230_v49 = vld [vmem:[%s3419_s20 + $0x60] sm:$0xff] }
  0x79   : > { %1129 = vmatmul.mubr.bf16.gmra.mrb[4].mxu0 %v3512_v8  ;;  %1225 = vmatmul.mubr.bf16.gmra.mrb[4].mxu1 %v3516_v9  ;;  %v3576_v7 = vsel %vm3484_vm5, %v458_v61, %v387_v30  ;;  %v3602_v33 = vshll.u32 %v3572_v4, 16  ;;  %v3156_v61 = vld [vmem:[#allocation4 + $0x190] sm:$0xff]  }
  0x7a   : > { %2634 = vmatpush3.bf16.msra.mxu1 %v3130_v10  ;;  %1136 = vmatprep.mubr.bf16.mxu0 %v3432_v14  ;;  %v3143_v10 = vld [vmem:[#allocation4 + $0xf8] sm:$0xff]  }
  0x7b   : > { %2635 = vmatprep.subr.bf16.mxu1 %v3131_v15  ;;  %1232 = vmatprep.mubr.bf16.mxu1 %v3493_v57  ;;  %v3144_v15 = vld [vmem:[#allocation4 + $0xb8] sm:$0xff]  }
  0x7c   : > { %2746 = vmatpush3.bf16.msra.mxu0 %v3142_v20  ;;  %v3584_v20 = vshrl.u32 %v3572_v4, 16 }
  0x7d   : > { %2747 = vmatprep.subr.bf16.mxu0 %v3147_v41 }
  0x7e   : > { %2636 = vmatpush3.bf16.msra.mxu1 %v3133_v19  ;;  %v345_v19 = vor.u32 %v3570_v3, %v342_v2  ;;  %v346_v30 = vrot.slane %v3584_v20, 7  ;;  %v232_v2 = vld [vmem:[%s3419_s20 + $0x70] sm:$0xff] }
  0x7f   : > { %2637 = vmatprep.subr.bf16.mxu1 %v3135_v25  ;;  %v229_v25 = vld [vmem:[%s3419_s20 + $0x58] sm:$0xff] }
  0x80   : > { %2748 = vmatpush3.bf16.msra.mxu0 %v3148_v47  ;;  %v3598_v28 = vsel %vm3459_vm3, %v3553_v54, %v345_v19  ;;  %v3604_v35 = vpack.c.bf16 %v229_v25, %v228_v24  ;;  %v349_v41 = vor.u32 %v3602_v33, %v346_v30  ;;  %v3161_v47 = vld [vmem:[#allocation4 + $0x178] sm:$0xff]   ;;  %v234_v30 = vld [vmem:[%s3419_s20 + $0x80] sm:$0xff] }
  0x81   : > { %1137 = vmatmul.mubr.bf16.gmra.mrb[8].mxu0 %v3473_v45  ;;  %1233 = vmatmul.mubr.bf16.gmra.mrb[8].mxu1 %v3540_v37 }
  0x82   : > { %2638 = vmatpush3.bf16.msra.mxu1 %v3136_v39  ;;  %1144 = vmatprep.mubr.bf16.mxu0 %v3505_v5  ;;  %v3152_v39 = vld [vmem:[#allocation4 + $0x188] sm:$0xff]   ;;  %v3618_v56 = vshll.u32 %v3604_v35, 16 }
  0x83   : > { %2639 = vmatprep.subr.bf16.mxu1 %v3137_v42  ;;  %1240 = vmatprep.mubr.bf16.mxu1 %v3507_v6  ;;  %v432_v42 = vor.u32 %v431_v26, %v3464_v38  ;;  %v3623_v38 = vsel %vm3459_vm3, %v3584_v20, %v349_v41  ;;  %v3165_v26 = vld [vmem:[#allocation4 + $0x1a0] sm:$0xff]   ;;  %v3168_v41 = vld [vmem:[#allocation4 + $0x1a8] sm:$0xff]  }
  0x84   : > { %2749 = vmatprep.subr.bf16.mxu0 %v3149_v52  ;;  %v3162_v52 = vld [vmem:[#allocation4 + $0x138] sm:$0xff]  }
  0x85   : > { %2750 = vmatpush3.bf16.msra.mxu0 %v3151_v60  ;;  %v3628_v58 = vsel %vm3484_vm5, %v432_v42, %v3468_v44  ;;  %v3631_v60 = vpack.c.bf16 %v231_v50, %v230_v49  ;;  %v3169_v42 = vld [vmem:[#allocation4 + $0x1f0] sm:$0xff]  }
  0x86   : > { %2640 = vmatpush3.bf16.msra.mxu1 %v3138_v46  ;;  %2751 = vmatprep.subr.bf16.mxu0 %v3153_v11  ;;  %v3612_v46 = vshrl.u32 %v3604_v35, 16  ;;  %v233_v11 = vld [vmem:[%s3419_s20 + $0x78] sm:$0xff] }
  0x87   : > { %2641 = vmatprep.subr.bf16.mxu1 %v3139_v51  ;;  %v3155_v51 = vld [vmem:[#allocation4 + $0x1d0] sm:$0xff]   ;;  %v3654_v24 = vshll.u32 %v3631_v60, 16  ;;  %v3656_v25 = vpack.c.bf16 %v233_v11, %v232_v2  ;;  %v237_v11 = vld [vmem:[%s3419_s20 + $0x98] sm:$0xff] }
  0x88   : > { %v350_v59 = vrot.slane %v3612_v46, 7 }
  0x89   : > { %1145 = vmatmul.mubr.bf16.gmra.mrb[12].mxu0 %v3561_v62  ;;  %1241 = vmatmul.mubr.bf16.gmra.mrb[12].mxu1 %v3565_v63 }
  0x8a   : > { %2642 = vmatpush3.bf16.msra.mxu1 %v3141_v0  ;;  %1152 = vmatprep.mubr.bf16.mxu0 %v3542_v40  ;;  %v3633_v0 = vld [vmem:[#allocation4 + $0x200] sm:$0xff]   ;;  %v353_v44 = vor.u32 %v3618_v56, %v350_v59  ;;  %v3171_v59 = vld [vmem:[#allocation4 + $0x1b0] sm:$0xff]  }
  0x8b   : > { %2643 = vmatprep.subr.bf16.mxu1 %v3143_v10  ;;  %1281 = vmatprep.mubr.bf16.mxu1 %v3512_v8  ;;  %v3146_v8 = vld [vmem:[#allocation4 + $0x180] sm:$0xff]   ;;  %v3642_v10 = vshrl.u32 %v3631_v60, 16 }
  0x8c   : > { %2752 = vmatpush3.bf16.msra.mxu0 %v3154_v13  ;;  %v3163_v13 = vld [vmem:[#allocation4 + $0x1e0] sm:$0xff]   ;;  %v3650_v19 = vsel %vm3459_vm3, %v3612_v46, %v353_v44  ;;  %v236_v44 = vld [vmem:[%s3419_s20 + $0x90] sm:$0xff] }
  0x8d   : > { %2753 = vmatprep.subr.bf16.mxu0 %v3157_v27  ;;  %v3166_v27 = vld [vmem:[#allocation4 + $0x1e8] sm:$0xff]  }
  0x8e   : > { %2644 = vmatpush3.bf16.msra.mxu1 %v3144_v15  ;;  %v433_v15 = vrot.slane %v3534_v29, 1 }
  0x8f   : > { %2853 = vmatprep.subr.bf16.mxu1 %v3145_v22  ;;  %v354_v22 = vrot.slane %v3642_v10, 7 }
  0x90   : > { %2754 = vmatpush3.bf16.msra.mxu0 %v3158_v36  ;;  %v3666_v36 = vshrl.u32 %v3656_v25, 16 }
  0x91   : > { %1153 = vmatmul.mubr.bf16.gmra.mrb[16].mxu0 %v3598_v28  ;;  %1282 = vmatmul.mubr.bf16.vlgmr.msra.gmra.mrb[16].mxu1 %v3592_v18 }
  0x92   : > { %2854 = vmatpush3.bf16.msra.mxu1 %v3146_v8  ;;  %1160 = vmatprep.mubr.bf16.mxu0 %v3572_v4  ;;  %v434_v8 = vor.u32 %v433_v15, %v3526_v21  ;;  %v435_v21 = vrot.slane %v3570_v3, 1  ;;  %v358_v50 = vrot.slane %v3666_v36, 7 }
  0x93   : > { %1289 = vmatprep.mubr.bf16.mxu1 %v3473_v45  ;;  %2855 = vmatprep.subr.bf16.mxu1 %v3150_v23  ;;  %v357_v23 = vor.u32 %v3654_v24, %v354_v22 }
  0x94   : > { %2755 = vmatprep.subr.bf16.mxu0 %v3161_v47  ;;  %v3672_v47 = vsel %vm3484_vm5, %v434_v8, %v3534_v29  ;;  %v3172_v29 = vld [vmem:[#allocation4 + $0x1f8] sm:$0xff]  }
  0x95   : > { %2756 = vmatpush3.bf16.msra.mxu0 %v3162_v52  ;;  %v3678_v49 = vsel %vm3459_vm3, %v3642_v10, %v357_v23  ;;  %v238_v23 = vld [vmem:[%s3419_s20 + $0xa0] sm:$0xff] }
  0x96   : > { %2856 = vmatpush3.bf16.msra.mxu1 %v3152_v39  ;;  %2989 = vmatprep.subr.bf16.mxu0 %v3633_v0  ;;  %v235_v39 = vld [vmem:[%s3419_s20 + $0x88] sm:$0xff] }
  0x97   : > { %2857 = vmatprep.subr.bf16.mxu1 %v3155_v51  ;;  %v3682_v51 = vshll.u32 %v3656_v25, 16  ;;  %v3684_v52 = vpack.c.bf16 %v235_v39, %v234_v30  ;;  %v239_v39 = vld [vmem:[%s3419_s20 + $0xa8] sm:$0xff] }
  0x99   : > { %1161 = vmatmul.mubr.bf16.gmra.mrb[20].mxu0 %v3623_v38  ;;  %1290 = vmatmul.mubr.bf16.gmra.mrb[20].mxu1 %v3628_v58  ;;  %v3693_v2 = vshrl.u32 %v3684_v52, 16 }
  0x9a   : > { %1168 = vmatprep.mubr.bf16.mxu0 %v3604_v35  ;;  %1297 = vmatprep.mubr.bf16.mxu1 %v3561_v62 }
  0x9b   : > { %2858 = vmatpush3.bf16.msra.mxu1 %v3156_v61  ;;  %v436_v61 = vor.u32 %v435_v21, %v3553_v54  ;;  %v362_v22 = vrot.slane %v3693_v2, 7 }
  0x9c   : > { %2859 = vmatprep.subr.bf16.mxu1 %v3159_v1  ;;  %v361_v1 = vor.u32 %v3682_v51, %v358_v50 }
  0x9d   : > { %v3700_v54 = vsel %vm3484_vm5, %v436_v61, %v3570_v3 }
  0x9e   : > { %v3706_v15 = vsel %vm3459_vm3, %v3666_v36, %v361_v1  ;;  %v248_v1 = vld [vmem:[%s3419_s20 + $0xf0] sm:$0xff] }
  0x9f   : > { %2860 = vmatpush3.bf16.msra.mxu1 %v3160_v12  ;;  %v3174_v12 = vld [vmem:[#allocation4 + $0x1b8] sm:$0xff]  }
  0xa0   : > { %2861 = vmatprep.subr.bf16.mxu1 %v3163_v13  ;;  %v437_v13 = vrot.slane %v3602_v33, 1 }
  0xa1   : > { %1169 = vmatmul.mubr.bf16.gmra.mrb[24].mxu0 %v3650_v19  ;;  %1298 = vmatmul.mubr.bf16.gmra.mrb[24].mxu1 %v3592_v18 }
  0xa2   : > { %1176 = vmatprep.mubr.bf16.mxu0 %v3631_v60  ;;  %1305 = vmatprep.mubr.bf16.mxu1 %v3598_v28  ;;  %v438_v3 = vor.u32 %v437_v13, %v3584_v20  ;;  %v439_v20 = vrot.slane %v3618_v56, 1 }
  0xa3   : > { %2862 = vmatpush3.bf16.msra.mxu1 %v3165_v26  ;;  %v3710_v26 = vshll.u32 %v3684_v52, 16 }
  0xa4   : > { %2863 = vmatprep.subr.bf16.mxu1 %v3166_v27  ;;  %v3712_v27 = vpack.c.bf16 %v237_v11, %v236_v44  ;;  %v249_v44 = vld [vmem:[%s3419_s20 + $0xf8] sm:$0xff]  ;;  %v441_v11 = vrot.slane %v3654_v24, 1 }
  0xa5   : > { %v365_v8 = vor.u32 %v3710_v26, %v362_v22 }
  0xa6   : > { %v3721_v30 = vshrl.u32 %v3712_v27, 16  ;;  %v367_v50 = vshll.u32 %v3712_v27, 16 }
  0xa7   : > { %2864 = vmatpush3.bf16.msra.mxu1 %v3168_v41  ;;  %v3728_v41 = vsel %vm3484_vm5, %v438_v3, %v3602_v33 }
  0xa8   : > { %2865 = vmatprep.subr.bf16.mxu1 %v3169_v42  ;;  %v3734_v42 = vsel %vm3459_vm3, %v3693_v2, %v365_v8  ;;  %v366_v21 = vrot.slane %v3721_v30, 7 }
  0xa9   : > { %1177 = vmatmul.mubr.bf16.gmra.mrb[28].mxu0 %v3678_v49  ;;  %1306 = vmatmul.mubr.bf16.gmra.mrb[28].mxu1 %v3672_v47 }
  0xaa   : > { %1184 = vmatprep.mubr.bf16.mxu0 %v3656_v25  ;;  %1313 = vmatprep.mubr.bf16.mxu1 %v3623_v38  ;;  %v369_v33 = vor.u32 %v367_v50, %v366_v21 }
  0xab   : > { %2866 = vmatpush3.bf16.msra.mxu1 %v3171_v59  ;;  %v3738_v59 = vpack.c.bf16 %v239_v39, %v238_v23 }
  0xac   : > { %2867 = vmatprep.subr.bf16.mxu1 %v3172_v29  ;;  %v440_v29 = vor.u32 %v439_v20, %v3612_v46  ;;  %v3760_v46 = vpack.c.bf16 %v249_v44, %v248_v1  ;;  %v443_v1 = vrot.slane %v3682_v51, 1 }
  0xad   : > { %v297_v61 = vshrl.u32 %v3738_v59, 16  ;;  %v371_v3 = vshll.u32 %v3738_v59, 16 }
  0xae   : > { %v3757_v13 = vsel %vm3484_vm5, %v440_v29, %v3618_v56  ;;  %v3765_v8 = vshll.u32 %v3760_v46, 16  ;;  %v442_v56 = vor.u32 %v441_v11, %v3642_v10  ;;  %v3771_v39 = vshrl.u32 %v3760_v46, 16 }
  0xaf   : > { %2868 = vmatpush3.bf16.msra.mxu1 %v3174_v12  ;;  %v3752_v12 = vsel %vm3459_vm3, %v3721_v30, %v369_v33  ;;  %v370_v22 = vrot.slane %v297_v61, 7  ;;  %v444_v44 = vor.u32 %v443_v1, %v3666_v36  ;;  %v445_v11 = vrot.slane %v3710_v26, 1  ;;  %v3170_v36 = vld [vmem:[#allocation4 + $0x210] sm:$0xff]   ;;  %v3178_v1 = vld [vmem:[#allocation4 + $0x238] sm:$0xff]  }
  0xb0   : > { %v459_v20 = vrot.slane %v3765_v8, 1  ;;  %v3782_v29 = vsel %vm3484_vm5, %v442_v56, %v3654_v24  ;;  %v3173_v56 = vld [vmem:[#allocation4 + $0x218] sm:$0xff]   ;;  %v390_v53 = vrot.slane %v3771_v39, 7 }
  0xb1   : > { %1185 = vmatmul.mubr.bf16.gmra.mrb[32].mxu0 %v3706_v15  ;;  %1314 = vmatmul.mubr.bf16.gmra.mrb[32].mxu1 %v3700_v54  ;;  %v373_v23 = vor.u32 %v371_v3, %v370_v22  ;;  %v3798_v24 = vsel %vm3484_vm5, %v444_v44, %v3682_v51  ;;  %v3167_v22 = vld [vmem:[#allocation4 + $0x208] sm:$0xff]  }
  0xb2   : > { %1192 = vmatprep.mubr.bf16.mxu0 %v3684_v52  ;;  %1321 = vmatprep.mubr.bf16.mxu1 %v3650_v19  ;;  %v460_v21 = vor.u32 %v459_v20, %v3771_v39  ;;  %v3176_v20 = vld [vmem:[#allocation4 + $0x228] sm:$0xff]  }
  0xb3   : > { %v3777_v33 = vsel %vm3459_vm3, %v297_v61, %v373_v23  ;;  %v447_v23 = vrot.slane %v367_v50, 1 }
  0xb4   : > { %v3788_v10 = vsel %vm3484_vm5, %v460_v21, %v3765_v8  ;;  %v3177_v21 = vld [vmem:[#allocation4 + $0x230] sm:$0xff]  }
  0xb9   : > { %1193 = vmatmul.mubr.bf16.gmra.mrb[36].mxu0 %v3734_v42  ;;  %1322 = vmatmul.mubr.bf16.gmra.mrb[36].mxu1 %v3728_v41 }
  0xba   : > { %1200 = vmatprep.mubr.bf16.mxu0 %v3712_v27  ;;  %1329 = vmatprep.mubr.bf16.mxu1 %v3678_v49 }
  0xc1   : > { %1201 = vmatmul.mubr.bf16.gmra.mrb[40].mxu0 %v3752_v12  ;;  %1330 = vmatmul.mubr.bf16.gmra.mrb[40].mxu1 %v3757_v13 }
  0xc2   : > { %1208 = vmatprep.mubr.bf16.mxu0 %v3738_v59  ;;  %1337 = vmatprep.mubr.bf16.mxu1 %v3706_v15 }
  0xc9   : > { %1209 = vmatmul.mubr.bf16.gmra.mrb[44].mxu0 %v3777_v33  ;;  %1338 = vmatmul.mubr.bf16.gmra.mrb[44].mxu1 %v3782_v29 }
  0xca   : > { %1345 = vmatprep.mubr.bf16.mxu1 %v3734_v42  ;;  %1442 = vmatprep.mubr.bf16.mxu0 %v3628_v58  ;;  %v446_v58 = vor.u32 %v445_v11, %v3693_v2 }
  0xcc   : > { %v3810_v51 = vsel %vm3484_vm5, %v446_v58, %v3710_v26  ;;  %v449_v26 = vrot.slane %v371_v3, 1 }
  0xd1   : > { %1346 = vmatmul.mubr.bf16.gmra.mrb[48].mxu1 %v3798_v24  ;;  %1443 = vmatmul.mubr.bf16.vlgmr.msra.gmra.mrb[48].mxu0 %v3452_v31  ;;  %v448_v31 = vor.u32 %v447_v23, %v3721_v30  ;;  %v450_v30 = vor.u32 %v449_v26, %v297_v61  ;;  %v393_v61 = vor.u32 %v3765_v8, %v390_v53 }
  0xd2   : > { %2990 = vmatpush3.bf16.msra.mxu0 %v3633_v0  ;;  %1353 = vmatprep.mubr.bf16.mxu1 %v3752_v12  ;;  %v3175_v0 = vld [vmem:[#allocation4 + $0x220] sm:$0xff]  }
  0xd3   : > { %1450 = vmatprep.mubr.bf16.mxu0 %v3592_v18  ;;  %2991 = vmatprep.subr.bf16.mxu0 %v3167_v22  ;;  %v3819_v2 = vsel %vm3484_vm5, %v448_v31, %v367_v50  ;;  %v3827_v50 = vsel %vm3484_vm5, %v450_v30, %v371_v3  ;;  %v3846_v3 = vsel %vm3459_vm3, %v3771_v39, %v393_v61 }
  0xd6   : > { %2992 = vmatpush3.bf16.msra.mxu0 %v3167_v22 }
  0xd7   : > { %2993 = vmatprep.subr.bf16.mxu0 %v3170_v36 }
  0xd9   : > { %1354 = vmatmul.mubr.bf16.gmra.mrb[52].mxu1 %v3810_v51  ;;  %1451 = vmatmul.mubr.bf16.gmra.mrb[52].mxu0 %v3432_v14 }
  0xda   : > { %1361 = vmatprep.mubr.bf16.mxu1 %v3777_v33  ;;  %1458 = vmatprep.mubr.bf16.mxu0 %v3672_v47 }
  0xdb   : > { %2994 = vmatpush3.bf16.msra.mxu0 %v3170_v36 }
  0xdc   : > { %2995 = vmatprep.subr.bf16.mxu0 %v3173_v56 }
  0xdf   : > { %2996 = vmatpush3.bf16.msra.mxu0 %v3173_v56 }
  0xe0   : > { %2997 = vmatprep.subr.bf16.mxu0 %v3175_v0 }
  0xe1   : > { %1362 = vmatmul.mubr.bf16.gmra.mrb[56].mxu1 %v3819_v2  ;;  %1459 = vmatmul.mubr.bf16.gmra.mrb[56].mxu0 %v3505_v5 }
  0xe2   : > { %1369 = vmatprep.mubr.bf16.mxu1 %v3477_v48  ;;  %1466 = vmatprep.mubr.bf16.mxu0 %v3700_v54 }
  0xe3   : > { %2998 = vmatpush3.bf16.msra.mxu0 %v3175_v0 }
  0xe4   : > { %2999 = vmatprep.subr.bf16.mxu0 %v3176_v20 }
  0xe7   : > { %3000 = vmatpush3.bf16.msra.mxu0 %v3176_v20 }
  0xe8   : > { %3001 = vmatprep.subr.bf16.mxu0 %v3177_v21 }
  0xe9   : > { %1370 = vmatmul.mubr.bf16.gmra.mrb[60].mxu1 %v3827_v50  ;;  %1467 = vmatmul.mubr.bf16.gmra.mrb[60].mxu0 %v3542_v40 }
  0xea   : > { %1377 = vmatprep.mubr.bf16.mxu1 %v3516_v9  ;;  %1474 = vmatprep.mubr.bf16.mxu0 %v3728_v41 }
  0xeb   : > { %3002 = vmatpush3.bf16.msra.mxu0 %v3177_v21 }
  0xec   : > { %3003 = vmatprep.subr.bf16.mxu0 %v3178_v1 }
  0xef   : > { %3004 = vmatpush3.bf16.msra.mxu0 %v3178_v1 }
  0xf1   : > { %1378 = vmatmul.mubr.bf16.gmra.mrb[64].mxu1 %v3491_v55  ;;  %1475 = vmatmul.mubr.bf16.gmra.mrb[64].mxu0 %v3572_v4 }
  0xf2   : > { %1385 = vmatprep.mubr.bf16.mxu1 %v3540_v37  ;;  %1482 = vmatprep.mubr.bf16.mxu0 %v3757_v13 }
  0xf9   : > { %1386 = vmatmul.mubr.bf16.gmra.mrb[68].mxu1 %v3521_v17  ;;  %1483 = vmatmul.mubr.bf16.gmra.mrb[68].mxu0 %v3604_v35 }
  0xfa   : > { %1393 = vmatprep.mubr.bf16.mxu1 %v3565_v63  ;;  %1490 = vmatprep.mubr.bf16.mxu0 %v3782_v29 }
 0x101   : > { %1394 = vmatmul.mubr.bf16.gmra.mrb[72].mxu1 %v3546_v43  ;;  %1491 = vmatmul.mubr.bf16.gmra.mrb[72].mxu0 %v3631_v60 }
 0x102   : > { %1401 = vmatprep.mubr.bf16.mxu1 %v3846_v3  ;;  %1498 = vmatprep.mubr.bf16.mxu0 %v3798_v24 }
 0x109   : > { %1402 = vmatmul.mubr.bf16.gmra.mrb[76].mxu1 %v3576_v7  ;;  %1499 = vmatmul.mubr.bf16.gmra.mrb[76].mxu0 %v3656_v25 }
 0x10a   : > { %1506 = vmatprep.mubr.bf16.mxu0 %v3810_v51  ;;  %1603 = vmatprep.mubr.bf16.mxu1 %v3432_v14 }
 0x111   : > { %1507 = vmatmul.mubr.bf16.gmra.mrb[80].mxu0 %v3684_v52  ;;  %1604 = vmatmul.mubr.bf16.vlgmr.msra.gmra.mrb[80].mxu1 %v3473_v45 }
 0x112   : > { %1514 = vmatprep.mubr.bf16.mxu0 %v3819_v2  ;;  %1611 = vmatprep.mubr.bf16.mxu1 %v3505_v5 }
 0x119   : > { %1515 = vmatmul.mubr.bf16.gmra.mrb[84].mxu0 %v3712_v27  ;;  %1612 = vmatmul.mubr.bf16.gmra.mrb[84].mxu1 %v3561_v62 }
 0x11a   : > { %1522 = vmatprep.mubr.bf16.mxu0 %v3827_v50  ;;  %1619 = vmatprep.mubr.bf16.mxu1 %v3542_v40 }
 0x121   : > { %1523 = vmatmul.mubr.bf16.gmra.mrb[88].mxu0 %v3738_v59  ;;  %1620 = vmatmul.mubr.bf16.gmra.mrb[88].mxu1 %v3598_v28 }
 0x122   : > { %1530 = vmatprep.mubr.bf16.mxu0 %v3491_v55  ;;  %1627 = vmatprep.mubr.bf16.mxu1 %v3572_v4 }
 0x129   : > { %1531 = vmatmul.mubr.bf16.gmra.mrb[92].mxu0 %v3435_v16  ;;  %1628 = vmatmul.mubr.bf16.gmra.mrb[92].mxu1 %v3623_v38 }
 0x12a   : > { %1538 = vmatprep.mubr.bf16.mxu0 %v3521_v17  ;;  %1635 = vmatprep.mubr.bf16.mxu1 %v3604_v35 }
 0x131   : > { %1539 = vmatmul.mubr.bf16.gmra.mrb[96].mxu0 %v3454_v32  ;;  %1636 = vmatmul.mubr.bf16.gmra.mrb[96].mxu1 %v3650_v19 }
 0x132   : > { %1546 = vmatprep.mubr.bf16.mxu0 %v3546_v43  ;;  %1643 = vmatprep.mubr.bf16.mxu1 %v3631_v60 }
 0x139   : > { %1547 = vmatmul.mubr.bf16.gmra.mrb[100].mxu0 %v3493_v57  ;;  %1644 = vmatmul.mubr.bf16.gmra.mrb[100].mxu1 %v3678_v49 }
 0x13a   : > { %1554 = vmatprep.mubr.bf16.mxu0 %v3576_v7  ;;  %1651 = vmatprep.mubr.bf16.mxu1 %v3656_v25 }
 0x141   : > { %1555 = vmatmul.mubr.bf16.gmra.mrb[104].mxu0 %v3507_v6  ;;  %1652 = vmatmul.mubr.bf16.gmra.mrb[104].mxu1 %v3706_v15 }
 0x142   : > { %1562 = vmatprep.mubr.bf16.mxu0 %v3788_v10  ;;  %1659 = vmatprep.mubr.bf16.mxu1 %v3684_v52 }
 0x144   : > { %v2533_v14 = vpop.f32.mrb[0].mxu0  ;;  %v2605_v34 = vpop.f32.mrb[0].mxu1 }
 0x145   : > { %v2534_v45 = vpop.f32.mrb[1].mxu0  ;;  %v2606_v5 = vpop.f32.mrb[1].mxu1 }
 0x146   : > { %v3884_v40 = vadd.f32 %v2534_v45, %v2533_v14  ;;  %v3886_v62 = vadd.f32 %v2606_v5, %v2605_v34  ;;  %v2536_v4 = vpop.f32.mrb[2].mxu0  ;;  %v2608_v28 = vpop.f32.mrb[2].mxu1 }
 0x147   : > { %v2537_v35 = vpop.f32.mrb[3].mxu0  ;;  %v2609_v38 = vpop.f32.mrb[3].mxu1 }
 0x148   : > { %v3888_v60 = vadd.f32 %v2537_v35, %v2536_v4  ;;  %v3890_v19 = vadd.f32 %v2609_v38, %v2608_v28 }
 0x149   : > { %1563 = vmatmul.mubr.bf16.gmra.mrb[108].mxu0 %v3760_v46  ;;  %1660 = vmatmul.mubr.bf16.gmra.mrb[108].mxu1 %v3734_v42 }
 0x14a   : > { %1667 = vmatprep.mubr.bf16.mxu1 %v3712_v27  ;;  %3005 = vmatprep.mubr.bf16.mxu0 %v3592_v18 }
 0x14c   : > { %v2539_v25 = vpop.f32.mrb[4].mxu0  ;;  %v2611_v49 = vpop.f32.mrb[4].mxu1 }
 0x14d   : > { %v2540_v52 = vpop.f32.mrb[5].mxu0  ;;  %v2612_v15 = vpop.f32.mrb[5].mxu1 }
 0x14e   : > { %v3896_v8 = vadd.f32 %v2540_v52, %v2539_v25  ;;  %v3898_v39 = vadd.f32 %v2612_v15, %v2611_v49  ;;  %v2542_v44 = vpop.f32.mrb[6].mxu0  ;;  %v2614_v11 = vpop.f32.mrb[6].mxu1 }
 0x14f   : > { %v2543_v22 = vpop.f32.mrb[7].mxu0  ;;  %v2615_v58 = vpop.f32.mrb[7].mxu1 }
 0x150   : > { %v3900_v36 = vadd.f32 %v2543_v22, %v2542_v44  ;;  %v3902_v23 = vadd.f32 %v2615_v58, %v2614_v11 }
 0x151   : > { %1668 = vmatmul.mubr.bf16.gmra.mrb[112].mxu1 %v3752_v12  ;;  %3006 = vmatmul.mubr.bf16.vlgmr.msra.gmra.mrb[112].mxu0 %v3672_v47 }
 0x152   : > { %1675 = vmatprep.mubr.bf16.mxu1 %v3738_v59  ;;  %3009 = vmatprep.mubr.bf16.mxu0 %v3700_v54 }
 0x154   : > { %v2545_v18 = vpop.f32.mrb[8].mxu0  ;;  %v2617_v27 = vpop.f32.mrb[8].mxu1 }
 0x155   : > { %v2546_v42 = vpop.f32.mrb[9].mxu0  ;;  %v2618_v56 = vpop.f32.mrb[9].mxu1 }
 0x156   : > { %v3908_v31 = vadd.f32 %v2546_v42, %v2545_v18  ;;  %v3910_v0 = vadd.f32 %v2618_v56, %v2617_v27  ;;  %v2548_v26 = vpop.f32.mrb[10].mxu0  ;;  %v2620_v20 = vpop.f32.mrb[10].mxu1 }
 0x157   : > { %v2549_v30 = vpop.f32.mrb[11].mxu0  ;;  %v2621_v21 = vpop.f32.mrb[11].mxu1 }
 0x158   : > { %v3912_v1 = vadd.f32 %v2549_v30, %v2548_v26  ;;  %v3914_v12 = vadd.f32 %v2621_v21, %v2620_v20 }
 0x159   : > { %1676 = vmatmul.mubr.bf16.gmra.mrb[116].mxu1 %v3777_v33  ;;  %3010 = vmatmul.mubr.bf16.gmra.mrb[116].mxu0 %v3728_v41 }
 0x15a   : > { %1683 = vmatprep.mubr.bf16.mxu1 %v3435_v16  ;;  %3013 = vmatprep.mubr.bf16.mxu0 %v3757_v13 }
 0x15c   : > { %v2551_v47 = vpop.f32.mrb[12].mxu0  ;;  %v2623_v54 = vpop.f32.mrb[12].mxu1 }
 0x15d   : > { %v2552_v59 = vpop.f32.mrb[13].mxu0  ;;  %v2624_v53 = vpop.f32.mrb[13].mxu1 }
 0x15e   : > { %v3920_v61 = vadd.f32 %v2552_v59, %v2551_v47  ;;  %v3922_v14 = vadd.f32 %v2624_v53, %v2623_v54  ;;  %v2554_v34 = vpop.f32.mrb[14].mxu0  ;;  %v2626_v45 = vpop.f32.mrb[14].mxu1 }
 0x15f   : > { %v2555_v5 = vpop.f32.mrb[15].mxu0  ;;  %v2627_v4 = vpop.f32.mrb[15].mxu1 }
 0x160   : > { %v3924_v28 = vadd.f32 %v2555_v5, %v2554_v34  ;;  %v3926_v33 = vadd.f32 %v2627_v4, %v2626_v45 }
 0x161   : > { %1684 = vmatmul.mubr.bf16.gmra.mrb[120].mxu1 %v3477_v48  ;;  %3014 = vmatmul.mubr.bf16.gmra.mrb[120].mxu0 %v3782_v29 }
 0x162   : > { %1691 = vmatprep.mubr.bf16.mxu1 %v3454_v32  ;;  %3017 = vmatprep.mubr.bf16.mxu0 %v3798_v24 }
 0x164   : > { %v2557_v16 = vpop.f32.mrb[16].mxu0  ;;  %v2645_v41 = vpop.f32.mrb[16].mxu1 }
 0x165   : > { %v2558_v13 = vpop.f32.mrb[17].mxu0  ;;  %v2646_v35 = vpop.f32.mrb[17].mxu1 }
 0x166   : > { %v3932_v38 = vadd.f32 %v2558_v13, %v2557_v16  ;;  %v2647_v25 = vadd.f32 %v2646_v35, %v2645_v41  ;;  %v2560_v49 = vpop.f32.mrb[18].mxu0  ;;  %v2648_v52 = vpop.f32.mrb[18].mxu1 }
 0x167   : > { %v2561_v15 = vpop.f32.mrb[19].mxu0  ;;  %v2649_v44 = vpop.f32.mrb[19].mxu1 }
 0x168   : > { %v3935_v11 = vadd.f32 %v2647_v25, %v3884_v40  ;;  %v3937_v48 = vadd.f32 %v2561_v15, %v2560_v49  ;;  %v2650_v29 = vadd.f32 %v2649_v44, %v2648_v52 }
 0x169   : > { %1692 = vmatmul.mubr.bf16.gmra.mrb[124].mxu1 %v3516_v9  ;;  %3018 = vmatmul.mubr.bf16.gmra.mrb[124].mxu0 %v3810_v51 }
 0x16a   : > { %v3942_v32 = vadd.f32 %v2650_v29, %v3888_v60  ;;  %1699 = vmatprep.mubr.bf16.mxu1 %v3493_v57  ;;  %3021 = vmatprep.mubr.bf16.mxu0 %v3819_v2 }
 0x16c   : > { %v2563_v24 = vpop.f32.mrb[20].mxu0  ;;  %v2651_v22 = vpop.f32.mrb[20].mxu1 }
 0x16d   : > { %v2564_v58 = vpop.f32.mrb[21].mxu0  ;;  %v2652_v18 = vpop.f32.mrb[21].mxu1 }
 0x16e   : > { %v3946_v40 = vadd.f32 %v2564_v58, %v2563_v24  ;;  %v2653_v27 = vadd.f32 %v2652_v18, %v2651_v22  ;;  %v2566_v42 = vpop.f32.mrb[22].mxu0  ;;  %v2654_v56 = vpop.f32.mrb[22].mxu1 }
 0x16f   : > { %v2567_v26 = vpop.f32.mrb[23].mxu0  ;;  %v2655_v9 = vpop.f32.mrb[23].mxu1 }
 0x170   : > { %v3949_v51 = vadd.f32 %v2653_v27, %v3896_v8  ;;  %v3951_v60 = vadd.f32 %v2567_v26, %v2566_v42  ;;  %v2656_v20 = vadd.f32 %v2655_v9, %v2654_v56 }
 0x171   : > { %1700 = vmatmul.mubr.bf16.gmra.mrb[128].mxu1 %v3540_v37  ;;  %3022 = vmatmul.mubr.bf16.gmra.mrb[128].mxu0 %v3827_v50 }
 0x172   : > { %v3956_v57 = vadd.f32 %v2656_v20, %v3900_v36  ;;  %1707 = vmatprep.mubr.bf16.mxu1 %v3507_v6  ;;  %3025 = vmatprep.mubr.bf16.mxu0 %v3491_v55 }
 0x174   : > { %v2569_v2 = vpop.f32.mrb[24].mxu0  ;;  %v2657_v30 = vpop.f32.mrb[24].mxu1 }
 0x175   : > { %v2570_v21 = vpop.f32.mrb[25].mxu0  ;;  %v2658_v47 = vpop.f32.mrb[25].mxu1 }
 0x176   : > { %v3960_v8 = vadd.f32 %v2570_v21, %v2569_v2  ;;  %v2659_v54 = vadd.f32 %v2658_v47, %v2657_v30  ;;  %v2572_v59 = vpop.f32.mrb[26].mxu0  ;;  %v2660_v53 = vpop.f32.mrb[26].mxu1 }
 0x177   : > { %v2573_v34 = vpop.f32.mrb[27].mxu0  ;;  %v2661_v37 = vpop.f32.mrb[27].mxu1 }
 0x178   : > { %v3963_v50 = vadd.f32 %v2659_v54, %v3908_v31  ;;  %v3965_v36 = vadd.f32 %v2573_v34, %v2572_v59  ;;  %v2662_v45 = vadd.f32 %v2661_v37, %v2660_v53 }
 0x179   : > { %1708 = vmatmul.mubr.bf16.gmra.mrb[132].mxu1 %v3565_v63  ;;  %3026 = vmatmul.mubr.bf16.gmra.mrb[132].mxu0 %v3521_v17 }
 0x17a   : > { %v3970_v55 = vadd.f32 %v2662_v45, %v3912_v1  ;;  %1715 = vmatprep.mubr.bf16.mxu1 %v3760_v46  ;;  %3029 = vmatprep.mubr.bf16.mxu0 %v3546_v43 }
 0x17c   : > { %v2575_v5 = vpop.f32.mrb[28].mxu0  ;;  %v2663_v4 = vpop.f32.mrb[28].mxu1 }
 0x17d   : > { %v2576_v16 = vpop.f32.mrb[29].mxu0  ;;  %v2664_v41 = vpop.f32.mrb[29].mxu1 }
 0x17e   : > { %v3974_v31 = vadd.f32 %v2576_v16, %v2575_v5  ;;  %v2665_v13 = vadd.f32 %v2664_v41, %v2663_v4  ;;  %v2578_v35 = vpop.f32.mrb[30].mxu0  ;;  %v2666_v25 = vpop.f32.mrb[30].mxu1 }
 0x17f   : > { %v2579_v49 = vpop.f32.mrb[31].mxu0  ;;  %v2667_v52 = vpop.f32.mrb[31].mxu1 }
 0x180   : > { %v3977_v17 = vadd.f32 %v2665_v13, %v3920_v61  ;;  %v3979_v1 = vadd.f32 %v2579_v49, %v2578_v35  ;;  %v2668_v15 = vadd.f32 %v2667_v52, %v2666_v25 }
 0x181   : > { %1716 = vmatmul.mubr.bf16.gmra.mrb[136].mxu1 %v3846_v3  ;;  %3030 = vmatmul.mubr.bf16.gmra.mrb[136].mxu0 %v3576_v7 }
 0x182   : > { %v3984_v43 = vadd.f32 %v2668_v15, %v3924_v28  ;;  %1723 = vmatprep.mubr.bf16.mxu1 %v3507_v6  ;;  %3033 = vmatprep.mubr.bf16.mxu0 %v3788_v10 }
 0x184   : > { %v2581_v46 = vpop.f32.mrb[32].mxu0  ;;  %v2669_v44 = vpop.f32.mrb[32].mxu1 }
 0x185   : > { %v2582_v29 = vpop.f32.mrb[33].mxu0  ;;  %v2670_v24 = vpop.f32.mrb[33].mxu1 }
 0x186   : > { %v3988_v61 = vadd.f32 %v2582_v29, %v2581_v46  ;;  %v2671_v22 = vadd.f32 %v2670_v24, %v2669_v44  ;;  %v2584_v58 = vpop.f32.mrb[34].mxu0  ;;  %v2672_v18 = vpop.f32.mrb[34].mxu1 }
 0x187   : > { %v2585_v27 = vpop.f32.mrb[35].mxu0  ;;  %v2673_v3 = vpop.f32.mrb[35].mxu1 }
 0x188   : > { %v3991_v42 = vadd.f32 %v2671_v22, %v3932_v38  ;;  %v2586_v28 = vadd.f32 %v2585_v27, %v2584_v58  ;;  %v2674_v56 = vadd.f32 %v2673_v3, %v2672_v18 }
 0x189   : > { %1724 = vmatmul.mubr.bf16.gmra.mrb[140].mxu1 %v3565_v63  ;;  %3034 = vmatmul.mubr.bf16.gmra.mrb[140].mxu0 %v3576_v7 }
 0x18a   : > { %v3996_v6 = vadd.f32 %v2674_v56, %v3937_v48 }
 0x18c   : > { %v2587_v10 = vpop.f32.mrb[36].mxu0  ;;  %v2675_v26 = vpop.f32.mrb[36].mxu1 }
 0x18d   : > { %v2588_v9 = vpop.f32.mrb[37].mxu0  ;;  %v2676_v20 = vpop.f32.mrb[37].mxu1 }
 0x18e   : > { %v3998_v2 = vadd.f32 %v2588_v9, %v2587_v10  ;;  %v2677_v30 = vadd.f32 %v2676_v20, %v2675_v26  ;;  %v2590_v21 = vpop.f32.mrb[38].mxu0  ;;  %v2678_v47 = vpop.f32.mrb[38].mxu1 }
 0x18f   : > { %v2591_v38 = vpop.f32.mrb[39].mxu0  ;;  %v2679_v54 = vpop.f32.mrb[39].mxu1 }
 0x190   : > { %v4001_v59 = vadd.f32 %v2677_v30, %v3946_v40  ;;  %v2592_v63 = vadd.f32 %v2591_v38, %v2590_v21  ;;  %v2680_v53 = vadd.f32 %v2679_v54, %v2678_v47 }
 0x192   : > { %v4004_v7 = vadd.f32 %v2680_v53, %v3951_v60 }
 0x194   : > { %v2593_v48 = vpop.f32.mrb[40].mxu0  ;;  %v2681_v34 = vpop.f32.mrb[40].mxu1 }
 0x195   : > { %v2594_v37 = vpop.f32.mrb[41].mxu0  ;;  %v2682_v45 = vpop.f32.mrb[41].mxu1 }
 0x196   : > { %v4006_v5 = vadd.f32 %v2594_v37, %v2593_v48  ;;  %v2683_v4 = vadd.f32 %v2682_v45, %v2681_v34  ;;  %v2596_v16 = vpop.f32.mrb[42].mxu0  ;;  %v2684_v41 = vpop.f32.mrb[42].mxu1 }
 0x197   : > { %v2597_v13 = vpop.f32.mrb[43].mxu0  ;;  %v2685_v35 = vpop.f32.mrb[43].mxu1 }
 0x198   : > { %v4009_v25 = vadd.f32 %v2683_v4, %v3960_v8  ;;  %v4011_v40 = vadd.f32 %v2597_v13, %v2596_v16  ;;  %v2686_v49 = vadd.f32 %v2685_v35, %v2684_v41 }
 0x19a   : > { %v4014_v60 = vadd.f32 %v2686_v49, %v3965_v36 }
 0x19c   : > { %v2599_v52 = vpop.f32.mrb[44].mxu0  ;;  %v2687_v15 = vpop.f32.mrb[44].mxu1 }
 0x19d   : > { %v2600_v46 = vpop.f32.mrb[45].mxu0  ;;  %v2688_v44 = vpop.f32.mrb[45].mxu1 }
 0x19e   : > { %v4016_v29 = vadd.f32 %v2600_v46, %v2599_v52  ;;  %v2689_v24 = vadd.f32 %v2688_v44, %v2687_v15  ;;  %v2602_v22 = vpop.f32.mrb[46].mxu0  ;;  %v2690_v58 = vpop.f32.mrb[46].mxu1 }
 0x19f   : > { %v2603_v18 = vpop.f32.mrb[47].mxu0  ;;  %v2691_v27 = vpop.f32.mrb[47].mxu1 }
 0x1a0   : > { %v4019_v8 = vadd.f32 %v2689_v24, %v3974_v31  ;;  %v4021_v3 = vadd.f32 %v2603_v18, %v2602_v22  ;;  %v2692_v56 = vadd.f32 %v2691_v27, %v2690_v58 }
 0x1a2   : > { %v4024_v36 = vadd.f32 %v2692_v56, %v3979_v1 }
 0x1a4   : > { %v2693_v10 = vpop.f32.mrb[48].mxu1  ;;  %v2757_v26 = vpop.f32.mrb[48].mxu0 }
 0x1a5   : > { %v2694_v9 = vpop.f32.mrb[49].mxu1  ;;  %v2758_v20 = vpop.f32.mrb[49].mxu0 }
 0x1a6   : > { %v2695_v30 = vadd.f32 %v2694_v9, %v2693_v10  ;;  %v2759_v21 = vadd.f32 %v2758_v20, %v2757_v26  ;;  %v2696_v47 = vpop.f32.mrb[50].mxu1  ;;  %v2760_v38 = vpop.f32.mrb[50].mxu0 }
 0x1a7   : > { %v2697_v54 = vpop.f32.mrb[51].mxu1  ;;  %v2761_v53 = vpop.f32.mrb[51].mxu0 }
 0x1a8   : > { %v4027_v48 = vadd.f32 %v2695_v30, %v3988_v61  ;;  %v4030_v31 = vadd.f32 %v2759_v21, %v3935_v11  ;;  %v2698_v34 = vadd.f32 %v2697_v54, %v2696_v47  ;;  %v2762_v37 = vadd.f32 %v2761_v53, %v2760_v38 }
 0x1aa   : > { %v4032_v1 = vadd.f32 %v2698_v34, %v2586_v28  ;;  %v4035_v45 = vadd.f32 %v2762_v37, %v3942_v32 }
 0x1ac   : > { %v2699_v4 = vpop.f32.mrb[52].mxu1  ;;  %v2763_v16 = vpop.f32.mrb[52].mxu0 }
 0x1ad   : > { %v2700_v41 = vpop.f32.mrb[53].mxu1  ;;  %v2764_v13 = vpop.f32.mrb[53].mxu0 }
 0x1ae   : > { %v2701_v35 = vadd.f32 %v2700_v41, %v2699_v4  ;;  %v2765_v49 = vadd.f32 %v2764_v13, %v2763_v16  ;;  %v2702_v52 = vpop.f32.mrb[54].mxu1  ;;  %v2766_v15 = vpop.f32.mrb[54].mxu0 }
 0x1af   : > { %v2703_v61 = vpop.f32.mrb[55].mxu1  ;;  %v2767_v46 = vpop.f32.mrb[55].mxu0 }
 0x1b0   : > { %v4038_v11 = vadd.f32 %v2701_v35, %v3998_v2  ;;  %v4041_v44 = vadd.f32 %v2765_v49, %v3949_v51  ;;  %v2704_v28 = vadd.f32 %v2703_v61, %v2702_v52  ;;  %v2768_v24 = vadd.f32 %v2767_v46, %v2766_v15 }
 0x1b2   : > { %v4043_v32 = vadd.f32 %v2704_v28, %v2592_v63  ;;  %v4046_v22 = vadd.f32 %v2768_v24, %v3956_v57 }
 0x1b4   : > { %v2705_v58 = vpop.f32.mrb[56].mxu1  ;;  %v2769_v18 = vpop.f32.mrb[56].mxu0 }
 0x1b5   : > { %v2706_v27 = vpop.f32.mrb[57].mxu1  ;;  %v2770_v56 = vpop.f32.mrb[57].mxu0 }
 0x1b6   : > { %v2707_v10 = vadd.f32 %v2706_v27, %v2705_v58  ;;  %v2771_v26 = vadd.f32 %v2770_v56, %v2769_v18  ;;  %v2708_v9 = vpop.f32.mrb[58].mxu1  ;;  %v2772_v20 = vpop.f32.mrb[58].mxu0 }
 0x1b7   : > { %v2709_v2 = vpop.f32.mrb[59].mxu1  ;;  %v2773_v30 = vpop.f32.mrb[59].mxu0 }
 0x1b8   : > { %v4049_v51 = vadd.f32 %v2707_v10, %v4006_v5  ;;  %v4052_v21 = vadd.f32 %v2771_v26, %v3963_v50  ;;  %v2710_v63 = vadd.f32 %v2709_v2, %v2708_v9  ;;  %v2774_v47 = vadd.f32 %v2773_v30, %v2772_v20 }
 0x1ba   : > { %v4055_v57 = vadd.f32 %v2710_v63, %v4011_v40  ;;  %v4058_v38 = vadd.f32 %v2774_v47, %v3970_v55 }
 0x1bc   : > { %v2711_v54 = vpop.f32.mrb[60].mxu1  ;;  %v2775_v53 = vpop.f32.mrb[60].mxu0 }
 0x1bd   : > { %v2712_v34 = vpop.f32.mrb[61].mxu1  ;;  %v2776_v37 = vpop.f32.mrb[61].mxu0 }
 0x1be   : > { %v2713_v4 = vadd.f32 %v2712_v34, %v2711_v54  ;;  %v2777_v16 = vadd.f32 %v2776_v37, %v2775_v53  ;;  %v2714_v41 = vpop.f32.mrb[62].mxu1  ;;  %v2778_v5 = vpop.f32.mrb[62].mxu0 }
 0x1bf   : > { %v2715_v13 = vpop.f32.mrb[63].mxu1  ;;  %v2779_v35 = vpop.f32.mrb[63].mxu0 }
 0x1c0   : > { %v4061_v50 = vadd.f32 %v2713_v4, %v4016_v29  ;;  %v4064_v49 = vadd.f32 %v2777_v16, %v3977_v17  ;;  %v2716_v40 = vadd.f32 %v2715_v13, %v2714_v41  ;;  %v2780_v52 = vadd.f32 %v2779_v35, %v2778_v5 }
 0x1c2   : > { %v4067_v55 = vadd.f32 %v2716_v40, %v4021_v3  ;;  %v4070_v15 = vadd.f32 %v2780_v52, %v3984_v43 }
 0x1c4   : > { %v2717_v61 = vpop.f32.mrb[64].mxu1  ;;  %v2781_v46 = vpop.f32.mrb[64].mxu0 }
 0x1c5   : > { %v2718_v28 = vpop.f32.mrb[65].mxu1  ;;  %v2782_v24 = vpop.f32.mrb[65].mxu0 }
 0x1c6   : > { %v2719_v58 = vadd.f32 %v2718_v28, %v2717_v61  ;;  %v2783_v18 = vadd.f32 %v2782_v24, %v2781_v46  ;;  %v2720_v27 = vpop.f32.mrb[66].mxu1  ;;  %v2784_v29 = vpop.f32.mrb[66].mxu0 }
 0x1c7   : > { %v2721_v56 = vpop.f32.mrb[67].mxu1  ;;  %v2785_v10 = vpop.f32.mrb[67].mxu0 }
 0x1c8   : > { %v4073_v17 = vadd.f32 %v2719_v58, %v3886_v62  ;;  %v4076_v26 = vadd.f32 %v2783_v18, %v3991_v42  ;;  %v2722_v3 = vadd.f32 %v2721_v56, %v2720_v27  ;;  %v2786_v9 = vadd.f32 %v2785_v10, %v2784_v29 }
 0x1ca   : > { %v4079_v43 = vadd.f32 %v2722_v3, %v3890_v19  ;;  %v4082_v20 = vadd.f32 %v2786_v9, %v3996_v6 }
 0x1cc   : > { %v2723_v2 = vpop.f32.mrb[68].mxu1  ;;  %v2787_v30 = vpop.f32.mrb[68].mxu0 }
 0x1cd   : > { %v2724_v63 = vpop.f32.mrb[69].mxu1  ;;  %v2788_v47 = vpop.f32.mrb[69].mxu0 }
 0x1ce   : > { %v2725_v54 = vadd.f32 %v2724_v63, %v2723_v2  ;;  %v2789_v53 = vadd.f32 %v2788_v47, %v2787_v30  ;;  %v2726_v34 = vpop.f32.mrb[70].mxu1  ;;  %v2790_v62 = vpop.f32.mrb[70].mxu0 }
 0x1cf   : > { %v2727_v37 = vpop.f32.mrb[71].mxu1  ;;  %v2791_v4 = vpop.f32.mrb[71].mxu0 }
 0x1d0   : > { %v4085_v42 = vadd.f32 %v2725_v54, %v3898_v39  ;;  %v4088_v16 = vadd.f32 %v2789_v53, %v4001_v59  ;;  %v2728_v19 = vadd.f32 %v2727_v37, %v2726_v34  ;;  %v2792_v41 = vadd.f32 %v2791_v4, %v2790_v62 }
 0x1d2   : > { %v4091_v6 = vadd.f32 %v2728_v19, %v3902_v23  ;;  %v4094_v5 = vadd.f32 %v2792_v41, %v4004_v7 }
 0x1d4   : > { %v2729_v13 = vpop.f32.mrb[72].mxu1  ;;  %v2793_v35 = vpop.f32.mrb[72].mxu0 }
 0x1d5   : > { %v2730_v40 = vpop.f32.mrb[73].mxu1  ;;  %v2794_v52 = vpop.f32.mrb[73].mxu0 }
 0x1d6   : > { %v2731_v61 = vadd.f32 %v2730_v40, %v2729_v13  ;;  %v2795_v46 = vadd.f32 %v2794_v52, %v2793_v35  ;;  %v2732_v28 = vpop.f32.mrb[74].mxu1  ;;  %v2796_v39 = vpop.f32.mrb[74].mxu0 }
 0x1d7   : > { %v2733_v24 = vpop.f32.mrb[75].mxu1  ;;  %v2797_v58 = vpop.f32.mrb[75].mxu0 }
 0x1d8   : > { %v4097_v59 = vadd.f32 %v2731_v61, %v3910_v0  ;;  %v4100_v18 = vadd.f32 %v2795_v46, %v4009_v25  ;;  %v2734_v23 = vadd.f32 %v2733_v24, %v2732_v28  ;;  %v2798_v27 = vadd.f32 %v2797_v58, %v2796_v39 }
 0x1da   : > { %v4103_v7 = vadd.f32 %v2734_v23, %v3914_v12  ;;  %v4106_v29 = vadd.f32 %v2798_v27, %v4014_v60 }
 0x1dc   : > { %v2735_v56 = vpop.f32.mrb[76].mxu1  ;;  %v2799_v10 = vpop.f32.mrb[76].mxu0 }
 0x1dd   : > { %v2736_v3 = vpop.f32.mrb[77].mxu1  ;;  %v2800_v9 = vpop.f32.mrb[77].mxu0 }
 0x1de   : > { %v2737_v2 = vadd.f32 %v2736_v3, %v2735_v56  ;;  %v2801_v30 = vadd.f32 %v2800_v9, %v2799_v10  ;;  %v2738_v63 = vpop.f32.mrb[78].mxu1  ;;  %v2802_v0 = vpop.f32.mrb[78].mxu0 }
 0x1df   : > { %v2739_v47 = vpop.f32.mrb[79].mxu1  ;;  %v2803_v54 = vpop.f32.mrb[79].mxu0 }
 0x1e0   : > { %v4109_v25 = vadd.f32 %v2737_v2, %v3922_v14  ;;  %v4112_v53 = vadd.f32 %v2801_v30, %v4019_v8  ;;  %v2740_v12 = vadd.f32 %v2739_v47, %v2738_v63  ;;  %v2804_v34 = vadd.f32 %v2803_v54, %v2802_v0 }
 0x1e2   : > { %v4115_v60 = vadd.f32 %v2740_v12, %v3926_v33  ;;  %v4118_v62 = vadd.f32 %v2804_v34, %v4024_v36 }
 0x1e4   : > { %v2805_v37 = vpop.f32.mrb[80].mxu0  ;;  %v2869_v4 = vpop.f32.mrb[80].mxu1 }
 0x1e5   : > { %v2806_v19 = vpop.f32.mrb[81].mxu0  ;;  %v2870_v41 = vpop.f32.mrb[81].mxu1 }
 0x1e6   : > { %v2807_v13 = vadd.f32 %v2806_v19, %v2805_v37  ;;  %v2871_v35 = vadd.f32 %v2870_v41, %v2869_v4  ;;  %v2808_v40 = vpop.f32.mrb[82].mxu0  ;;  %v2872_v14 = vpop.f32.mrb[82].mxu1 }
 0x1e7   : > { %v2809_v52 = vpop.f32.mrb[83].mxu0  ;;  %v2873_v61 = vpop.f32.mrb[83].mxu1 }
 0x1e8   : > { %v4121_v8 = vadd.f32 %v2807_v13, %v4027_v48  ;;  %v2810_v46 = vadd.f32 %v2809_v52, %v2808_v40  ;;  %v2874_v28 = vadd.f32 %v2873_v61, %v2872_v14  ;;  %v4124_v33 = vadd.f32 %v2871_v35, %v4030_v31 }
 0x1ea   : > { %v4127_v36 = vadd.f32 %v2810_v46, %v4032_v1  ;;  %v4130_v39 = vadd.f32 %v2874_v28, %v4035_v45 }
 0x1ec   : > { %v2811_v24 = vpop.f32.mrb[84].mxu0  ;;  %v2875_v58 = vpop.f32.mrb[84].mxu1 }
 0x1ed   : > { %v2812_v23 = vpop.f32.mrb[85].mxu0  ;;  %v2876_v27 = vpop.f32.mrb[85].mxu1 }
 0x1ee   : > { %v2813_v56 = vadd.f32 %v2812_v23, %v2811_v24  ;;  %v2877_v10 = vadd.f32 %v2876_v27, %v2875_v58  ;;  %v2814_v3 = vpop.f32.mrb[86].mxu0  ;;  %v2878_v48 = vpop.f32.mrb[86].mxu1 }
 0x1ef   : > { %v2815_v9 = vpop.f32.mrb[87].mxu0  ;;  %v2879_v2 = vpop.f32.mrb[87].mxu1 }
 0x1f0   : > { %v4133_v30 = vadd.f32 %v2813_v56, %v4038_v11  ;;  %v2816_v31 = vadd.f32 %v2815_v9, %v2814_v3  ;;  %v2880_v63 = vadd.f32 %v2879_v2, %v2878_v48  ;;  %v4136_v1 = vadd.f32 %v2877_v10, %v4041_v44 }
 0x1f2   : > { %v4139_v45 = vadd.f32 %v2816_v31, %v4043_v32  ;;  %v4142_v0 = vadd.f32 %v2880_v63, %v4046_v22 }
 0x1f4   : > { %v2817_v47 = vpop.f32.mrb[88].mxu0  ;;  %v2881_v54 = vpop.f32.mrb[88].mxu1 }
 0x1f5   : > { %v2818_v12 = vpop.f32.mrb[89].mxu0  ;;  %v2882_v34 = vpop.f32.mrb[89].mxu1 }
 0x1f6   : > { %v2819_v37 = vadd.f32 %v2818_v12, %v2817_v47  ;;  %v2883_v4 = vadd.f32 %v2882_v34, %v2881_v54  ;;  %v2820_v19 = vpop.f32.mrb[90].mxu0  ;;  %v2884_v11 = vpop.f32.mrb[90].mxu1 }
 0x1f7   : > { %v2821_v41 = vpop.f32.mrb[91].mxu0  ;;  %v2885_v13 = vpop.f32.mrb[91].mxu1 }
 0x1f8   : > { %v4145_v35 = vadd.f32 %v2819_v37, %v4049_v51  ;;  %v2822_v44 = vadd.f32 %v2821_v41, %v2820_v19  ;;  %v2886_v40 = vadd.f32 %v2885_v13, %v2884_v11  ;;  %v4148_v32 = vadd.f32 %v2883_v4, %v4052_v21 }
 0x1fa   : > { %v4151_v22 = vadd.f32 %v2822_v44, %v4055_v57  ;;  %v4154_v14 = vadd.f32 %v2886_v40, %v4058_v38 }
 0x1fc   : > { %v2823_v52 = vpop.f32.mrb[92].mxu0  ;;  %v2887_v61 = vpop.f32.mrb[92].mxu1 }
 0x1fd   : > { %v2824_v46 = vpop.f32.mrb[93].mxu0  ;;  %v2888_v28 = vpop.f32.mrb[93].mxu1 }
 0x1fe   : > { %v2825_v24 = vadd.f32 %v2824_v46, %v2823_v52  ;;  %v2889_v58 = vadd.f32 %v2888_v28, %v2887_v61  ;;  %v2826_v23 = vpop.f32.mrb[94].mxu0  ;;  %v2890_v51 = vpop.f32.mrb[94].mxu1 }
 0x1ff   : > { %v2827_v27 = vpop.f32.mrb[95].mxu0  ;;  %v2891_v56 = vpop.f32.mrb[95].mxu1 }
 0x200   : > { %v4157_v10 = vadd.f32 %v2825_v24, %v4061_v50  ;;  %v2828_v21 = vadd.f32 %v2827_v27, %v2826_v23  ;;  %v2892_v3 = vadd.f32 %v2891_v56, %v2890_v51  ;;  %v4160_v57 = vadd.f32 %v2889_v58, %v4064_v49 }
 0x202   : > { %v4163_v38 = vadd.f32 %v2828_v21, %v4067_v55  ;;  %v4166_v48 = vadd.f32 %v2892_v3, %v4070_v15 }
 0x204   : > { %v2829_v9 = vpop.f32.mrb[96].mxu0  ;;  %v2893_v2 = vpop.f32.mrb[96].mxu1 }
 0x205   : > { %v2830_v31 = vpop.f32.mrb[97].mxu0  ;;  %v2894_v63 = vpop.f32.mrb[97].mxu1 }
 0x206   : > { %v2831_v47 = vadd.f32 %v2830_v31, %v2829_v9  ;;  %v2895_v54 = vadd.f32 %v2894_v63, %v2893_v2  ;;  %v2832_v12 = vpop.f32.mrb[98].mxu0  ;;  %v2896_v50 = vpop.f32.mrb[98].mxu1 }
 0x207   : > { %v2833_v34 = vpop.f32.mrb[99].mxu0  ;;  %v2897_v37 = vpop.f32.mrb[99].mxu1 }
 0x208   : > { %v4169_v4 = vadd.f32 %v2831_v47, %v4073_v17  ;;  %v2834_v49 = vadd.f32 %v2833_v34, %v2832_v12  ;;  %v2898_v19 = vadd.f32 %v2897_v37, %v2896_v50  ;;  %v4172_v55 = vadd.f32 %v2895_v54, %v4076_v26 }
 0x20a   : > { %v4175_v15 = vadd.f32 %v2834_v49, %v4079_v43  ;;  %v4178_v11 = vadd.f32 %v2898_v19, %v4082_v20 }
 0x20c   : > { %v2835_v41 = vpop.f32.mrb[100].mxu0  ;;  %v2899_v13 = vpop.f32.mrb[100].mxu1 }
 0x20d   : > { %v2836_v44 = vpop.f32.mrb[101].mxu0  ;;  %v2900_v40 = vpop.f32.mrb[101].mxu1 }
 0x20e   : > { %v2837_v52 = vadd.f32 %v2836_v44, %v2835_v41  ;;  %v2901_v61 = vadd.f32 %v2900_v40, %v2899_v13  ;;  %v2838_v46 = vpop.f32.mrb[102].mxu0  ;;  %v2902_v17 = vpop.f32.mrb[102].mxu1 }
 0x20f   : > { %v2839_v28 = vpop.f32.mrb[103].mxu0  ;;  %v2903_v24 = vpop.f32.mrb[103].mxu1 }
 0x210   : > { %v4181_v58 = vadd.f32 %v2837_v52, %v4085_v42  ;;  %v2840_v26 = vadd.f32 %v2839_v28, %v2838_v46  ;;  %v2904_v23 = vadd.f32 %v2903_v24, %v2902_v17  ;;  %v4184_v43 = vadd.f32 %v2901_v61, %v4088_v16 }
 0x212   : > { %v4187_v20 = vadd.f32 %v2840_v26, %v4091_v6  ;;  %v4190_v51 = vadd.f32 %v2904_v23, %v4094_v5 }
 0x214   : > { %v2841_v27 = vpop.f32.mrb[104].mxu0  ;;  %v2905_v56 = vpop.f32.mrb[104].mxu1 }
 0x215   : > { %v2842_v21 = vpop.f32.mrb[105].mxu0  ;;  %v2906_v3 = vpop.f32.mrb[105].mxu1 }
 0x216   : > { %v2843_v9 = vadd.f32 %v2842_v21, %v2841_v27  ;;  %v2907_v2 = vadd.f32 %v2906_v3, %v2905_v56  ;;  %v2844_v42 = vpop.f32.mrb[106].mxu0  ;;  %v2908_v31 = vpop.f32.mrb[106].mxu1 }
 0x217   : > { %v2845_v63 = vpop.f32.mrb[107].mxu0  ;;  %v2909_v47 = vpop.f32.mrb[107].mxu1 }
 0x218   : > { %v4193_v16 = vadd.f32 %v2843_v9, %v4097_v59  ;;  %v2846_v54 = vadd.f32 %v2845_v63, %v2844_v42  ;;  %v2910_v6 = vadd.f32 %v2909_v47, %v2908_v31  ;;  %v4196_v12 = vadd.f32 %v2907_v2, %v4100_v18 }
 0x21a   : > { %v4199_v5 = vadd.f32 %v2846_v54, %v4103_v7  ;;  %v4202_v50 = vadd.f32 %v2910_v6, %v4106_v29 }
 0x21c   : > { %v2847_v34 = vpop.f32.mrb[108].mxu0  ;;  %v2911_v37 = vpop.f32.mrb[108].mxu1 }
 0x21d   : > { %v2848_v49 = vpop.f32.mrb[109].mxu0  ;;  %v2912_v19 = vpop.f32.mrb[109].mxu1 }
 0x21e   : > { %v2849_v41 = vadd.f32 %v2848_v49, %v2847_v34  ;;  %v2913_v59 = vadd.f32 %v2912_v19, %v2911_v37  ;;  %v2850_v13 = vpop.f32.mrb[110].mxu0  ;;  %v2914_v44 = vpop.f32.mrb[110].mxu1 }
 0x21f   : > { %v2851_v40 = vpop.f32.mrb[111].mxu0  ;;  %v2915_v52 = vpop.f32.mrb[111].mxu1 }
 0x220   : > { %v4206_v18 = vadd.f32 %v2849_v41, %v4109_v25  ;;  %v2852_v7 = vadd.f32 %v2851_v40, %v2850_v13  ;;  %v2916_v61 = vadd.f32 %v2915_v52, %v2914_v44  ;;  %v4209_v29 = vadd.f32 %v2913_v59, %v4112_v53 }
 0x222   : > { %v4215_v46 = vadd.f32 %v2852_v7, %v4115_v60  ;;  %v4218_v17 = vadd.f32 %v2916_v61, %v4118_v62 }
 0x224   : > { %v2917_v28 = vpop.f32.mrb[112].mxu1  ;;  %v3007_v24 = vpop.f32.mrb[112].mxu0 }
 0x225   : > { %v1775_v26 = vadd.f32 %v3007_v24, %v4136_v1  ;;  %v2918_v25 = vpop.f32.mrb[113].mxu1  ;;  %v1766_v23 = vpop.f32.mrb[113].mxu0 }
 0x226   : > { %v2919_v27 = vadd.f32 %v2918_v25, %v2917_v28  ;;  %v1767_v53 = vadd.f32 %v1766_v23, %v4124_v33  ;;  %v2920_v56 = vpop.f32.mrb[114].mxu1  ;;  %v3008_v21 = vpop.f32.mrb[114].mxu0 }
 0x227   : > { %v1778_v3 = vadd.f32 %v3008_v21, %v4142_v0  ;;  %v2921_v9 = vpop.f32.mrb[115].mxu1  ;;  %v1769_v60 = vpop.f32.mrb[115].mxu0  ;;  %v1933_v54 = vmul.f32 %v1775_v26, %v1775_v26 }
 0x228   : > { %v2922_v62 = vadd.f32 %v2921_v9, %v2920_v56  ;;  %v1770_v1 = vadd.f32 %v1769_v60, %v4130_v39  ;;  %v4231_v2 = vadd.f32 %v2919_v27, %v4121_v8  ;;  %v1931_v33 = vmul.f32 %v1767_v53, %v1767_v53 }
 0x229   : > { %v2430_v42 = vpack.c.bf16 %v1778_v3, %v1775_v26  ;;  %v1934_v19 = vmul.f32 %v1778_v3, %v1778_v3 }
 0x22a   : > { %v1893_v31 = vadd.f32 %v1770_v1, %v1767_v53  ;;  %v1932_v63 = vmul.f32 %v1770_v1, %v1770_v1  ;;  %v2425_v0 = vpack.c.bf16 %v1770_v1, %v1767_v53  ;;  %v4234_v47 = vadd.f32 %v2922_v62, %v4127_v36 }
 0x22b   : > { %2502 = vst [vmem:[%s4227_s21 + $0x8] sm:$0xff] %v2430_v42  }
 0x22c   : > { %v1894_v6 = vadd.f32 %v1893_v31, %v1775_v26  ;;  %v1963_v34 = vadd.f32 %v1932_v63, %v1931_v33  ;;  %2426 = vst [vmem:[%s4227_s21] sm:$0xff] %v2425_v0   ;;  %v2923_v37 = vpop.f32.mrb[116].mxu1  ;;  %v3011_v49 = vpop.f32.mrb[116].mxu0 }
 0x22d   : > { %v1791_v39 = vadd.f32 %v3011_v49, %v4160_v57  ;;  %v2924_v8 = vpop.f32.mrb[117].mxu1  ;;  %v1782_v41 = vpop.f32.mrb[117].mxu0 }
 0x22e   : > { %v1964_v59 = vadd.f32 %v1963_v34, %v1933_v54  ;;  %v2925_v13 = vadd.f32 %v2924_v8, %v2923_v37  ;;  %v1783_v44 = vadd.f32 %v1782_v41, %v4148_v32  ;;  %v1895_v40 = vadd.f32 %v1894_v6, %v1778_v3  ;;  %v2926_v36 = vpop.f32.mrb[118].mxu1  ;;  %v3012_v52 = vpop.f32.mrb[118].mxu0 }
 0x22f   : > { %v1794_v7 = vadd.f32 %v3012_v52, %v4166_v48  ;;  %v2927_v61 = vpop.f32.mrb[119].mxu1  ;;  %v1785_v28 = vpop.f32.mrb[119].mxu0  ;;  %v1937_v62 = vmul.f32 %v1791_v39, %v1791_v39 }
 0x230   : > { %v1896_v24 = vadd.f32 %v1895_v40, %v1783_v44  ;;  %v1935_v26 = vmul.f32 %v1783_v44, %v1783_v44  ;;  %v1965_v25 = vadd.f32 %v1964_v59, %v1934_v19  ;;  %v2928_v23 = vadd.f32 %v2927_v61, %v2926_v36 }
 0x231   : > { %v2440_v57 = vpack.c.bf16 %v1794_v7, %v1791_v39  ;;  %v1786_v27 = vadd.f32 %v1785_v28, %v4154_v14  ;;  %v4243_v53 = vadd.f32 %v2925_v13, %v4133_v30  ;;  %v1938_v54 = vmul.f32 %v1794_v7, %v1794_v7 }
 0x232   : > { %v1966_v32 = vadd.f32 %v1965_v25, %v1935_v26  ;;  %v4246_v56 = vadd.f32 %v2928_v23, %v4139_v45 }
 0x233   : > { %2504 = vst [vmem:[%s4227_s21 + $0x18] sm:$0xff] %v2440_v57   ;;  %v1897_v21 = vadd.f32 %v1896_v24, %v1786_v27  ;;  %v1936_v48 = vmul.f32 %v1786_v27, %v1786_v27  ;;  %v2435_v3 = vpack.c.bf16 %v1786_v27, %v1783_v44 }
 0x234   : > { %v2929_v9 = vpop.f32.mrb[120].mxu1  ;;  %v3015_v60 = vpop.f32.mrb[120].mxu0 }
 0x235   : > { %v1898_v1 = vadd.f32 %v1897_v21, %v1791_v39  ;;  %v1967_v33 = vadd.f32 %v1966_v32, %v1936_v48  ;;  %2503 = vst [vmem:[%s4227_s21 + $0x10] sm:$0xff] %v2435_v3   ;;  %v1807_v42 = vadd.f32 %v3015_v60, %v4184_v43  ;;  %v2930_v14 = vpop.f32.mrb[121].mxu1  ;;  %v1798_v31 = vpop.f32.mrb[121].mxu0 }
 0x236   : > { %v2931_v30 = vadd.f32 %v2930_v14, %v2929_v9  ;;  %v1799_v63 = vadd.f32 %v1798_v31, %v4172_v55  ;;  %v2932_v0 = vpop.f32.mrb[122].mxu1  ;;  %v3016_v45 = vpop.f32.mrb[122].mxu0 }
 0x237   : > { %v1968_v6 = vadd.f32 %v1967_v33, %v1937_v62  ;;  %v1899_v34 = vadd.f32 %v1898_v1, %v1794_v7  ;;  %v1810_v37 = vadd.f32 %v3016_v45, %v4190_v51  ;;  %v2933_v49 = vpop.f32.mrb[123].mxu1  ;;  %v1801_v19 = vpop.f32.mrb[123].mxu0  ;;  %v1941_v28 = vmul.f32 %v1807_v42, %v1807_v42 }
 0x238   : > { %v1939_v39 = vmul.f32 %v1799_v63, %v1799_v63  ;;  %v2934_v8 = vadd.f32 %v2933_v49, %v2932_v0  ;;  %v1802_v43 = vadd.f32 %v1801_v19, %v4178_v11  ;;  %v4255_v41 = vadd.f32 %v2931_v30, %v4145_v35 }
 0x239   : > { %v1900_v59 = vadd.f32 %v1899_v34, %v1799_v63  ;;  %v1969_v55 = vadd.f32 %v1968_v6, %v1938_v54  ;;  %v2450_v13 = vpack.c.bf16 %v1810_v37, %v1807_v42 }
 0x23a   : > { %v1940_v44 = vmul.f32 %v1802_v43, %v1802_v43  ;;  %v2445_v40 = vpack.c.bf16 %v1802_v43, %v1799_v63  ;;  %v4258_v36 = vadd.f32 %v2934_v8, %v4151_v22  ;;  %v1942_v22 = vmul.f32 %v1810_v37, %v1810_v37 }
 0x23b   : > { %v1970_v52 = vadd.f32 %v1969_v55, %v1939_v39  ;;  %2506 = vst [vmem:[%s4227_s21 + $0x28] sm:$0xff] %v2450_v13   ;;  %v1901_v51 = vadd.f32 %v1900_v59, %v1802_v43 }
 0x23c   : > { %2505 = vst [vmem:[%s4227_s21 + $0x20] sm:$0xff] %v2445_v40   ;;  %v2935_v7 = vpop.f32.mrb[124].mxu1  ;;  %v3019_v61 = vpop.f32.mrb[124].mxu0 }
 0x23d   : > { %v1902_v24 = vadd.f32 %v1901_v51, %v1807_v42  ;;  %v1971_v11 = vadd.f32 %v1970_v52, %v1940_v44  ;;  %v1823_v35 = vadd.f32 %v3019_v61, %v4209_v29  ;;  %v2936_v26 = vpop.f32.mrb[125].mxu1  ;;  %v1814_v25 = vpop.f32.mrb[125].mxu0 }
 0x23e   : > { %v2937_v23 = vadd.f32 %v2936_v26, %v2935_v7  ;;  %v1815_v57 = vadd.f32 %v1814_v25, %v4196_v12  ;;  %v2938_v27 = vpop.f32.mrb[126].mxu1  ;;  %v3020_v32 = vpop.f32.mrb[126].mxu0 }
 0x23f   : > { %v1972_v21 = vadd.f32 %v1971_v11, %v1941_v28  ;;  %v1903_v48 = vadd.f32 %v1902_v24, %v1810_v37  ;;  %v1826_v3 = vadd.f32 %v3020_v32, %v4218_v17  ;;  %v2939_v9 = vpop.f32.mrb[127].mxu1  ;;  %v1817_v60 = vpop.f32.mrb[127].mxu0  ;;  %v1945_v6 = vmul.f32 %v1823_v35, %v1823_v35 }
 0x240   : > { %v1943_v62 = vmul.f32 %v1815_v57, %v1815_v57  ;;  %v2940_v1 = vadd.f32 %v2939_v9, %v2938_v27  ;;  %v1818_v29 = vadd.f32 %v1817_v60, %v4202_v50  ;;  %v1694_v33 = vadd.f32 %v2937_v23, %v4157_v10 }
 0x241   : > { %v1904_v42 = vadd.f32 %v1903_v48, %v1815_v57  ;;  %v1973_v14 = vadd.f32 %v1972_v21, %v1942_v22  ;;  %v2460_v12 = vpack.c.bf16 %v1826_v3, %v1823_v35  ;;  %v1946_v59 = vmul.f32 %v1826_v3, %v1826_v3 }
 0x242   : > { %v1944_v31 = vmul.f32 %v1818_v29, %v1818_v29  ;;  %v2455_v30 = vpack.c.bf16 %v1818_v29, %v1815_v57  ;;  %v1697_v63 = vadd.f32 %v2940_v1, %v4163_v38 }
 0x243   : > { %v1974_v0 = vadd.f32 %v1973_v14, %v1943_v62  ;;  %2508 = vst [vmem:[%s4227_s21 + $0x38] sm:$0xff] %v2460_v12   ;;  %v1905_v45 = vadd.f32 %v1904_v42, %v1818_v29 }
 0x244   : > { %2507 = vst [vmem:[%s4227_s21 + $0x30] sm:$0xff] %v2455_v30   ;;  %v2941_v17 = vpop.f32.mrb[128].mxu1  ;;  %v3023_v54 = vpop.f32.mrb[128].mxu0 }
 0x245   : > { %v1906_v34 = vadd.f32 %v1905_v45, %v1823_v35  ;;  %v1975_v37 = vadd.f32 %v1974_v0, %v1944_v31  ;;  %v1839_v50 = vadd.f32 %v3023_v54, %v4243_v53  ;;  %v2942_v49 = vpop.f32.mrb[129].mxu1  ;;  %v1830_v10 = vpop.f32.mrb[129].mxu0 }
 0x246   : > { %v2943_v19 = vadd.f32 %v2942_v49, %v2941_v17  ;;  %v1831_v39 = vadd.f32 %v1830_v10, %v4231_v2  ;;  %v2944_v8 = vpop.f32.mrb[130].mxu1  ;;  %v3024_v43 = vpop.f32.mrb[130].mxu0 }
 0x247   : > { %v1976_v38 = vadd.f32 %v1975_v37, %v1945_v6  ;;  %v1907_v55 = vadd.f32 %v1906_v34, %v1826_v3  ;;  %v1842_v13 = vadd.f32 %v3024_v43, %v4246_v56  ;;  %v2945_v44 = vpop.f32.mrb[131].mxu1  ;;  %v1833_v40 = vpop.f32.mrb[131].mxu0  ;;  %v1949_v57 = vmul.f32 %v1839_v50, %v1839_v50 }
 0x248   : > { %v1947_v52 = vmul.f32 %v1831_v39, %v1831_v39  ;;  %v2946_v51 = vadd.f32 %v2945_v44, %v2944_v8  ;;  %v1834_v53 = vadd.f32 %v1833_v40, %v4234_v47  ;;  %v1702_v7 = vadd.f32 %v2943_v19, %v4169_v4 }
 0x249   : > { %v1908_v61 = vadd.f32 %v1907_v55, %v1831_v39  ;;  %v1977_v28 = vadd.f32 %v1976_v38, %v1946_v59  ;;  %v2470_v2 = vpack.c.bf16 %v1842_v13, %v1839_v50  ;;  %v1950_v60 = vmul.f32 %v1842_v13, %v1842_v13 }
 0x24a   : > { %v1948_v24 = vmul.f32 %v1834_v53, %v1834_v53  ;;  %v2465_v11 = vpack.c.bf16 %v1834_v53, %v1831_v39  ;;  %v1705_v35 = vadd.f32 %v2946_v51, %v4175_v15 }
 0x24b   : > { %v1978_v26 = vadd.f32 %v1977_v28, %v1947_v52  ;;  %2510 = vst [vmem:[%s4227_s21 + $0x48] sm:$0xff] %v2470_v2   ;;  %v1909_v25 = vadd.f32 %v1908_v61, %v1834_v53 }
 0x24c   : > { %2509 = vst [vmem:[%s4227_s21 + $0x40] sm:$0xff] %v2465_v11   ;;  %v2947_v56 = vpop.f32.mrb[132].mxu1  ;;  %v3027_v23 = vpop.f32.mrb[132].mxu0 }
 0x24d   : > { %v1910_v27 = vadd.f32 %v1909_v25, %v1839_v50  ;;  %v1979_v32 = vadd.f32 %v1978_v26, %v1948_v24  ;;  %v1855_v22 = vadd.f32 %v3027_v23, %v1694_v33  ;;  %v2948_v47 = vpop.f32.mrb[133].mxu1  ;;  %v1846_v21 = vpop.f32.mrb[133].mxu0 }
 0x24e   : > { %v2949_v4 = vadd.f32 %v2948_v47, %v2947_v56  ;;  %v1847_v48 = vadd.f32 %v1846_v21, %v4255_v41  ;;  %v2950_v3 = vpop.f32.mrb[134].mxu1  ;;  %v3028_v9 = vpop.f32.mrb[134].mxu0 }
 0x24f   : > { %v1980_v62 = vadd.f32 %v1979_v32, %v1949_v57  ;;  %v1911_v15 = vadd.f32 %v1910_v27, %v1842_v13  ;;  %v1858_v1 = vadd.f32 %v3028_v9, %v1697_v63  ;;  %v2951_v29 = vpop.f32.mrb[135].mxu1  ;;  %v1849_v42 = vpop.f32.mrb[135].mxu0  ;;  %v1953_v50 = vmul.f32 %v1855_v22, %v1855_v22 }
 0x250   : > { %v1951_v14 = vmul.f32 %v1847_v48, %v1847_v48  ;;  %v2952_v12 = vadd.f32 %v2951_v29, %v2950_v3  ;;  %v1850_v31 = vadd.f32 %v1849_v42, %v4258_v36  ;;  %v1710_v33 = vadd.f32 %v2949_v4, %v4181_v58 }
 0x251   : > { %v1912_v30 = vadd.f32 %v1911_v15, %v1847_v48  ;;  %v1981_v0 = vadd.f32 %v1980_v62, %v1950_v60  ;;  %v2480_v45 = vpack.c.bf16 %v1858_v1, %v1855_v22  ;;  %v1954_v38 = vmul.f32 %v1858_v1, %v1858_v1 }
 0x252   : > { %v1952_v41 = vmul.f32 %v1850_v31, %v1850_v31  ;;  %v2475_v17 = vpack.c.bf16 %v1850_v31, %v1847_v48  ;;  %v1713_v54 = vadd.f32 %v2952_v12, %v4187_v20 }
 0x253   : > { %v1982_v6 = vadd.f32 %v1981_v0, %v1951_v14  ;;  %2512 = vst [vmem:[%s4227_s21 + $0x58] sm:$0xff] %v2480_v45   ;;  %v1913_v34 = vadd.f32 %v1912_v30, %v1850_v31 }
 0x254   : > { %2511 = vst [vmem:[%s4227_s21 + $0x50] sm:$0xff] %v2475_v17   ;;  %v2953_v63 = vpop.f32.mrb[136].mxu1  ;;  %v3031_v37 = vpop.f32.mrb[136].mxu0 }
 0x255   : > { %v1914_v49 = vadd.f32 %v1913_v34, %v1855_v22  ;;  %v1983_v10 = vadd.f32 %v1982_v6, %v1952_v41  ;;  %v1871_v19 = vadd.f32 %v3031_v37, %v1710_v33  ;;  %v2954_v36 = vpop.f32.mrb[137].mxu1  ;;  %v1862_v39 = vpop.f32.mrb[137].mxu0 }
 0x256   : > { %v2955_v58 = vadd.f32 %v2954_v36, %v2953_v63  ;;  %v1863_v8 = vadd.f32 %v1862_v39, %v1702_v7  ;;  %v2956_v43 = vpop.f32.mrb[138].mxu1  ;;  %v3032_v59 = vpop.f32.mrb[138].mxu0 }
 0x257   : > { %v1984_v55 = vadd.f32 %v1983_v10, %v1953_v50  ;;  %v1915_v20 = vadd.f32 %v1914_v49, %v1858_v1  ;;  %v1874_v13 = vadd.f32 %v3032_v59, %v1713_v54  ;;  %v2957_v44 = vpop.f32.mrb[139].mxu1  ;;  %v1865_v40 = vpop.f32.mrb[139].mxu0  ;;  %v1957_v27 = vmul.f32 %v1871_v19, %v1871_v19 }
 0x258   : > { %v1955_v52 = vmul.f32 %v1863_v8, %v1863_v8  ;;  %v2958_v51 = vadd.f32 %v2957_v44, %v2956_v43  ;;  %v1866_v53 = vadd.f32 %v1865_v40, %v1705_v35  ;;  %v1718_v61 = vadd.f32 %v2955_v58, %v4193_v16 }
 0x259   : > { %v1916_v28 = vadd.f32 %v1915_v20, %v1863_v8  ;;  %v1985_v2 = vadd.f32 %v1984_v55, %v1954_v38  ;;  %v2490_v24 = vpack.c.bf16 %v1874_v13, %v1871_v19  ;;  %v1958_v3 = vmul.f32 %v1874_v13, %v1874_v13 }
 0x25a   : > { %v1956_v11 = vmul.f32 %v1866_v53, %v1866_v53  ;;  %v2485_v7 = vpack.c.bf16 %v1866_v53, %v1863_v8  ;;  %v1721_v26 = vadd.f32 %v2958_v51, %v4199_v5 }
 0x25b   : > { %v1986_v25 = vadd.f32 %v1985_v2, %v1955_v52  ;;  %2514 = vst [vmem:[%s4227_s21 + $0x68] sm:$0xff] %v2490_v24   ;;  %v1917_v56 = vadd.f32 %v1916_v28, %v1866_v53 }
 0x25c   : > { %2513 = vst [vmem:[%s4227_s21 + $0x60] sm:$0xff] %v2485_v7   ;;  %v2959_v23 = vpop.f32.mrb[140].mxu1  ;;  %v3035_v57 = vpop.f32.mrb[140].mxu0 }
 0x25d   : > { %v1918_v32 = vadd.f32 %v1917_v56, %v1871_v19  ;;  %v1987_v22 = vadd.f32 %v1986_v25, %v1956_v11  ;;  %v2960_v47 = vpop.f32.mrb[141].mxu1  ;;  %v1878_v35 = vpop.f32.mrb[141].mxu0 }
 0x25e   : > { %v2961_v21 = vadd.f32 %v2960_v47, %v2959_v23  ;;  %v1879_v16 = vadd.f32 %v1878_v35, %v1718_v61  ;;  %v2962_v4 = vpop.f32.mrb[142].mxu1  ;;  %v3036_v48 = vpop.f32.mrb[142].mxu0 }
 0x25f   : > { %v1988_v9 = vadd.f32 %v1987_v22, %v1957_v27  ;;  %v1919_v60 = vadd.f32 %v1918_v32, %v1874_v13  ;;  %v2963_v62 = vpop.f32.mrb[143].mxu1  ;;  %v1881_v5 = vpop.f32.mrb[143].mxu0 }
 0x260   : > { %v1726_v15 = vadd.f32 %v2961_v21, %v4206_v18  ;;  %v1959_v1 = vmul.f32 %v1879_v16, %v1879_v16  ;;  %v2964_v29 = vadd.f32 %v2963_v62, %v2962_v4  ;;  %v1882_v42 = vadd.f32 %v1881_v5, %v1721_v26 }
 0x261   : > { %v1920_v14 = vadd.f32 %v1919_v60, %v1879_v16  ;;  %v1989_v12 = vadd.f32 %v1988_v9, %v1958_v3 }
 0x262   : > { %v1887_v31 = vadd.f32 %v3035_v57, %v1726_v15  ;;  %v1729_v33 = vadd.f32 %v2964_v29, %v4215_v46  ;;  %v1960_v30 = vmul.f32 %v1882_v42, %v1882_v42  ;;  %v2495_v0 = vpack.c.bf16 %v1882_v42, %v1879_v16 }
 0x263   : > { %v1990_v45 = vadd.f32 %v1989_v12, %v1959_v1  ;;  %v1921_v41 = vadd.f32 %v1920_v14, %v1882_v42 }
 0x264   : > { %v1961_v17 = vmul.f32 %v1887_v31, %v1887_v31  ;;  %v1890_v54 = vadd.f32 %v3036_v48, %v1729_v33  ;;  %2515 = vst [vmem:[%s4227_s21 + $0x70] sm:$0xff] %v2495_v0  }
 0x265   : > { %v1922_v6 = vadd.f32 %v1921_v41, %v1887_v31  ;;  %v1991_v34 = vadd.f32 %v1990_v45, %v1960_v30 }
 0x266   : > { %v1962_v18 = vmul.f32 %v1890_v54, %v1890_v54  ;;  %v2500_v63 = vpack.c.bf16 %v1890_v54, %v1887_v31 }
 0x267   : > { %v1923_v37 = vadd.f32 %v1922_v6, %v1890_v54  ;;  %v1992_v50 = vadd.f32 %v1991_v34, %v1961_v17 }
 0x268   : > { %2516 = vst [vmem:[%s4227_s21 + $0x78] sm:$0xff] %v2500_v63  }
 0x269   : > { %v1924_v49 = vrot.slane %v1923_v37, 4  ;;  %v1993_v10 = vadd.f32 %v1992_v50, %v1962_v18 }
 0x26b   : > { %v1925_v19 = vadd.f32 %v1924_v49, %v1923_v37  ;;  %v1994_v36 = vrot.slane %v1993_v10, 4 }
 0x26d   : > { %v1926_v46 = vrot.slane %v1925_v19, 2  ;;  %v1995_v39 = vadd.f32 %v1994_v36, %v1993_v10 }
 0x26f   : > { %v1927_v58 = vadd.f32 %v1926_v46, %v1925_v19  ;;  %v1996_v8 = vrot.slane %v1995_v39, 2 }
 0x271   : > { %v1928_v43 = vrot.slane %v1927_v58, 1  ;;  %v1997_v59 = vadd.f32 %v1996_v8, %v1995_v39 }
 0x273   : > { %v1929_v38 = vadd.f32 %v1928_v43, %v1927_v58  ;;  %v1998_v55 = vrot.slane %v1997_v59, 1 }
 0x275   : > { %1930 = vst [vmem:[%s216_s28] sm:$0x1] %v1929_v38  ;;  %v1999_v20 = vadd.f32 %v1998_v55, %v1997_v59 }
 0x277   : > { %2000 = vst [vmem:[%s216_s28 + $0x1] sm:$0x1] %v1999_v20 }
 0x278 PF: > { %p15_p8 = scmp.ge.s32.totalorder %s3347_s22, 4   ;;  %s4328_s12 = smov %s3267_s13 }
 0x279   : > { %s4329_s13 = smov %s3271_s14  ;;  %s4330_s14 = smov %s3373_s10 }
 0x27a   : > { %s4331_s15 = smov %s3347_s22  ;;  %17 = sbr.rel (!%p15_p8) target bundleno = 4 (0x4), region = 84 }
 0x281   :  { %2196 = vsyncpa [#allocation3], 1 }
 0x282   :  { %2198 = vsyncpa [#allocation3 + $0x1], 1 }
 0x283   :  { %2199 = vsyncpa [#allocation5], 1 }

// kernel: _lambda_.4
= control target key start
LH: loop header
LB: loop body
LE: loop exit
PB: predicated region body
PF: predicated region fallthrough
CT: control target
= control target key end

     0   :  { %s3356_s18 = smov 0   ;;  %s4530_s0 = inlined_call_operand.vmem [shape: bf16[2,16,16,128], index: 0, kind: input, shape index: {}]   ;;  %s4531_s1 = inlined_call_operand.vmem [shape: f32[1,128], index: 1, kind: input, shape index: {}]   ;;  %s4532_s2 = inlined_call_operand.vmem [shape: f32[1,128], index: 2, kind: input, shape index: {}]   ;;  %s4533_s3 = inlined_call_operand.vmem [shape: bf16[1152,128], index: 3, kind: input, shape index: {}]   ;;  %s4534_s4 = inlined_call_operand.vmem [shape: bf16[2,16,16,128], index: 4, kind: output, shape index: {0}]   ;;  %s4535_s5 = inlined_call_operand.vmem [shape: f32[2,2,128], index: 5, kind: output, shape index: {1}]  }
   0x1 LB: > { %s2376_s19 = sadd.s32 4294967295, %s3324_s18   ;;  %p2380_p0 = scmp.ge.s32.totalorder %s3324_s18, 1  ;;  %s3324_s18 = sphi %s3356_s18, %s16_s18  }
   0x2   : > { %p190_p1 = scmp.lt.s32.totalorder %s3324_s18, 3 }
   0x4   : > { %p191_p2 = pnand %p2380_p0, %p190_p1 }
   0x5   : > { %v3246_v0 = vld [vmem:[%s4533_s3 + $0x40] sm:$0xff] (!%p191_p2)   ;;  %v3248_v2 = vld [vmem:[%s4533_s3 + $0x48] sm:$0xff] (!%p191_p2)   ;;  %p222_p3 = scmp.lt.s32.totalorder (!%p191_p2), %s2376_s19, 1  ;;  %v3250_v4 = vld [vmem:[%s4533_s3 + $0x50] sm:$0xff] (!%p191_p2)   ;;  %vm540_vm0 = vsmask.f32 (!%p191_p2), 256 }
   0x6   : > { %194 = sbr.rel (%p191_p2) target bundleno = 557 (0x22d), region = 36  ;;  %v3247_v1 = vld [vmem:[%s4533_s3] sm:$0xff] (!%p191_p2)   ;;  %2702 = vmatprep.subr.bf16.mxu0 (!%p191_p2), %v3246_v0  ;;  %3222 = vmatprep.subr.bf16.mxu1 (!%p191_p2), %v3246_v0  ;;  %v3249_v3 = vld [vmem:[%s4533_s3 + $0x8] sm:$0xff] (!%p191_p2)   ;;  %v3251_v5 = vld [vmem:[%s4533_s3 + $0x10] sm:$0xff] (!%p191_p2)   ;;  %vm539_vm1 = vcmask (!%p191_p2), 1040384   ;;  %vm622_vm4 = vcmask (!%p191_p2), 1047552  }
   0x7   : > { %2703 = vmatpush3.bf16.msra.mxu0 (!%p191_p2), %v3247_v1  ;;  %3230 = vmatpush3.bf16.msra.mxu1 (!%p191_p2), %v3247_v1  ;;  %v3252_v6 = vld [vmem:[%s4533_s3 + $0x58] sm:$0xff] (!%p191_p2)   ;;  %v3254_v8 = vld [vmem:[%s4533_s3 + $0x60] sm:$0xff] (!%p191_p2)   ;;  %v3256_v10 = vld [vmem:[%s4533_s3 + $0x68] sm:$0xff] (!%p191_p2)   ;;  %vm623_vm3 = vsmask.f32 (!%p191_p2), 7424 }
   0x8   : > { %2704 = vmatprep.subr.bf16.mxu0 (!%p191_p2), %v3248_v2  ;;  %3223 = vmatprep.subr.bf16.mxu1 (!%p191_p2), %v3248_v2  ;;  %v3253_v7 = vld [vmem:[%s4533_s3 + $0x18] sm:$0xff] (!%p191_p2)   ;;  %v3255_v9 = vld [vmem:[%s4533_s3 + $0x20] sm:$0xff] (!%p191_p2)   ;;  %v3257_v19 = vld [vmem:[%s4533_s3 + $0x28] sm:$0xff] (!%p191_p2)  }
   0x9   : > { %v3411_v12 = vld [vmem:[%s4531_s1] ss:$0 sm:$0xff] (!%p191_p2)  ;;  %v3258_v22 = vld [vmem:[%s4533_s3 + $0x70] sm:$0xff] (!%p191_p2)   ;;  %v3260_v30 = vld [vmem:[%s4533_s3 + $0x78] sm:$0xff] (!%p191_p2)  }
   0xa   : > { %v3417_v16 = vld [vmem:[%s4532_s2] ss:$0 sm:$0xff] (!%p191_p2)  ;;  %v3259_v27 = vld [vmem:[%s4533_s3 + $0x30] sm:$0xff] (!%p191_p2)   ;;  %v3261_v37 = vld [vmem:[%s4533_s3 + $0x38] sm:$0xff] (!%p191_p2)  }
   0xb   : > { %2705 = vmatpush3.bf16.msra.mxu0 (!%p191_p2), %v3249_v3  ;;  %3231 = vmatpush3.bf16.msra.mxu1 (!%p191_p2), %v3249_v3  ;;  %v3262_v44 = vld [vmem:[%s4533_s3 + $0xc0] sm:$0xff] (!%p191_p2)   ;;  %vm3468_vm2 = vmand (!%p191_p2), %vm539_vm1, %vm540_vm0  ;;  %v3266_v1 = vld [vmem:[%s4533_s3 + $0xc8] sm:$0xff] (!%p191_p2)  }
   0xc   : > { %2706 = vmatprep.subr.bf16.mxu0 (!%p191_p2), %v3250_v4  ;;  %3224 = vmatprep.subr.bf16.mxu1 (!%p191_p2), %v3250_v4  ;;  %v3263_v52 = vld [vmem:[%s4533_s3 + $0x140] sm:$0xff] (!%p191_p2)   ;;  %vm3571_vm5 = vmand (!%p191_p2), %vm622_vm4, %vm623_vm3 }
   0xd   : > { %s4541_s19 = smov (!%p222_p3, %s2376_s19), 1  ;;  %v3264_v56 = vld [vmem:[%s4533_s3 + $0x80] sm:$0xff]  }
   0xe   : > { %s2494_s9 = sshll.u32 %s4541_s19, 7  ;;  %v3265_v60 = vld [vmem:[%s4533_s3 + $0x100] sm:$0xff]  }
   0xf   : > { %2707 = vmatpush3.bf16.msra.mxu0 %v3251_v5  ;;  %3232 = vmatpush3.bf16.msra.mxu1 %v3251_v5  ;;  %s3399_s16 = scalar_lea.vmem %s4530_s0, %s2494_s9  ;;  %s4458_s23 = scalar_lea.vmem %s4534_s4, %s2494_s9 }
  0x10   : > { %2708 = vmatprep.subr.bf16.mxu0 %v3252_v6  ;;  %3225 = vmatprep.subr.bf16.mxu1 %v3252_v6  ;;  %v2672_v11 = vld [vmem:[%s3399_s16 + $0x8] sm:$0xff]   ;;  %v2682_v15 = vld [vmem:[%s3399_s16 + $0x58] sm:$0xff]   ;;  %v2529_v32 = vld [vmem:[%s3399_s16] sm:$0xff]   ;;  %s2385_s9 = sshll.u32 %s4541_s19, 1 }
  0x11   : > { %v2534_v13 = vunpack.c.l.bf16 %v2672_v11  ;;  %v2535_v14 = vunpack.c.h.bf16 %v2672_v11  ;;  %v2574_v17 = vunpack.c.l.bf16 %v2682_v15  ;;  %v2575_v18 = vunpack.c.h.bf16 %v2682_v15  ;;  %v2683_v36 = vld [vmem:[%s3399_s16 + $0x60] sm:$0xff]   ;;  %v2684_v62 = vld [vmem:[%s3399_s16 + $0x68] sm:$0xff]   ;;  %s235_s26 = scalar_lea.vmem %s4535_s5, %s2385_s9 }
  0x12   : > { %v2530_v34 = vunpack.c.l.bf16 %v2529_v32  ;;  %v2531_v35 = vunpack.c.h.bf16 %v2529_v32  ;;  %v2578_v40 = vunpack.c.l.bf16 %v2683_v36  ;;  %v2579_v41 = vunpack.c.h.bf16 %v2683_v36  ;;  %v3271_v11 = vld [vmem:[%s4533_s3 + $0x148] sm:$0xff]   ;;  %v3269_v36 = vld [vmem:[%s4533_s3 + $0x90] sm:$0xff]  }
  0x13   : > { %2709 = vmatpush3.bf16.msra.mxu0 %v3253_v7  ;;  %3233 = vmatpush3.bf16.msra.mxu1 %v3253_v7  ;;  %v310_v20 = vmul.f32 %v2534_v13, %v3411_v12  ;;  %v311_v21 = vmul.f32 %v2535_v14, %v3411_v12  ;;  %v330_v23 = vmul.f32 %v2574_v17, %v3411_v12  ;;  %v2582_v3 = vunpack.c.l.bf16 %v2684_v62  ;;  %v3273_v17 = vld [vmem:[%s4533_s3 + $0x108] sm:$0xff]  }
  0x14   : > { %2710 = vmatprep.subr.bf16.mxu0 %v3254_v8  ;;  %3226 = vmatprep.subr.bf16.mxu1 %v3254_v8  ;;  %v331_v24 = vmul.f32 %v2575_v18, %v3411_v12  ;;  %v308_v45 = vmul.f32 %v2530_v34, %v3411_v12  ;;  %v309_v46 = vmul.f32 %v2531_v35, %v3411_v12  ;;  %v2583_v4 = vunpack.c.h.bf16 %v2684_v62  ;;  %v3267_v8 = vld [vmem:[%s4533_s3 + $0x88] sm:$0xff]   ;;  %v3279_v34 = vld [vmem:[%s4533_s3 + $0x150] sm:$0xff]   ;;  %v3272_v62 = vld [vmem:[%s4533_s3 + $0x98] sm:$0xff]  }
  0x15   : > { %v349_v25 = vadd.f32 %v3417_v16, %v310_v20  ;;  %v350_v26 = vadd.f32 %v3417_v16, %v311_v21  ;;  %v369_v28 = vadd.f32 %v3417_v16, %v330_v23  ;;  %v332_v49 = vmul.f32 %v2578_v40, %v3411_v12  ;;  %v2685_v23 = vld [vmem:[%s3399_s16 + $0x70] sm:$0xff]  }
  0x16   : > { %v370_v29 = vadd.f32 %v3417_v16, %v331_v24  ;;  %v333_v50 = vmul.f32 %v2579_v41, %v3411_v12  ;;  %v347_v53 = vadd.f32 %v3417_v16, %v308_v45  ;;  %v348_v54 = vadd.f32 %v3417_v16, %v309_v46 }
  0x17   : > { %2711 = vmatpush3.bf16.msra.mxu0 %v3255_v9  ;;  %3234 = vmatpush3.bf16.msra.mxu1 %v3255_v9  ;;  %v3439_v31 = vpack.c.bf16 %v350_v26, %v349_v25  ;;  %v371_v57 = vadd.f32 %v3417_v16, %v332_v49  ;;  %v334_v13 = vmul.f32 %v2582_v3, %v3411_v12  ;;  %v3268_v25 = vld [vmem:[%s4533_s3 + $0xd0] sm:$0xff]   ;;  %v2587_v32 = vunpack.c.h.bf16 %v2685_v23  ;;  %v3270_v49 = vld [vmem:[%s4533_s3 + $0xd8] sm:$0xff]  }
  0x18   : > { %2712 = vmatprep.subr.bf16.mxu0 %v3256_v10  ;;  %3227 = vmatprep.subr.bf16.mxu1 %v3256_v10  ;;  %v3442_v33 = vpack.c.bf16 %v370_v29, %v369_v28  ;;  %v372_v58 = vadd.f32 %v3417_v16, %v333_v50  ;;  %v3489_v61 = vpack.c.bf16 %v348_v54, %v347_v53  ;;  %v2586_v28 = vunpack.c.l.bf16 %v2685_v23 }
  0x19   : > { %1249 = vmatprep.mubr.bf16.mxu0 %v3439_v31  ;;  %v3450_v38 = vshrl.u32 %v3439_v31, 16  ;;  %v3453_v39 = vshll.u32 %v3439_v31, 16  ;;  %v335_v14 = vmul.f32 %v2583_v4, %v3411_v12  ;;  %v373_v20 = vadd.f32 %v3417_v16, %v334_v13  ;;  %v3274_v4 = vld [vmem:[%s4533_s3 + $0xe0] sm:$0xff]  }
  0x1a   : > { %1345 = vmatprep.mubr.bf16.mxu1 %v3442_v33  ;;  %v429_v42 = vshrl.u32 %v3442_v33, 16  ;;  %v3458_v43 = vshll.u32 %v3442_v33, 16  ;;  %v3501_v2 = vpack.c.bf16 %v372_v58, %v371_v57  ;;  %v3508_v6 = vshrl.u32 %v3489_v61, 16 }
  0x1b   : > { %2713 = vmatpush3.bf16.msra.mxu0 %v3257_v19  ;;  %3235 = vmatpush3.bf16.msra.mxu1 %v3257_v19  ;;  %v459_v47 = vrot.slane %v3450_v38, 7  ;;  %v3511_v7 = vshll.u32 %v3489_v61, 16  ;;  %v374_v21 = vadd.f32 %v3417_v16, %v335_v14  ;;  %v336_v41 = vmul.f32 %v2586_v28, %v3411_v12  ;;  %v3275_v14 = vld [vmem:[%s4533_s3 + $0xa0] sm:$0xff]  }
  0x1c   : > { %2714 = vmatprep.subr.bf16.mxu0 %v3258_v22  ;;  %3228 = vmatprep.subr.bf16.mxu1 %v3258_v22  ;;  %v503_v51 = vrot.slane %v429_v42, 7  ;;  %v580_v63 = vrot.slane %v3458_v43, 1  ;;  %v432_v9 = vshrl.u32 %v3501_v2, 16  ;;  %v3518_v10 = vshll.u32 %v3501_v2, 16  ;;  %v2673_v22 = vld [vmem:[%s3399_s16 + $0x10] sm:$0xff]  }
  0x1d   : > { %v462_v55 = vor.u32 %v3453_v39, %v459_v47  ;;  %v463_v15 = vrot.slane %v3508_v6, 7  ;;  %v2538_v26 = vunpack.c.l.bf16 %v2673_v22  ;;  %v337_v46 = vmul.f32 %v2587_v32, %v3411_v12 }
  0x1e   : > { %v506_v59 = vor.u32 %v3458_v43, %v503_v51  ;;  %v581_v18 = vor.u32 %v580_v63, %v429_v42  ;;  %v507_v19 = vrot.slane %v432_v9, 7  ;;  %v582_v53 = vrot.slane %v3518_v10, 1 }
  0x1f   : > { %2715 = vmatpush3.bf16.msra.mxu0 %v3259_v27  ;;  %3236 = vmatpush3.bf16.msra.mxu1 %v3259_v27  ;;  %v3496_v0 = vsel %vm3468_vm2, %v3450_v38, %v462_v55  ;;  %v466_v24 = vor.u32 %v3511_v7, %v463_v15  ;;  %v2539_v27 = vunpack.c.h.bf16 %v2673_v22  ;;  %v376_v55 = vadd.f32 %v3417_v16, %v337_v46 }
  0x20   : > { %2716 = vmatprep.subr.bf16.mxu0 %v3260_v30  ;;  %3229 = vmatprep.subr.bf16.mxu1 %v3260_v30  ;;  %v3505_v5 = vsel %vm3468_vm2, %v429_v42, %v506_v59  ;;  %v510_v29 = vor.u32 %v3518_v10, %v507_v19  ;;  %v3542_v30 = vpack.c.bf16 %v374_v21, %v373_v20  ;;  %v2674_v59 = vld [vmem:[%s3399_s16 + $0x18] sm:$0xff]  }
  0x21   : > { %v3550_v35 = vsel %vm3468_vm2, %v3508_v6, %v466_v24  ;;  %v313_v40 = vmul.f32 %v2539_v27, %v3411_v12  ;;  %v3590_v57 = vsel %vm3571_vm5, %v581_v18, %v3458_v43  ;;  %v2542_v43 = vunpack.c.l.bf16 %v2674_v59  ;;  %v2675_v24 = vld [vmem:[%s3399_s16 + $0x20] sm:$0xff]  }
  0x22   : > { %v3560_v42 = vsel %vm3468_vm2, %v432_v9, %v510_v29  ;;  %v3566_v45 = vshll.u32 %v3542_v30, 16  ;;  %v2543_v3 = vunpack.c.h.bf16 %v2674_v59  ;;  %v2546_v28 = vunpack.c.l.bf16 %v2675_v24 }
  0x23   : > { %2717 = vmatpush3.bf16.msra.mxu0 %v3261_v37  ;;  %3237 = vmatpush3.bf16.msra.mxu1 %v3261_v37  ;;  %v312_v37 = vmul.f32 %v2538_v26, %v3411_v12  ;;  %v352_v51 = vadd.f32 %v3417_v16, %v313_v40  ;;  %v314_v18 = vmul.f32 %v2542_v43, %v3411_v12  ;;  %v3276_v26 = vld [vmem:[%s4533_s3 + $0xe8] sm:$0xff]   ;;  %v2547_v29 = vunpack.c.h.bf16 %v2675_v24 }
  0x24   : > { %2814 = vmatprep.subr.bf16.mxu1 %v3262_v44  ;;  %2926 = vmatprep.subr.bf16.mxu0 %v3263_v52  ;;  %v3563_v44 = vshrl.u32 %v3542_v30, 16  ;;  %v375_v52 = vadd.f32 %v3417_v16, %v336_v41  ;;  %v315_v20 = vmul.f32 %v2543_v3, %v3411_v12  ;;  %v316_v40 = vmul.f32 %v2546_v28, %v3411_v12  ;;  %v3283_v28 = vld [vmem:[%s4533_s3 + $0xb8] sm:$0xff]  }
  0x25   : > { %v351_v50 = vadd.f32 %v3417_v16, %v312_v37  ;;  %v353_v23 = vadd.f32 %v3417_v16, %v314_v18 }
  0x26   : > { %1250 = vmatmul.mubr.bf16.vlgmr.msra.gmra.mrb[0].mxu0 %v3496_v0  ;;  %1346 = vmatmul.mubr.bf16.vlgmr.msra.gmra.mrb[0].mxu1 %v3505_v5  ;;  %v511_v54 = vrot.slane %v3563_v44, 7  ;;  %v354_v27 = vadd.f32 %v3417_v16, %v315_v20 }
  0x27   : > { %2815 = vmatpush3.bf16.msra.mxu1 %v3264_v56  ;;  %2927 = vmatpush3.bf16.msra.mxu0 %v3265_v60  ;;  %v3281_v56 = vld [vmem:[%s4533_s3 + $0x110] sm:$0xff]   ;;  %v3594_v58 = vpack.c.bf16 %v352_v51, %v351_v50  ;;  %v583_v60 = vor.u32 %v582_v53, %v432_v9  ;;  %v3277_v50 = vld [vmem:[%s4533_s3 + $0xa8] sm:$0xff]   ;;  %v558_v51 = vrot.slane %v3453_v39, 1 }
  0x28   : > { %2816 = vmatprep.subr.bf16.mxu1 %v3266_v1  ;;  %1257 = vmatprep.mubr.bf16.mxu0 %v3489_v61  ;;  %v514_v63 = vor.u32 %v3566_v45, %v511_v54  ;;  %v3602_v1 = vpack.c.bf16 %v376_v55, %v375_v52  ;;  %v3657_v37 = vpack.c.bf16 %v354_v27, %v353_v23  ;;  %v3278_v53 = vld [vmem:[%s4533_s3 + $0xf0] sm:$0xff]   ;;  %v3293_v23 = vld [vmem:[%s4533_s3 + $0x128] sm:$0xff]   ;;  %v2679_v27 = vld [vmem:[%s3399_s16 + $0x40] sm:$0xff]  }
  0x29   : > { %1353 = vmatprep.mubr.bf16.mxu1 %v3501_v2  ;;  %2928 = vmatprep.subr.bf16.mxu0 %v3271_v11  ;;  %v3612_v9 = vshll.u32 %v3594_v58, 16  ;;  %v3286_v11 = vld [vmem:[%s4533_s3 + $0x158] sm:$0xff]   ;;  %v3620_v13 = vsel %vm3571_vm5, %v583_v60, %v3518_v10  ;;  %v317_v52 = vmul.f32 %v2547_v29, %v3411_v12  ;;  %v355_v55 = vadd.f32 %v3417_v16, %v316_v40  ;;  %v3292_v60 = vld [vmem:[%s4533_s3 + $0x168] sm:$0xff]   ;;  %v3284_v40 = vld [vmem:[%s4533_s3 + $0x1c0] sm:$0xff]  }
  0x2a   : > { %v3626_v15 = vshrl.u32 %v3602_v1, 16  ;;  %v3287_v10 = vld [vmem:[%s4533_s3 + $0x118] sm:$0xff]   ;;  %v3640_v21 = vsel %vm3468_vm2, %v3563_v44, %v514_v63  ;;  %v3674_v54 = vshrl.u32 %v3657_v37, 16  ;;  %v3700_v18 = vshll.u32 %v3657_v37, 16 }
  0x2b   : > { %2817 = vmatpush3.bf16.msra.mxu1 %v3267_v8  ;;  %2929 = vmatpush3.bf16.msra.mxu0 %v3273_v17  ;;  %v3609_v8 = vshrl.u32 %v3594_v58, 16  ;;  %v3629_v17 = vshll.u32 %v3602_v1, 16  ;;  %v356_v59 = vadd.f32 %v3417_v16, %v317_v52  ;;  %v2563_v52 = vunpack.c.h.bf16 %v2679_v27 }
  0x2c   : > { %2818 = vmatprep.subr.bf16.mxu1 %v3268_v25  ;;  %2930 = vmatprep.subr.bf16.mxu0 %v3279_v34  ;;  %v515_v22 = vrot.slane %v3626_v15, 7  ;;  %v2676_v25 = vld [vmem:[%s3399_s16 + $0x28] sm:$0xff]  }
  0x2d   : > { %v467_v19 = vrot.slane %v3609_v8, 7  ;;  %v2550_v41 = vunpack.c.l.bf16 %v2676_v25  ;;  %v2551_v46 = vunpack.c.h.bf16 %v2676_v25 }
  0x2e   : > { %1258 = vmatmul.mubr.bf16.gmra.mrb[4].mxu0 %v3550_v35  ;;  %1354 = vmatmul.mubr.bf16.gmra.mrb[4].mxu1 %v3560_v42  ;;  %v518_v34 = vor.u32 %v3629_v17, %v515_v22  ;;  %v559_v22 = vor.u32 %v558_v51, %v3450_v38  ;;  %v2562_v51 = vunpack.c.l.bf16 %v2679_v27 }
  0x2f   : > { %2819 = vmatpush3.bf16.msra.mxu1 %v3269_v36  ;;  %1265 = vmatprep.mubr.bf16.mxu0 %v3439_v31  ;;  %v470_v32 = vor.u32 %v3612_v9, %v467_v19  ;;  %v3288_v36 = vld [vmem:[%s4533_s3 + $0x160] sm:$0xff]   ;;  %v318_v43 = vmul.f32 %v2550_v41, %v3411_v12  ;;  %v319_v3 = vmul.f32 %v2551_v46, %v3411_v12 }
  0x30   : > { %2820 = vmatprep.subr.bf16.mxu1 %v3270_v49  ;;  %1361 = vmatprep.mubr.bf16.mxu1 %v3542_v30  ;;  %v3290_v49 = vld [vmem:[%s4533_s3 + $0x120] sm:$0xff]   ;;  %v3692_v63 = vsel %vm3468_vm2, %v3626_v15, %v518_v34  ;;  %v3702_v19 = vpack.c.bf16 %v356_v59, %v355_v55  ;;  %v3296_v34 = vld [vmem:[%s4533_s3 + $0x170] sm:$0xff]   ;;  %v560_v55 = vrot.slane %v3511_v7, 1 }
  0x31   : > { %2931 = vmatpush3.bf16.msra.mxu0 %v3281_v56  ;;  %v3280_v56 = vld [vmem:[%s4533_s3 + $0xb0] sm:$0xff]   ;;  %v357_v29 = vadd.f32 %v3417_v16, %v318_v43  ;;  %v358_v38 = vadd.f32 %v3417_v16, %v319_v3 }
  0x32   : > { %2932 = vmatprep.subr.bf16.mxu0 %v3286_v11  ;;  %v2678_v11 = vld [vmem:[%s3399_s16 + $0x38] sm:$0xff]   ;;  %v3729_v41 = vshrl.u32 %v3702_v19, 16  ;;  %v3751_v43 = vshll.u32 %v3702_v19, 16  ;;  %v561_v27 = vor.u32 %v560_v55, %v3508_v6 }
  0x33   : > { %2821 = vmatpush3.bf16.msra.mxu1 %v3272_v62  ;;  %v3687_v62 = vsel %vm3468_vm2, %v3609_v8, %v470_v32  ;;  %v2558_v20 = vunpack.c.l.bf16 %v2678_v11  ;;  %v2559_v24 = vunpack.c.h.bf16 %v2678_v11  ;;  %v3753_v3 = vpack.c.bf16 %v358_v38, %v357_v29  ;;  %v3300_v38 = vld [vmem:[%s4533_s3 + $0x178] sm:$0xff]  }
  0x34   : > { %2822 = vmatprep.subr.bf16.mxu1 %v3274_v4  ;;  %v2677_v4 = vld [vmem:[%s3399_s16 + $0x30] sm:$0xff]   ;;  %v325_v11 = vmul.f32 %v2563_v52, %v3411_v12 }
  0x35   : > { %2933 = vmatpush3.bf16.msra.mxu0 %v3287_v10  ;;  %v3282_v10 = vld [vmem:[%s4533_s3 + $0xf8] sm:$0xff]   ;;  %v2554_v25 = vunpack.c.l.bf16 %v2677_v4  ;;  %v322_v32 = vmul.f32 %v2558_v20, %v3411_v12  ;;  %v323_v46 = vmul.f32 %v2559_v24, %v3411_v12  ;;  %v475_v20 = vrot.slane %v3729_v41, 7 }
  0x36   : > { %1266 = vmatmul.mubr.bf16.gmra.mrb[8].mxu0 %v3496_v0  ;;  %1362 = vmatmul.mubr.bf16.gmra.mrb[8].mxu1 %v3640_v21 }
  0x37   : > { %2823 = vmatpush3.bf16.msra.mxu1 %v3275_v14  ;;  %1273 = vmatprep.mubr.bf16.mxu0 %v3594_v58  ;;  %v471_v14 = vrot.slane %v3674_v54, 7 }
  0x38   : > { %2824 = vmatprep.subr.bf16.mxu1 %v3276_v26  ;;  %1369 = vmatprep.mubr.bf16.mxu1 %v3602_v1  ;;  %v2555_v26 = vunpack.c.h.bf16 %v2677_v4  ;;  %v324_v4 = vmul.f32 %v2562_v51, %v3411_v12 }
  0x39   : > { %2934 = vmatprep.subr.bf16.mxu0 %v3288_v36  ;;  %v474_v36 = vor.u32 %v3700_v18, %v471_v14 }
  0x3a   : > { %2935 = vmatpush3.bf16.msra.mxu0 %v3290_v49  ;;  %v3736_v49 = vsel %vm3571_vm5, %v559_v22, %v3453_v39  ;;  %v321_v59 = vmul.f32 %v2555_v26, %v3411_v12  ;;  %v3285_v39 = vld [vmem:[%s4533_s3 + $0x180] sm:$0xff]   ;;  %v363_v24 = vadd.f32 %v3417_v16, %v324_v4  ;;  %v2681_v26 = vld [vmem:[%s3399_s16 + $0x50] sm:$0xff]   ;;  %v3810_v4 = vsel %vm3571_vm5, %v561_v27, %v3511_v7 }
  0x3b   : > { %2825 = vmatpush3.bf16.msra.mxu1 %v3277_v50  ;;  %2936 = vmatprep.subr.bf16.mxu0 %v3292_v60  ;;  %v361_v50 = vadd.f32 %v3417_v16, %v322_v32  ;;  %v362_v60 = vadd.f32 %v3417_v16, %v323_v46  ;;  %v3760_v14 = vsel %vm3468_vm2, %v3674_v54, %v474_v36  ;;  %v3779_v32 = vshrl.u32 %v3753_v3, 16 }
  0x3c   : > { %2826 = vmatprep.subr.bf16.mxu1 %v3278_v53  ;;  %v2680_v53 = vld [vmem:[%s3399_s16 + $0x48] sm:$0xff]   ;;  %v478_v46 = vor.u32 %v3751_v43, %v475_v20  ;;  %v2570_v52 = vunpack.c.l.bf16 %v2681_v26  ;;  %v3814_v20 = vshll.u32 %v3753_v3, 16  ;;  %v586_v27 = vrot.slane %v3629_v17, 1 }
  0x3d   : > { %v3766_v22 = vpack.c.bf16 %v362_v60, %v361_v50  ;;  %v2567_v29 = vunpack.c.h.bf16 %v2680_v53  ;;  %v3291_v50 = vld [vmem:[%s4533_s3 + $0x188] sm:$0xff]  }
  0x3e   : > { %1274 = vmatmul.mubr.bf16.gmra.mrb[12].mxu0 %v3687_v62  ;;  %1370 = vmatmul.mubr.bf16.gmra.mrb[12].mxu1 %v3692_v63 }
  0x3f   : > { %2827 = vmatpush3.bf16.msra.mxu1 %v3280_v56  ;;  %1281 = vmatprep.mubr.bf16.mxu0 %v3657_v37  ;;  %v320_v56 = vmul.f32 %v2554_v25, %v3411_v12  ;;  %v364_v25 = vadd.f32 %v3417_v16, %v325_v11  ;;  %v327_v51 = vmul.f32 %v2567_v29, %v3411_v12  ;;  %v479_v11 = vrot.slane %v3779_v32, 7 }
  0x40   : > { %2828 = vmatprep.subr.bf16.mxu1 %v3282_v10  ;;  %1410 = vmatprep.mubr.bf16.mxu1 %v3550_v35  ;;  %v3297_v35 = vld [vmem:[%s4533_s3 + $0x130] sm:$0xff]   ;;  %v3289_v10 = vld [vmem:[%s4533_s3 + $0x1c8] sm:$0xff]  }
  0x41   : > { %2937 = vmatpush3.bf16.msra.mxu0 %v3293_v23  ;;  %v2566_v23 = vunpack.c.l.bf16 %v2680_v53  ;;  %v3782_v36 = vpack.c.bf16 %v364_v25, %v363_v24  ;;  %v3294_v53 = vld [vmem:[%s4533_s3 + $0x1d0] sm:$0xff]   ;;  %v366_v60 = vadd.f32 %v3417_v16, %v327_v51  ;;  %v587_v51 = vor.u32 %v586_v27, %v3626_v15 }
  0x42   : > { %2938 = vmatprep.subr.bf16.mxu0 %v3296_v34  ;;  %v360_v34 = vadd.f32 %v3417_v16, %v321_v59  ;;  %v584_v59 = vrot.slane %v3566_v45, 1 }
  0x43   : > { %2829 = vmatpush3.bf16.msra.mxu1 %v3283_v28  ;;  %v359_v28 = vadd.f32 %v3417_v16, %v320_v56  ;;  %v326_v6 = vmul.f32 %v2566_v23, %v3411_v12  ;;  %v3802_v56 = vld [vmem:[%s4533_s3 + $0x200] sm:$0xff]   ;;  %v3821_v23 = vsel %vm3468_vm2, %v3729_v41, %v478_v46 }
  0x44   : > { %3038 = vmatprep.subr.bf16.mxu1 %v3284_v40  ;;  %v3301_v40 = vld [vmem:[%s4533_s3 + $0x138] sm:$0xff]  }
  0x45   : > { %2939 = vmatpush3.bf16.msra.mxu0 %v3297_v35  ;;  %v365_v55 = vadd.f32 %v3417_v16, %v326_v6  ;;  %v2571_v35 = vunpack.c.h.bf16 %v2681_v26  ;;  %v3295_v26 = vld [vmem:[%s4533_s3 + $0x190] sm:$0xff]  }
  0x46   : > { %1282 = vmatmul.mubr.bf16.gmra.mrb[16].mxu0 %v3760_v14  ;;  %1411 = vmatmul.mubr.bf16.vlgmr.msra.gmra.mrb[16].mxu1 %v3736_v49 }
  0x47   : > { %3039 = vmatpush3.bf16.msra.mxu1 %v3285_v39  ;;  %1289 = vmatprep.mubr.bf16.mxu0 %v3702_v19  ;;  %v328_v39 = vmul.f32 %v2570_v52, %v3411_v12  ;;  %v3823_v24 = vpack.c.bf16 %v366_v60, %v365_v55  ;;  %v329_v25 = vmul.f32 %v2571_v35, %v3411_v12  ;;  %v3302_v52 = vld [vmem:[%s4533_s3 + $0x1e0] sm:$0xff]  }
  0x48   : > { %1418 = vmatprep.mubr.bf16.mxu1 %v3496_v0  ;;  %3040 = vmatprep.subr.bf16.mxu1 %v3289_v10  ;;  %v3816_v10 = vpack.c.bf16 %v360_v34, %v359_v28  ;;  %v3298_v28 = vld [vmem:[%s4533_s3 + $0x1d8] sm:$0xff]   ;;  %v482_v34 = vor.u32 %v3814_v20, %v479_v11  ;;  %v3864_v60 = vsel %vm3571_vm5, %v587_v51, %v3629_v17  ;;  %v3915_v51 = vshll.u32 %v3766_v22, 16 }
  0x49   : > { %2940 = vmatprep.subr.bf16.mxu0 %v3300_v38  ;;  %v367_v7 = vadd.f32 %v3417_v16, %v328_v39  ;;  %v368_v29 = vadd.f32 %v3417_v16, %v329_v25  ;;  %v585_v38 = vor.u32 %v584_v59, %v3563_v44  ;;  %v3304_v39 = vld [vmem:[%s4533_s3 + $0x1a0] sm:$0xff]   ;;  %v3305_v25 = vld [vmem:[%s4533_s3 + $0x1e8] sm:$0xff]  }
  0x4a   : > { %2941 = vmatpush3.bf16.msra.mxu0 %v3301_v40  ;;  %v3843_v6 = vshrl.u32 %v3816_v10, 16  ;;  %v3299_v40 = vld [vmem:[%s4533_s3 + $0x198] sm:$0xff]   ;;  %v3873_v35 = vshll.u32 %v3816_v10, 16 }
  0x4b   : > { %3041 = vmatpush3.bf16.msra.mxu1 %v3291_v50  ;;  %3174 = vmatprep.subr.bf16.mxu0 %v3802_v56  ;;  %v3848_v46 = vpack.c.bf16 %v368_v29, %v367_v7  ;;  %v3853_v44 = vsel %vm3571_vm5, %v585_v38, %v3566_v45  ;;  %v2686_v50 = vld [vmem:[%s3399_s16 + $0x78] sm:$0xff]   ;;  %v3869_v45 = vsel %vm3468_vm2, %v3779_v32, %v482_v34  ;;  %v3307_v29 = vld [vmem:[%s4533_s3 + $0x1a8] sm:$0xff]   ;;  %v564_v34 = vrot.slane %v3700_v18, 1 }
  0x4c   : > { %3042 = vmatprep.subr.bf16.mxu1 %v3294_v53  ;;  %v562_v53 = vrot.slane %v3612_v9, 1  ;;  %v2590_v55 = vunpack.c.l.bf16 %v2686_v50  ;;  %v2591_v59 = vunpack.c.h.bf16 %v2686_v50  ;;  %v483_v15 = vrot.slane %v3843_v6, 7 }
  0x4e   : > { %1290 = vmatmul.mubr.bf16.gmra.mrb[20].mxu0 %v3821_v23  ;;  %1419 = vmatmul.mubr.bf16.gmra.mrb[20].mxu1 %v3810_v4  ;;  %v338_v11 = vmul.f32 %v2590_v55, %v3411_v12  ;;  %v339_v17 = vmul.f32 %v2591_v59, %v3411_v12  ;;  %v486_v27 = vor.u32 %v3873_v35, %v483_v15  ;;  %v420_v59 = vshrl.u32 %v3782_v36, 16  ;;  %v3313_v15 = vld [vmem:[%s4533_s3 + $0x1b8] sm:$0xff]  }
  0x4f   : > { %1297 = vmatprep.mubr.bf16.mxu0 %v3753_v3  ;;  %1426 = vmatprep.mubr.bf16.mxu1 %v3687_v62  ;;  %v563_v12 = vor.u32 %v562_v53, %v3609_v8  ;;  %v3311_v53 = vld [vmem:[%s4533_s3 + $0x1f8] sm:$0xff]  }
  0x50   : > { %3043 = vmatpush3.bf16.msra.mxu1 %v3295_v26  ;;  %v377_v7 = vadd.f32 %v3417_v16, %v338_v11  ;;  %v378_v26 = vadd.f32 %v3417_v16, %v339_v17  ;;  %v3308_v16 = vld [vmem:[%s4533_s3 + $0x1f0] sm:$0xff]   ;;  %v3906_v8 = vsel %vm3468_vm2, %v3843_v6, %v486_v27  ;;  %v491_v11 = vrot.slane %v420_v59, 7 }
  0x51   : > { %3044 = vmatprep.subr.bf16.mxu1 %v3298_v28  ;;  %v3892_v28 = vshrl.u32 %v3766_v22, 16  ;;  %v492_v17 = vshll.u32 %v3782_v36, 16  ;;  %v568_v27 = vrot.slane %v3814_v20, 1 }
  0x52   : > { %v3897_v38 = vpack.c.bf16 %v378_v26, %v377_v7  ;;  %v423_v26 = vshrl.u32 %v3823_v24, 16 }
  0x53   : > { %v487_v50 = vrot.slane %v3892_v28, 7 }
  0x54   : > { %3045 = vmatpush3.bf16.msra.mxu1 %v3299_v40  ;;  %v3911_v40 = vsel %vm3571_vm5, %v563_v12, %v3612_v9  ;;  %v565_v9 = vor.u32 %v564_v34, %v3674_v54  ;;  %v496_v34 = vshll.u32 %v3823_v24, 16 }
  0x55   : > { %3046 = vmatprep.subr.bf16.mxu1 %v3302_v52  ;;  %v3310_v52 = vld [vmem:[%s4533_s3 + $0x1b0] sm:$0xff]   ;;  %v490_v55 = vor.u32 %v3915_v51, %v487_v50 }
  0x56   : > { %1298 = vmatmul.mubr.bf16.gmra.mrb[24].mxu0 %v3869_v45  ;;  %1427 = vmatmul.mubr.bf16.gmra.mrb[24].mxu1 %v3736_v49 }
  0x57   : > { %1305 = vmatprep.mubr.bf16.mxu0 %v3816_v10  ;;  %1434 = vmatprep.mubr.bf16.mxu1 %v3760_v14  ;;  %v3941_v54 = vsel %vm3468_vm2, %v3892_v28, %v490_v55  ;;  %v500_v55 = vshll.u32 %v3848_v46, 16 }
  0x58   : > { %3047 = vmatpush3.bf16.msra.mxu1 %v3304_v39  ;;  %v3936_v39 = vsel %vm3571_vm5, %v565_v9, %v3700_v18  ;;  %v494_v18 = vor.u32 %v492_v17, %v491_v11 }
  0x59   : > { %3048 = vmatprep.subr.bf16.mxu1 %v3305_v25  ;;  %v566_v25 = vrot.slane %v3751_v43, 1 }
  0x5a   : > { %v3954_v12 = vsel %vm3468_vm2, %v420_v59, %v494_v18 }
  0x5b   : > { %v567_v7 = vor.u32 %v566_v25, %v3729_v41  ;;  %v569_v41 = vor.u32 %v568_v27, %v3779_v32  ;;  %v570_v32 = vrot.slane %v3873_v35, 1  ;;  %v3988_v25 = vshrl.u32 %v3897_v38, 16 }
  0x5c   : > { %3049 = vmatpush3.bf16.msra.mxu1 %v3307_v29 }
  0x5d   : > { %3050 = vmatprep.subr.bf16.mxu1 %v3308_v16  ;;  %v3959_v29 = vsel %vm3571_vm5, %v567_v7, %v3751_v43  ;;  %v495_v16 = vrot.slane %v423_v26, 7  ;;  %v3971_v43 = vsel %vm3571_vm5, %v569_v41, %v3814_v20  ;;  %v571_v11 = vor.u32 %v570_v32, %v3843_v6  ;;  %v3306_v32 = vld [vmem:[%s4533_s3 + $0x208] sm:$0xff]  }
  0x5e   : > { %1306 = vmatmul.mubr.bf16.gmra.mrb[28].mxu0 %v3906_v8  ;;  %1435 = vmatmul.mubr.bf16.gmra.mrb[28].mxu1 %v3911_v40  ;;  %v572_v41 = vrot.slane %v3915_v51, 1  ;;  %v519_v47 = vrot.slane %v3988_v25, 7 }
  0x5f   : > { %1313 = vmatprep.mubr.bf16.mxu0 %v3766_v22  ;;  %1442 = vmatprep.mubr.bf16.mxu1 %v3821_v23  ;;  %v498_v50 = vor.u32 %v496_v34, %v495_v16  ;;  %v3999_v16 = vsel %vm3571_vm5, %v571_v11, %v3873_v35  ;;  %v578_v11 = vrot.slane %v500_v55, 1 }
  0x60   : > { %3051 = vmatpush3.bf16.msra.mxu1 %v3310_v52  ;;  %v426_v52 = vshrl.u32 %v3848_v46, 16 }
  0x61   : > { %3052 = vmatprep.subr.bf16.mxu1 %v3311_v53  ;;  %v3975_v53 = vsel %vm3468_vm2, %v423_v26, %v498_v50  ;;  %v573_v50 = vor.u32 %v572_v41, %v3892_v28  ;;  %v3309_v28 = vld [vmem:[%s4533_s3 + $0x210] sm:$0xff]   ;;  %v3317_v41 = vld [vmem:[%s4533_s3 + $0x238] sm:$0xff]  }
  0x62   : > { %v499_v9 = vrot.slane %v426_v52, 7 }
  0x63   : > { %v4015_v35 = vsel %vm3571_vm5, %v573_v50, %v3915_v51 }
  0x64   : > { %3053 = vmatpush3.bf16.msra.mxu1 %v3313_v15  ;;  %v3982_v15 = vshll.u32 %v3897_v38, 16  ;;  %v502_v20 = vor.u32 %v500_v55, %v499_v9  ;;  %v574_v9 = vrot.slane %v492_v17, 1 }
  0x66   : > { %1314 = vmatmul.mubr.bf16.gmra.mrb[32].mxu0 %v3941_v54  ;;  %1443 = vmatmul.mubr.bf16.gmra.mrb[32].mxu1 %v3936_v39  ;;  %v588_v18 = vrot.slane %v3982_v15, 1  ;;  %v3994_v27 = vsel %vm3468_vm2, %v426_v52, %v502_v20  ;;  %v576_v20 = vrot.slane %v496_v34, 1 }
  0x67   : > { %1321 = vmatprep.mubr.bf16.mxu0 %v3782_v36  ;;  %1450 = vmatprep.mubr.bf16.mxu1 %v3869_v45 }
  0x68   : > { %v589_v7 = vor.u32 %v588_v18, %v3988_v25  ;;  %v3315_v18 = vld [vmem:[%s4533_s3 + $0x228] sm:$0xff]  }
  0x6a   : > { %v4005_v6 = vsel %vm3571_vm5, %v589_v7, %v3982_v15 }
  0x6e   : > { %1322 = vmatmul.mubr.bf16.gmra.mrb[36].mxu0 %v3954_v12  ;;  %1451 = vmatmul.mubr.bf16.gmra.mrb[36].mxu1 %v3959_v29 }
  0x6f   : > { %1329 = vmatprep.mubr.bf16.mxu0 %v3823_v24  ;;  %1458 = vmatprep.mubr.bf16.mxu1 %v3906_v8 }
  0x76   : > { %1330 = vmatmul.mubr.bf16.gmra.mrb[40].mxu0 %v3975_v53  ;;  %1459 = vmatmul.mubr.bf16.gmra.mrb[40].mxu1 %v3971_v43 }
  0x77   : > { %1337 = vmatprep.mubr.bf16.mxu0 %v3848_v46  ;;  %1466 = vmatprep.mubr.bf16.mxu1 %v3941_v54 }
  0x7e   : > { %1338 = vmatmul.mubr.bf16.gmra.mrb[44].mxu0 %v3994_v27  ;;  %1467 = vmatmul.mubr.bf16.gmra.mrb[44].mxu1 %v3999_v16 }
  0x7f   : > { %1474 = vmatprep.mubr.bf16.mxu1 %v3954_v12  ;;  %1571 = vmatprep.mubr.bf16.mxu0 %v3810_v4  ;;  %v575_v4 = vor.u32 %v574_v9, %v420_v59  ;;  %v3314_v59 = vld [vmem:[%s4533_s3 + $0x220] sm:$0xff]  }
  0x81   : > { %v4030_v51 = vsel %vm3571_vm5, %v575_v4, %v492_v17 }
  0x86   : > { %1475 = vmatmul.mubr.bf16.gmra.mrb[48].mxu1 %v4015_v35  ;;  %1572 = vmatmul.mubr.bf16.vlgmr.msra.gmra.mrb[48].mxu0 %v3489_v61  ;;  %v3312_v61 = vld [vmem:[%s4533_s3 + $0x218] sm:$0xff]  }
  0x87   : > { %3175 = vmatpush3.bf16.msra.mxu0 %v3802_v56  ;;  %1482 = vmatprep.mubr.bf16.mxu1 %v3975_v53  ;;  %v577_v56 = vor.u32 %v576_v20, %v423_v26  ;;  %v579_v26 = vor.u32 %v578_v11, %v426_v52  ;;  %v522_v52 = vor.u32 %v3982_v15, %v519_v47 }
  0x88   : > { %1579 = vmatprep.mubr.bf16.mxu0 %v3736_v49  ;;  %3176 = vmatprep.subr.bf16.mxu0 %v3306_v32 }
  0x89   : > { %v4044_v17 = vsel %vm3571_vm5, %v577_v56, %v496_v34  ;;  %v3316_v34 = vld [vmem:[%s4533_s3 + $0x230] sm:$0xff]   ;;  %v4058_v7 = vsel %vm3571_vm5, %v579_v26, %v500_v55  ;;  %v4080_v55 = vsel %vm3468_vm2, %v3988_v25, %v522_v52 }
  0x8b   : > { %3177 = vmatpush3.bf16.msra.mxu0 %v3306_v32 }
  0x8c   : > { %3178 = vmatprep.subr.bf16.mxu0 %v3309_v28 }
  0x8e   : > { %1483 = vmatmul.mubr.bf16.gmra.mrb[52].mxu1 %v4030_v51  ;;  %1580 = vmatmul.mubr.bf16.gmra.mrb[52].mxu0 %v3439_v31 }
  0x8f   : > { %1490 = vmatprep.mubr.bf16.mxu1 %v3994_v27  ;;  %1587 = vmatprep.mubr.bf16.mxu0 %v3911_v40 }
  0x90   : > { %3179 = vmatpush3.bf16.msra.mxu0 %v3309_v28 }
  0x91   : > { %3180 = vmatprep.subr.bf16.mxu0 %v3312_v61 }
  0x94   : > { %3181 = vmatpush3.bf16.msra.mxu0 %v3312_v61 }
  0x95   : > { %3182 = vmatprep.subr.bf16.mxu0 %v3314_v59 }
  0x96   : > { %1491 = vmatmul.mubr.bf16.gmra.mrb[56].mxu1 %v4044_v17  ;;  %1588 = vmatmul.mubr.bf16.gmra.mrb[56].mxu0 %v3594_v58 }
  0x97   : > { %1498 = vmatprep.mubr.bf16.mxu1 %v3505_v5  ;;  %1595 = vmatprep.mubr.bf16.mxu0 %v3936_v39 }
  0x98   : > { %3183 = vmatpush3.bf16.msra.mxu0 %v3314_v59 }
  0x99   : > { %3184 = vmatprep.subr.bf16.mxu0 %v3315_v18 }
  0x9c   : > { %3185 = vmatpush3.bf16.msra.mxu0 %v3315_v18 }
  0x9d   : > { %3186 = vmatprep.subr.bf16.mxu0 %v3316_v34 }
  0x9e   : > { %1499 = vmatmul.mubr.bf16.gmra.mrb[60].mxu1 %v4058_v7  ;;  %1596 = vmatmul.mubr.bf16.gmra.mrb[60].mxu0 %v3657_v37 }
  0x9f   : > { %1506 = vmatprep.mubr.bf16.mxu1 %v3560_v42  ;;  %1603 = vmatprep.mubr.bf16.mxu0 %v3959_v29 }
  0xa0   : > { %3187 = vmatpush3.bf16.msra.mxu0 %v3316_v34 }
  0xa1   : > { %3188 = vmatprep.subr.bf16.mxu0 %v3317_v41 }
  0xa4   : > { %3189 = vmatpush3.bf16.msra.mxu0 %v3317_v41 }
  0xa6   : > { %1507 = vmatmul.mubr.bf16.gmra.mrb[64].mxu1 %v3590_v57  ;;  %1604 = vmatmul.mubr.bf16.gmra.mrb[64].mxu0 %v3702_v19 }
  0xa7   : > { %1514 = vmatprep.mubr.bf16.mxu1 %v3640_v21  ;;  %1611 = vmatprep.mubr.bf16.mxu0 %v3971_v43 }
  0xae   : > { %1515 = vmatmul.mubr.bf16.gmra.mrb[68].mxu1 %v3620_v13  ;;  %1612 = vmatmul.mubr.bf16.gmra.mrb[68].mxu0 %v3753_v3 }
  0xaf   : > { %1522 = vmatprep.mubr.bf16.mxu1 %v3692_v63  ;;  %1619 = vmatprep.mubr.bf16.mxu0 %v3999_v16 }
  0xb6   : > { %1523 = vmatmul.mubr.bf16.gmra.mrb[72].mxu1 %v3853_v44  ;;  %1620 = vmatmul.mubr.bf16.gmra.mrb[72].mxu0 %v3816_v10 }
  0xb7   : > { %1530 = vmatprep.mubr.bf16.mxu1 %v4080_v55  ;;  %1627 = vmatprep.mubr.bf16.mxu0 %v4015_v35 }
  0xbe   : > { %1531 = vmatmul.mubr.bf16.gmra.mrb[76].mxu1 %v3864_v60  ;;  %1628 = vmatmul.mubr.bf16.gmra.mrb[76].mxu0 %v3766_v22 }
  0xbf   : > { %1635 = vmatprep.mubr.bf16.mxu0 %v4030_v51  ;;  %1732 = vmatprep.mubr.bf16.mxu1 %v3439_v31 }
  0xc6   : > { %1636 = vmatmul.mubr.bf16.gmra.mrb[80].mxu0 %v3782_v36  ;;  %1733 = vmatmul.mubr.bf16.vlgmr.msra.gmra.mrb[80].mxu1 %v3496_v0 }
  0xc7   : > { %1643 = vmatprep.mubr.bf16.mxu0 %v4044_v17  ;;  %1740 = vmatprep.mubr.bf16.mxu1 %v3594_v58 }
  0xce   : > { %1644 = vmatmul.mubr.bf16.gmra.mrb[84].mxu0 %v3823_v24  ;;  %1741 = vmatmul.mubr.bf16.gmra.mrb[84].mxu1 %v3687_v62 }
  0xcf   : > { %1651 = vmatprep.mubr.bf16.mxu0 %v4058_v7  ;;  %1748 = vmatprep.mubr.bf16.mxu1 %v3657_v37 }
  0xd6   : > { %1652 = vmatmul.mubr.bf16.gmra.mrb[88].mxu0 %v3848_v46  ;;  %1749 = vmatmul.mubr.bf16.gmra.mrb[88].mxu1 %v3760_v14 }
  0xd7   : > { %1659 = vmatprep.mubr.bf16.mxu0 %v3590_v57  ;;  %1756 = vmatprep.mubr.bf16.mxu1 %v3702_v19 }
  0xde   : > { %1660 = vmatmul.mubr.bf16.gmra.mrb[92].mxu0 %v3442_v33  ;;  %1757 = vmatmul.mubr.bf16.gmra.mrb[92].mxu1 %v3821_v23 }
  0xdf   : > { %1667 = vmatprep.mubr.bf16.mxu0 %v3620_v13  ;;  %1764 = vmatprep.mubr.bf16.mxu1 %v3753_v3 }
  0xe6   : > { %1668 = vmatmul.mubr.bf16.gmra.mrb[96].mxu0 %v3501_v2  ;;  %1765 = vmatmul.mubr.bf16.gmra.mrb[96].mxu1 %v3869_v45 }
  0xe7   : > { %1675 = vmatprep.mubr.bf16.mxu0 %v3853_v44  ;;  %1772 = vmatprep.mubr.bf16.mxu1 %v3816_v10 }
  0xee   : > { %1676 = vmatmul.mubr.bf16.gmra.mrb[100].mxu0 %v3542_v30  ;;  %1773 = vmatmul.mubr.bf16.gmra.mrb[100].mxu1 %v3906_v8 }
  0xef   : > { %1683 = vmatprep.mubr.bf16.mxu0 %v3864_v60  ;;  %1780 = vmatprep.mubr.bf16.mxu1 %v3766_v22 }
  0xf6   : > { %1684 = vmatmul.mubr.bf16.gmra.mrb[104].mxu0 %v3602_v1  ;;  %1781 = vmatmul.mubr.bf16.gmra.mrb[104].mxu1 %v3941_v54 }
  0xf7   : > { %1691 = vmatprep.mubr.bf16.mxu0 %v4005_v6  ;;  %1788 = vmatprep.mubr.bf16.mxu1 %v3782_v36 }
  0xf9   : > { %v2718_v31 = vpop.f32.mrb[0].mxu0  ;;  %v2790_v48 = vpop.f32.mrb[0].mxu1 }
  0xfa   : > { %v2719_v0 = vpop.f32.mrb[1].mxu0  ;;  %v2791_v58 = vpop.f32.mrb[1].mxu1 }
  0xfb   : > { %v4118_v37 = vadd.f32 %v2719_v0, %v2718_v31  ;;  %v4120_v62 = vadd.f32 %v2791_v58, %v2790_v48  ;;  %v2721_v19 = vpop.f32.mrb[2].mxu0  ;;  %v2793_v3 = vpop.f32.mrb[2].mxu1 }
  0xfc   : > { %v2722_v14 = vpop.f32.mrb[3].mxu0  ;;  %v2794_v22 = vpop.f32.mrb[3].mxu1 }
  0xfd   : > { %v4122_v10 = vadd.f32 %v2722_v14, %v2721_v19  ;;  %v4124_v23 = vadd.f32 %v2794_v22, %v2793_v3 }
  0xfe   : > { %1692 = vmatmul.mubr.bf16.gmra.mrb[108].mxu0 %v3897_v38  ;;  %1789 = vmatmul.mubr.bf16.gmra.mrb[108].mxu1 %v3954_v12 }
  0xff   : > { %1796 = vmatprep.mubr.bf16.mxu1 %v3823_v24  ;;  %3190 = vmatprep.mubr.bf16.mxu0 %v3736_v49 }
 0x101   : > { %v2724_v36 = vpop.f32.mrb[4].mxu0  ;;  %v2796_v45 = vpop.f32.mrb[4].mxu1 }
 0x102   : > { %v2725_v8 = vpop.f32.mrb[5].mxu0  ;;  %v2797_v54 = vpop.f32.mrb[5].mxu1 }
 0x103   : > { %v4130_v15 = vadd.f32 %v2725_v8, %v2724_v36  ;;  %v4132_v25 = vadd.f32 %v2797_v54, %v2796_v45  ;;  %v2727_v50 = vpop.f32.mrb[6].mxu0  ;;  %v2799_v9 = vpop.f32.mrb[6].mxu1 }
 0x104   : > { %v2728_v32 = vpop.f32.mrb[7].mxu0  ;;  %v2800_v4 = vpop.f32.mrb[7].mxu1 }
 0x105   : > { %v4134_v28 = vadd.f32 %v2728_v32, %v2727_v50  ;;  %v4136_v20 = vadd.f32 %v2800_v4, %v2799_v9 }
 0x106   : > { %1797 = vmatmul.mubr.bf16.gmra.mrb[112].mxu1 %v3975_v53  ;;  %3191 = vmatmul.mubr.bf16.vlgmr.msra.gmra.mrb[112].mxu0 %v3911_v40 }
 0x107   : > { %1804 = vmatprep.mubr.bf16.mxu1 %v3848_v46  ;;  %3194 = vmatprep.mubr.bf16.mxu0 %v3936_v39 }
 0x109   : > { %v2730_v49 = vpop.f32.mrb[8].mxu0  ;;  %v2802_v24 = vpop.f32.mrb[8].mxu1 }
 0x10a   : > { %v2731_v12 = vpop.f32.mrb[9].mxu0  ;;  %v2803_v61 = vpop.f32.mrb[9].mxu1 }
 0x10b   : > { %v4142_v56 = vadd.f32 %v2731_v12, %v2730_v49  ;;  %v4144_v59 = vadd.f32 %v2803_v61, %v2802_v24  ;;  %v2733_v11 = vpop.f32.mrb[10].mxu0  ;;  %v2805_v18 = vpop.f32.mrb[10].mxu1 }
 0x10c   : > { %v2734_v26 = vpop.f32.mrb[11].mxu0  ;;  %v2806_v34 = vpop.f32.mrb[11].mxu1 }
 0x10d   : > { %v4146_v41 = vadd.f32 %v2734_v26, %v2733_v11  ;;  %v4148_v53 = vadd.f32 %v2806_v34, %v2805_v18 }
 0x10e   : > { %1805 = vmatmul.mubr.bf16.gmra.mrb[116].mxu1 %v3994_v27  ;;  %3195 = vmatmul.mubr.bf16.gmra.mrb[116].mxu0 %v3959_v29 }
 0x10f   : > { %1812 = vmatprep.mubr.bf16.mxu1 %v3442_v33  ;;  %3198 = vmatprep.mubr.bf16.mxu0 %v3971_v43 }
 0x111   : > { %v2736_v46 = vpop.f32.mrb[12].mxu0  ;;  %v2808_v40 = vpop.f32.mrb[12].mxu1 }
 0x112   : > { %v2737_v39 = vpop.f32.mrb[13].mxu0  ;;  %v2809_v47 = vpop.f32.mrb[13].mxu1 }
 0x113   : > { %v4154_v52 = vadd.f32 %v2737_v39, %v2736_v46  ;;  %v4156_v31 = vadd.f32 %v2809_v47, %v2808_v40  ;;  %v2739_v48 = vpop.f32.mrb[14].mxu0  ;;  %v2811_v0 = vpop.f32.mrb[14].mxu1 }
 0x114   : > { %v2740_v58 = vpop.f32.mrb[15].mxu0  ;;  %v2812_v19 = vpop.f32.mrb[15].mxu1 }
 0x115   : > { %v4158_v3 = vadd.f32 %v2740_v58, %v2739_v48  ;;  %v4160_v27 = vadd.f32 %v2812_v19, %v2811_v0 }
 0x116   : > { %1813 = vmatmul.mubr.bf16.gmra.mrb[120].mxu1 %v3505_v5  ;;  %3199 = vmatmul.mubr.bf16.gmra.mrb[120].mxu0 %v3999_v16 }
 0x117   : > { %1820 = vmatprep.mubr.bf16.mxu1 %v3501_v2  ;;  %3202 = vmatprep.mubr.bf16.mxu0 %v4015_v35 }
 0x119   : > { %v2742_v33 = vpop.f32.mrb[16].mxu0  ;;  %v2830_v29 = vpop.f32.mrb[16].mxu1 }
 0x11a   : > { %v2743_v43 = vpop.f32.mrb[17].mxu0  ;;  %v2831_v14 = vpop.f32.mrb[17].mxu1 }
 0x11b   : > { %v4166_v22 = vadd.f32 %v2743_v43, %v2742_v33  ;;  %v2832_v36 = vadd.f32 %v2831_v14, %v2830_v29  ;;  %v2745_v45 = vpop.f32.mrb[18].mxu0  ;;  %v2833_v8 = vpop.f32.mrb[18].mxu1 }
 0x11c   : > { %v2746_v54 = vpop.f32.mrb[19].mxu0  ;;  %v2834_v50 = vpop.f32.mrb[19].mxu1 }
 0x11d   : > { %v4169_v9 = vadd.f32 %v2832_v36, %v4118_v37  ;;  %v4171_v5 = vadd.f32 %v2746_v54, %v2745_v45  ;;  %v2835_v16 = vadd.f32 %v2834_v50, %v2833_v8 }
 0x11e   : > { %1821 = vmatmul.mubr.bf16.gmra.mrb[124].mxu1 %v3560_v42  ;;  %3203 = vmatmul.mubr.bf16.gmra.mrb[124].mxu0 %v4030_v51 }
 0x11f   : > { %v4176_v2 = vadd.f32 %v2835_v16, %v4122_v10  ;;  %1828 = vmatprep.mubr.bf16.mxu1 %v3542_v30  ;;  %3206 = vmatprep.mubr.bf16.mxu0 %v4044_v17 }
 0x121   : > { %v2748_v35 = vpop.f32.mrb[20].mxu0  ;;  %v2836_v32 = vpop.f32.mrb[20].mxu1 }
 0x122   : > { %v2749_v4 = vpop.f32.mrb[21].mxu0  ;;  %v2837_v49 = vpop.f32.mrb[21].mxu1 }
 0x123   : > { %v4180_v37 = vadd.f32 %v2749_v4, %v2748_v35  ;;  %v2838_v24 = vadd.f32 %v2837_v49, %v2836_v32  ;;  %v2751_v12 = vpop.f32.mrb[22].mxu0  ;;  %v2839_v61 = vpop.f32.mrb[22].mxu1 }
 0x124   : > { %v2752_v11 = vpop.f32.mrb[23].mxu0  ;;  %v2840_v42 = vpop.f32.mrb[23].mxu1 }
 0x125   : > { %v4183_v51 = vadd.f32 %v2838_v24, %v4130_v15  ;;  %v4185_v10 = vadd.f32 %v2752_v11, %v2751_v12  ;;  %v2841_v18 = vadd.f32 %v2840_v42, %v2839_v61 }
 0x126   : > { %1829 = vmatmul.mubr.bf16.gmra.mrb[128].mxu1 %v3640_v21  ;;  %3207 = vmatmul.mubr.bf16.gmra.mrb[128].mxu0 %v4058_v7 }
 0x127   : > { %v4190_v30 = vadd.f32 %v2841_v18, %v4134_v28  ;;  %1836 = vmatprep.mubr.bf16.mxu1 %v3602_v1  ;;  %3210 = vmatprep.mubr.bf16.mxu0 %v3590_v57 }
 0x129   : > { %v2754_v17 = vpop.f32.mrb[24].mxu0  ;;  %v2842_v26 = vpop.f32.mrb[24].mxu1 }
 0x12a   : > { %v2755_v34 = vpop.f32.mrb[25].mxu0  ;;  %v2843_v46 = vpop.f32.mrb[25].mxu1 }
 0x12b   : > { %v4194_v15 = vadd.f32 %v2755_v34, %v2754_v17  ;;  %v2844_v40 = vadd.f32 %v2843_v46, %v2842_v26  ;;  %v2757_v39 = vpop.f32.mrb[26].mxu0  ;;  %v2845_v47 = vpop.f32.mrb[26].mxu1 }
 0x12c   : > { %v2758_v48 = vpop.f32.mrb[27].mxu0  ;;  %v2846_v21 = vpop.f32.mrb[27].mxu1 }
 0x12d   : > { %v4197_v7 = vadd.f32 %v2844_v40, %v4142_v56  ;;  %v4199_v28 = vadd.f32 %v2758_v48, %v2757_v39  ;;  %v2847_v0 = vadd.f32 %v2846_v21, %v2845_v47 }
 0x12e   : > { %1837 = vmatmul.mubr.bf16.gmra.mrb[132].mxu1 %v3692_v63  ;;  %3211 = vmatmul.mubr.bf16.gmra.mrb[132].mxu0 %v3620_v13 }
 0x12f   : > { %v4204_v57 = vadd.f32 %v2847_v0, %v4146_v41  ;;  %1844 = vmatprep.mubr.bf16.mxu1 %v3897_v38  ;;  %3214 = vmatprep.mubr.bf16.mxu0 %v3853_v44 }
 0x131   : > { %v2760_v58 = vpop.f32.mrb[28].mxu0  ;;  %v2848_v19 = vpop.f32.mrb[28].mxu1 }
 0x132   : > { %v2761_v33 = vpop.f32.mrb[29].mxu0  ;;  %v2849_v29 = vpop.f32.mrb[29].mxu1 }
 0x133   : > { %v4208_v56 = vadd.f32 %v2761_v33, %v2760_v58  ;;  %v2850_v43 = vadd.f32 %v2849_v29, %v2848_v19  ;;  %v2763_v14 = vpop.f32.mrb[30].mxu0  ;;  %v2851_v36 = vpop.f32.mrb[30].mxu1 }
 0x134   : > { %v2764_v45 = vpop.f32.mrb[31].mxu0  ;;  %v2852_v8 = vpop.f32.mrb[31].mxu1 }
 0x135   : > { %v4211_v13 = vadd.f32 %v2850_v43, %v4154_v52  ;;  %v4213_v41 = vadd.f32 %v2764_v45, %v2763_v14  ;;  %v2853_v54 = vadd.f32 %v2852_v8, %v2851_v36 }
 0x136   : > { %1845 = vmatmul.mubr.bf16.gmra.mrb[136].mxu1 %v4080_v55  ;;  %3215 = vmatmul.mubr.bf16.gmra.mrb[136].mxu0 %v3864_v60 }
 0x137   : > { %v4218_v44 = vadd.f32 %v2853_v54, %v4158_v3  ;;  %1852 = vmatprep.mubr.bf16.mxu1 %v3602_v1  ;;  %3218 = vmatprep.mubr.bf16.mxu0 %v4005_v6 }
 0x139   : > { %v2766_v38 = vpop.f32.mrb[32].mxu0  ;;  %v2854_v50 = vpop.f32.mrb[32].mxu1 }
 0x13a   : > { %v2767_v16 = vpop.f32.mrb[33].mxu0  ;;  %v2855_v35 = vpop.f32.mrb[33].mxu1 }
 0x13b   : > { %v4222_v52 = vadd.f32 %v2767_v16, %v2766_v38  ;;  %v2856_v32 = vadd.f32 %v2855_v35, %v2854_v50  ;;  %v2769_v4 = vpop.f32.mrb[34].mxu0  ;;  %v2857_v49 = vpop.f32.mrb[34].mxu1 }
 0x13c   : > { %v2770_v24 = vpop.f32.mrb[35].mxu0  ;;  %v2858_v55 = vpop.f32.mrb[35].mxu1 }
 0x13d   : > { %v4225_v12 = vadd.f32 %v2856_v32, %v4166_v22  ;;  %v2771_v3 = vadd.f32 %v2770_v24, %v2769_v4  ;;  %v2859_v61 = vadd.f32 %v2858_v55, %v2857_v49 }
 0x13e   : > { %1853 = vmatmul.mubr.bf16.gmra.mrb[140].mxu1 %v3692_v63  ;;  %3219 = vmatmul.mubr.bf16.gmra.mrb[140].mxu0 %v3864_v60 }
 0x13f   : > { %v4230_v1 = vadd.f32 %v2859_v61, %v4171_v5 }
 0x141   : > { %v2772_v6 = vpop.f32.mrb[36].mxu0  ;;  %v2860_v11 = vpop.f32.mrb[36].mxu1 }
 0x142   : > { %v2773_v42 = vpop.f32.mrb[37].mxu0  ;;  %v2861_v18 = vpop.f32.mrb[37].mxu1 }
 0x143   : > { %v4232_v17 = vadd.f32 %v2773_v42, %v2772_v6  ;;  %v2862_v26 = vadd.f32 %v2861_v18, %v2860_v11  ;;  %v2775_v34 = vpop.f32.mrb[38].mxu0  ;;  %v2863_v46 = vpop.f32.mrb[38].mxu1 }
 0x144   : > { %v2776_v22 = vpop.f32.mrb[39].mxu0  ;;  %v2864_v40 = vpop.f32.mrb[39].mxu1 }
 0x145   : > { %v4235_v39 = vadd.f32 %v2862_v26, %v4180_v37  ;;  %v2777_v63 = vadd.f32 %v2776_v22, %v2775_v34  ;;  %v2865_v47 = vadd.f32 %v2864_v40, %v2863_v46 }
 0x147   : > { %v4238_v60 = vadd.f32 %v2865_v47, %v4185_v10 }
 0x149   : > { %v2778_v5 = vpop.f32.mrb[40].mxu0  ;;  %v2866_v48 = vpop.f32.mrb[40].mxu1 }
 0x14a   : > { %v2779_v21 = vpop.f32.mrb[41].mxu0  ;;  %v2867_v0 = vpop.f32.mrb[41].mxu1 }
 0x14b   : > { %v4240_v58 = vadd.f32 %v2779_v21, %v2778_v5  ;;  %v2868_v19 = vadd.f32 %v2867_v0, %v2866_v48  ;;  %v2781_v33 = vpop.f32.mrb[42].mxu0  ;;  %v2869_v29 = vpop.f32.mrb[42].mxu1 }
 0x14c   : > { %v2782_v43 = vpop.f32.mrb[43].mxu0  ;;  %v2870_v14 = vpop.f32.mrb[43].mxu1 }
 0x14d   : > { %v4243_v36 = vadd.f32 %v2868_v19, %v4194_v15  ;;  %v4245_v37 = vadd.f32 %v2782_v43, %v2781_v33  ;;  %v2871_v45 = vadd.f32 %v2870_v14, %v2869_v29 }
 0x14f   : > { %v4248_v10 = vadd.f32 %v2871_v45, %v4199_v28 }
 0x151   : > { %v2784_v8 = vpop.f32.mrb[44].mxu0  ;;  %v2872_v54 = vpop.f32.mrb[44].mxu1 }
 0x152   : > { %v2785_v38 = vpop.f32.mrb[45].mxu0  ;;  %v2873_v50 = vpop.f32.mrb[45].mxu1 }
 0x153   : > { %v4250_v16 = vadd.f32 %v2785_v38, %v2784_v8  ;;  %v2874_v35 = vadd.f32 %v2873_v50, %v2872_v54  ;;  %v2787_v32 = vpop.f32.mrb[46].mxu0  ;;  %v2875_v4 = vpop.f32.mrb[46].mxu1 }
 0x154   : > { %v2788_v49 = vpop.f32.mrb[47].mxu0  ;;  %v2876_v24 = vpop.f32.mrb[47].mxu1 }
 0x155   : > { %v4253_v15 = vadd.f32 %v2874_v35, %v4208_v56  ;;  %v4255_v55 = vadd.f32 %v2788_v49, %v2787_v32  ;;  %v2877_v61 = vadd.f32 %v2876_v24, %v2875_v4 }
 0x157   : > { %v4258_v28 = vadd.f32 %v2877_v61, %v4213_v41 }
 0x159   : > { %v2878_v6 = vpop.f32.mrb[48].mxu1  ;;  %v2942_v11 = vpop.f32.mrb[48].mxu0 }
 0x15a   : > { %v2879_v42 = vpop.f32.mrb[49].mxu1  ;;  %v2943_v18 = vpop.f32.mrb[49].mxu0 }
 0x15b   : > { %v2880_v26 = vadd.f32 %v2879_v42, %v2878_v6  ;;  %v2944_v34 = vadd.f32 %v2943_v18, %v2942_v11  ;;  %v2881_v46 = vpop.f32.mrb[50].mxu1  ;;  %v2945_v22 = vpop.f32.mrb[50].mxu0 }
 0x15c   : > { %v2882_v40 = vpop.f32.mrb[51].mxu1  ;;  %v2946_v47 = vpop.f32.mrb[51].mxu0 }
 0x15d   : > { %v4261_v5 = vadd.f32 %v2880_v26, %v4222_v52  ;;  %v4264_v56 = vadd.f32 %v2944_v34, %v4169_v9  ;;  %v2883_v48 = vadd.f32 %v2882_v40, %v2881_v46  ;;  %v2947_v21 = vadd.f32 %v2946_v47, %v2945_v22 }
 0x15f   : > { %v4266_v41 = vadd.f32 %v2883_v48, %v2771_v3  ;;  %v4269_v0 = vadd.f32 %v2947_v21, %v4176_v2 }
 0x161   : > { %v2884_v19 = vpop.f32.mrb[52].mxu1  ;;  %v2948_v33 = vpop.f32.mrb[52].mxu0 }
 0x162   : > { %v2885_v29 = vpop.f32.mrb[53].mxu1  ;;  %v2949_v43 = vpop.f32.mrb[53].mxu0 }
 0x163   : > { %v2886_v14 = vadd.f32 %v2885_v29, %v2884_v19  ;;  %v2950_v45 = vadd.f32 %v2949_v43, %v2948_v33  ;;  %v2887_v8 = vpop.f32.mrb[54].mxu1  ;;  %v2951_v54 = vpop.f32.mrb[54].mxu0 }
 0x164   : > { %v2888_v52 = vpop.f32.mrb[55].mxu1  ;;  %v2952_v38 = vpop.f32.mrb[55].mxu0 }
 0x165   : > { %v4272_v9 = vadd.f32 %v2886_v14, %v4232_v17  ;;  %v4275_v50 = vadd.f32 %v2950_v45, %v4183_v51  ;;  %v2889_v3 = vadd.f32 %v2888_v52, %v2887_v8  ;;  %v2953_v35 = vadd.f32 %v2952_v38, %v2951_v54 }
 0x167   : > { %v4277_v2 = vadd.f32 %v2889_v3, %v2777_v63  ;;  %v4280_v32 = vadd.f32 %v2953_v35, %v4190_v30 }
 0x169   : > { %v2890_v4 = vpop.f32.mrb[56].mxu1  ;;  %v2954_v49 = vpop.f32.mrb[56].mxu0 }
 0x16a   : > { %v2891_v24 = vpop.f32.mrb[57].mxu1  ;;  %v2955_v61 = vpop.f32.mrb[57].mxu0 }
 0x16b   : > { %v2892_v6 = vadd.f32 %v2891_v24, %v2890_v4  ;;  %v2956_v11 = vadd.f32 %v2955_v61, %v2954_v49  ;;  %v2893_v42 = vpop.f32.mrb[58].mxu1  ;;  %v2957_v18 = vpop.f32.mrb[58].mxu0 }
 0x16c   : > { %v2894_v17 = vpop.f32.mrb[59].mxu1  ;;  %v2958_v26 = vpop.f32.mrb[59].mxu0 }
 0x16d   : > { %v4283_v51 = vadd.f32 %v2892_v6, %v4240_v58  ;;  %v4286_v34 = vadd.f32 %v2956_v11, %v4197_v7  ;;  %v2895_v63 = vadd.f32 %v2894_v17, %v2893_v42  ;;  %v2959_v46 = vadd.f32 %v2958_v26, %v2957_v18 }
 0x16f   : > { %v4289_v30 = vadd.f32 %v2895_v63, %v4245_v37  ;;  %v4292_v22 = vadd.f32 %v2959_v46, %v4204_v57 }
 0x171   : > { %v2896_v40 = vpop.f32.mrb[60].mxu1  ;;  %v2960_v47 = vpop.f32.mrb[60].mxu0 }
 0x172   : > { %v2897_v48 = vpop.f32.mrb[61].mxu1  ;;  %v2961_v21 = vpop.f32.mrb[61].mxu0 }
 0x173   : > { %v2898_v19 = vadd.f32 %v2897_v48, %v2896_v40  ;;  %v2962_v33 = vadd.f32 %v2961_v21, %v2960_v47  ;;  %v2899_v29 = vpop.f32.mrb[62].mxu1  ;;  %v2963_v58 = vpop.f32.mrb[62].mxu0 }
 0x174   : > { %v2900_v43 = vpop.f32.mrb[63].mxu1  ;;  %v2964_v14 = vpop.f32.mrb[63].mxu0 }
 0x175   : > { %v4295_v7 = vadd.f32 %v2898_v19, %v4250_v16  ;;  %v4298_v45 = vadd.f32 %v2962_v33, %v4211_v13  ;;  %v2901_v37 = vadd.f32 %v2900_v43, %v2899_v29  ;;  %v2965_v8 = vadd.f32 %v2964_v14, %v2963_v58 }
 0x177   : > { %v4301_v57 = vadd.f32 %v2901_v37, %v4255_v55  ;;  %v4304_v54 = vadd.f32 %v2965_v8, %v4218_v44 }
 0x179   : > { %v2902_v52 = vpop.f32.mrb[64].mxu1  ;;  %v2966_v38 = vpop.f32.mrb[64].mxu0 }
 0x17a   : > { %v2903_v3 = vpop.f32.mrb[65].mxu1  ;;  %v2967_v35 = vpop.f32.mrb[65].mxu0 }
 0x17b   : > { %v2904_v4 = vadd.f32 %v2903_v3, %v2902_v52  ;;  %v2968_v49 = vadd.f32 %v2967_v35, %v2966_v38  ;;  %v2905_v24 = vpop.f32.mrb[66].mxu1  ;;  %v2969_v16 = vpop.f32.mrb[66].mxu0 }
 0x17c   : > { %v2906_v61 = vpop.f32.mrb[67].mxu1  ;;  %v2970_v6 = vpop.f32.mrb[67].mxu0 }
 0x17d   : > { %v4307_v13 = vadd.f32 %v2904_v4, %v4120_v62  ;;  %v4310_v11 = vadd.f32 %v2968_v49, %v4225_v12  ;;  %v2907_v55 = vadd.f32 %v2906_v61, %v2905_v24  ;;  %v2971_v42 = vadd.f32 %v2970_v6, %v2969_v16 }
 0x17f   : > { %v4313_v44 = vadd.f32 %v2907_v55, %v4124_v23  ;;  %v4316_v18 = vadd.f32 %v2971_v42, %v4230_v1 }
 0x181   : > { %v2908_v17 = vpop.f32.mrb[68].mxu1  ;;  %v2972_v26 = vpop.f32.mrb[68].mxu0 }
 0x182   : > { %v2909_v63 = vpop.f32.mrb[69].mxu1  ;;  %v2973_v46 = vpop.f32.mrb[69].mxu0 }
 0x183   : > { %v2910_v40 = vadd.f32 %v2909_v63, %v2908_v17  ;;  %v2974_v47 = vadd.f32 %v2973_v46, %v2972_v26  ;;  %v2911_v48 = vpop.f32.mrb[70].mxu1  ;;  %v2975_v62 = vpop.f32.mrb[70].mxu0 }
 0x184   : > { %v2912_v21 = vpop.f32.mrb[71].mxu1  ;;  %v2976_v19 = vpop.f32.mrb[71].mxu0 }
 0x185   : > { %v4319_v12 = vadd.f32 %v2910_v40, %v4132_v25  ;;  %v4322_v33 = vadd.f32 %v2974_v47, %v4235_v39  ;;  %v2913_v23 = vadd.f32 %v2912_v21, %v2911_v48  ;;  %v2977_v29 = vadd.f32 %v2976_v19, %v2975_v62 }
 0x187   : > { %v4325_v1 = vadd.f32 %v2913_v23, %v4136_v20  ;;  %v4328_v58 = vadd.f32 %v2977_v29, %v4238_v60 }
 0x189   : > { %v2914_v43 = vpop.f32.mrb[72].mxu1  ;;  %v2978_v14 = vpop.f32.mrb[72].mxu0 }
 0x18a   : > { %v2915_v37 = vpop.f32.mrb[73].mxu1  ;;  %v2979_v8 = vpop.f32.mrb[73].mxu0 }
 0x18b   : > { %v2916_v52 = vadd.f32 %v2915_v37, %v2914_v43  ;;  %v2980_v38 = vadd.f32 %v2979_v8, %v2978_v14  ;;  %v2917_v3 = vpop.f32.mrb[74].mxu1  ;;  %v2981_v25 = vpop.f32.mrb[74].mxu0 }
 0x18c   : > { %v2918_v35 = vpop.f32.mrb[75].mxu1  ;;  %v2982_v4 = vpop.f32.mrb[75].mxu0 }
 0x18d   : > { %v4331_v39 = vadd.f32 %v2916_v52, %v4144_v59  ;;  %v4334_v49 = vadd.f32 %v2980_v38, %v4243_v36  ;;  %v2919_v20 = vadd.f32 %v2918_v35, %v2917_v3  ;;  %v2983_v24 = vadd.f32 %v2982_v4, %v2981_v25 }
 0x18f   : > { %v4337_v60 = vadd.f32 %v2919_v20, %v4148_v53  ;;  %v4340_v16 = vadd.f32 %v2983_v24, %v4248_v10 }
 0x191   : > { %v2920_v61 = vpop.f32.mrb[76].mxu1  ;;  %v2984_v6 = vpop.f32.mrb[76].mxu0 }
 0x192   : > { %v2921_v55 = vpop.f32.mrb[77].mxu1  ;;  %v2985_v42 = vpop.f32.mrb[77].mxu0 }
 0x193   : > { %v2922_v17 = vadd.f32 %v2921_v55, %v2920_v61  ;;  %v2986_v26 = vadd.f32 %v2985_v42, %v2984_v6  ;;  %v2923_v63 = vpop.f32.mrb[78].mxu1  ;;  %v2987_v59 = vpop.f32.mrb[78].mxu0 }
 0x194   : > { %v2924_v46 = vpop.f32.mrb[79].mxu1  ;;  %v2988_v40 = vpop.f32.mrb[79].mxu0 }
 0x195   : > { %v4343_v36 = vadd.f32 %v2922_v17, %v4156_v31  ;;  %v4346_v47 = vadd.f32 %v2986_v26, %v4253_v15  ;;  %v2925_v53 = vadd.f32 %v2924_v46, %v2923_v63  ;;  %v2989_v48 = vadd.f32 %v2988_v40, %v2987_v59 }
 0x197   : > { %v4349_v10 = vadd.f32 %v2925_v53, %v4160_v27  ;;  %v4352_v62 = vadd.f32 %v2989_v48, %v4258_v28 }
 0x199   : > { %v2990_v21 = vpop.f32.mrb[80].mxu0  ;;  %v3054_v19 = vpop.f32.mrb[80].mxu1 }
 0x19a   : > { %v2991_v23 = vpop.f32.mrb[81].mxu0  ;;  %v3055_v29 = vpop.f32.mrb[81].mxu1 }
 0x19b   : > { %v2992_v43 = vadd.f32 %v2991_v23, %v2990_v21  ;;  %v3056_v14 = vadd.f32 %v3055_v29, %v3054_v19  ;;  %v2993_v37 = vpop.f32.mrb[82].mxu0  ;;  %v3057_v31 = vpop.f32.mrb[82].mxu1 }
 0x19c   : > { %v2994_v8 = vpop.f32.mrb[83].mxu0  ;;  %v3058_v52 = vpop.f32.mrb[83].mxu1 }
 0x19d   : > { %v4355_v15 = vadd.f32 %v2992_v43, %v4261_v5  ;;  %v2995_v38 = vadd.f32 %v2994_v8, %v2993_v37  ;;  %v3059_v3 = vadd.f32 %v3058_v52, %v3057_v31  ;;  %v4358_v27 = vadd.f32 %v3056_v14, %v4264_v56 }
 0x19f   : > { %v4361_v28 = vadd.f32 %v2995_v38, %v4266_v41  ;;  %v4364_v25 = vadd.f32 %v3059_v3, %v4269_v0 }
 0x1a1   : > { %v2996_v35 = vpop.f32.mrb[84].mxu0  ;;  %v3060_v4 = vpop.f32.mrb[84].mxu1 }
 0x1a2   : > { %v2997_v20 = vpop.f32.mrb[85].mxu0  ;;  %v3061_v24 = vpop.f32.mrb[85].mxu1 }
 0x1a3   : > { %v2998_v61 = vadd.f32 %v2997_v20, %v2996_v35  ;;  %v3062_v6 = vadd.f32 %v3061_v24, %v3060_v4  ;;  %v2999_v55 = vpop.f32.mrb[86].mxu0  ;;  %v3063_v5 = vpop.f32.mrb[86].mxu1 }
 0x1a4   : > { %v3000_v42 = vpop.f32.mrb[87].mxu0  ;;  %v3064_v17 = vpop.f32.mrb[87].mxu1 }
 0x1a5   : > { %v4367_v26 = vadd.f32 %v2998_v61, %v4272_v9  ;;  %v3001_v56 = vadd.f32 %v3000_v42, %v2999_v55  ;;  %v3065_v63 = vadd.f32 %v3064_v17, %v3063_v5  ;;  %v4370_v41 = vadd.f32 %v3062_v6, %v4275_v50 }
 0x1a7   : > { %v4373_v0 = vadd.f32 %v3001_v56, %v4277_v2  ;;  %v4376_v59 = vadd.f32 %v3065_v63, %v4280_v32 }
 0x1a9   : > { %v3002_v46 = vpop.f32.mrb[88].mxu0  ;;  %v3066_v40 = vpop.f32.mrb[88].mxu1 }
 0x1aa   : > { %v3003_v53 = vpop.f32.mrb[89].mxu0  ;;  %v3067_v48 = vpop.f32.mrb[89].mxu1 }
 0x1ab   : > { %v3004_v21 = vadd.f32 %v3003_v53, %v3002_v46  ;;  %v3068_v19 = vadd.f32 %v3067_v48, %v3066_v40  ;;  %v3005_v23 = vpop.f32.mrb[90].mxu0  ;;  %v3069_v9 = vpop.f32.mrb[90].mxu1 }
 0x1ac   : > { %v3006_v29 = vpop.f32.mrb[91].mxu0  ;;  %v3070_v43 = vpop.f32.mrb[91].mxu1 }
 0x1ad   : > { %v4379_v14 = vadd.f32 %v3004_v21, %v4283_v51  ;;  %v3007_v50 = vadd.f32 %v3006_v29, %v3005_v23  ;;  %v3071_v37 = vadd.f32 %v3070_v43, %v3069_v9  ;;  %v4382_v2 = vadd.f32 %v3068_v19, %v4286_v34 }
 0x1af   : > { %v4385_v32 = vadd.f32 %v3007_v50, %v4289_v30  ;;  %v4388_v31 = vadd.f32 %v3071_v37, %v4292_v22 }
 0x1b1   : > { %v3008_v8 = vpop.f32.mrb[92].mxu0  ;;  %v3072_v52 = vpop.f32.mrb[92].mxu1 }
 0x1b2   : > { %v3009_v38 = vpop.f32.mrb[93].mxu0  ;;  %v3073_v3 = vpop.f32.mrb[93].mxu1 }
 0x1b3   : > { %v3010_v35 = vadd.f32 %v3009_v38, %v3008_v8  ;;  %v3074_v4 = vadd.f32 %v3073_v3, %v3072_v52  ;;  %v3011_v20 = vpop.f32.mrb[94].mxu0  ;;  %v3075_v51 = vpop.f32.mrb[94].mxu1 }
 0x1b4   : > { %v3012_v24 = vpop.f32.mrb[95].mxu0  ;;  %v3076_v61 = vpop.f32.mrb[95].mxu1 }
 0x1b5   : > { %v4391_v6 = vadd.f32 %v3010_v35, %v4295_v7  ;;  %v3013_v34 = vadd.f32 %v3012_v24, %v3011_v20  ;;  %v3077_v55 = vadd.f32 %v3076_v61, %v3075_v51  ;;  %v4394_v30 = vadd.f32 %v3074_v4, %v4298_v45 }
 0x1b7   : > { %v4397_v22 = vadd.f32 %v3013_v34, %v4301_v57  ;;  %v4400_v5 = vadd.f32 %v3077_v55, %v4304_v54 }
 0x1b9   : > { %v3014_v42 = vpop.f32.mrb[96].mxu0  ;;  %v3078_v17 = vpop.f32.mrb[96].mxu1 }
 0x1ba   : > { %v3015_v56 = vpop.f32.mrb[97].mxu0  ;;  %v3079_v63 = vpop.f32.mrb[97].mxu1 }
 0x1bb   : > { %v3016_v46 = vadd.f32 %v3015_v56, %v3014_v42  ;;  %v3080_v40 = vadd.f32 %v3079_v63, %v3078_v17  ;;  %v3017_v53 = vpop.f32.mrb[98].mxu0  ;;  %v3081_v7 = vpop.f32.mrb[98].mxu1 }
 0x1bc   : > { %v3018_v48 = vpop.f32.mrb[99].mxu0  ;;  %v3082_v21 = vpop.f32.mrb[99].mxu1 }
 0x1bd   : > { %v4403_v19 = vadd.f32 %v3016_v46, %v4307_v13  ;;  %v3019_v45 = vadd.f32 %v3018_v48, %v3017_v53  ;;  %v3083_v23 = vadd.f32 %v3082_v21, %v3081_v7  ;;  %v4406_v57 = vadd.f32 %v3080_v40, %v4310_v11 }
 0x1bf   : > { %v4409_v54 = vadd.f32 %v3019_v45, %v4313_v44  ;;  %v4412_v9 = vadd.f32 %v3083_v23, %v4316_v18 }
 0x1c1   : > { %v3020_v29 = vpop.f32.mrb[100].mxu0  ;;  %v3084_v43 = vpop.f32.mrb[100].mxu1 }
 0x1c2   : > { %v3021_v50 = vpop.f32.mrb[101].mxu0  ;;  %v3085_v37 = vpop.f32.mrb[101].mxu1 }
 0x1c3   : > { %v3022_v8 = vadd.f32 %v3021_v50, %v3020_v29  ;;  %v3086_v52 = vadd.f32 %v3085_v37, %v3084_v43  ;;  %v3023_v38 = vpop.f32.mrb[102].mxu0  ;;  %v3087_v13 = vpop.f32.mrb[102].mxu1 }
 0x1c4   : > { %v3024_v3 = vpop.f32.mrb[103].mxu0  ;;  %v3088_v35 = vpop.f32.mrb[103].mxu1 }
 0x1c5   : > { %v4415_v4 = vadd.f32 %v3022_v8, %v4319_v12  ;;  %v3025_v11 = vadd.f32 %v3024_v3, %v3023_v38  ;;  %v3089_v20 = vadd.f32 %v3088_v35, %v3087_v13  ;;  %v4418_v44 = vadd.f32 %v3086_v52, %v4322_v33 }
 0x1c7   : > { %v4421_v18 = vadd.f32 %v3025_v11, %v4325_v1  ;;  %v4424_v51 = vadd.f32 %v3089_v20, %v4328_v58 }
 0x1c9   : > { %v3026_v24 = vpop.f32.mrb[104].mxu0  ;;  %v3090_v61 = vpop.f32.mrb[104].mxu1 }
 0x1ca   : > { %v3027_v34 = vpop.f32.mrb[105].mxu0  ;;  %v3091_v55 = vpop.f32.mrb[105].mxu1 }
 0x1cb   : > { %v3028_v42 = vadd.f32 %v3027_v34, %v3026_v24  ;;  %v3092_v17 = vadd.f32 %v3091_v55, %v3090_v61  ;;  %v3029_v56 = vpop.f32.mrb[106].mxu0  ;;  %v3093_v12 = vpop.f32.mrb[106].mxu1 }
 0x1cc   : > { %v3030_v63 = vpop.f32.mrb[107].mxu0  ;;  %v3094_v46 = vpop.f32.mrb[107].mxu1 }
 0x1cd   : > { %v4427_v40 = vadd.f32 %v3028_v42, %v4331_v39  ;;  %v3031_v33 = vadd.f32 %v3030_v63, %v3029_v56  ;;  %v3095_v53 = vadd.f32 %v3094_v46, %v3093_v12  ;;  %v4430_v1 = vadd.f32 %v3092_v17, %v4334_v49 }
 0x1cf   : > { %v4433_v58 = vadd.f32 %v3031_v33, %v4337_v60  ;;  %v4436_v7 = vadd.f32 %v3095_v53, %v4340_v16 }
 0x1d1   : > { %v3032_v48 = vpop.f32.mrb[108].mxu0  ;;  %v3096_v21 = vpop.f32.mrb[108].mxu1 }
 0x1d2   : > { %v3033_v45 = vpop.f32.mrb[109].mxu0  ;;  %v3097_v23 = vpop.f32.mrb[109].mxu1 }
 0x1d3   : > { %v3034_v29 = vadd.f32 %v3033_v45, %v3032_v48  ;;  %v3098_v43 = vadd.f32 %v3097_v23, %v3096_v21  ;;  %v3035_v50 = vpop.f32.mrb[110].mxu0  ;;  %v3099_v39 = vpop.f32.mrb[110].mxu1 }
 0x1d4   : > { %v3036_v37 = vpop.f32.mrb[111].mxu0  ;;  %v3100_v8 = vpop.f32.mrb[111].mxu1 }
 0x1d5   : > { %v4439_v52 = vadd.f32 %v3034_v29, %v4343_v36  ;;  %v3037_v49 = vadd.f32 %v3036_v37, %v3035_v50  ;;  %v3101_v38 = vadd.f32 %v3100_v8, %v3099_v39  ;;  %v4442_v60 = vadd.f32 %v3098_v43, %v4346_v47 }
 0x1d7   : > { %v4445_v16 = vadd.f32 %v3037_v49, %v4349_v10  ;;  %v4448_v13 = vadd.f32 %v3101_v38, %v4352_v62 }
 0x1d9   : > { %v3102_v3 = vpop.f32.mrb[112].mxu1  ;;  %v3192_v35 = vpop.f32.mrb[112].mxu0 }
 0x1da   : > { %v1904_v11 = vadd.f32 %v3192_v35, %v4370_v41  ;;  %v3103_v20 = vpop.f32.mrb[113].mxu1  ;;  %v1895_v24 = vpop.f32.mrb[113].mxu0 }
 0x1db   : > { %v3104_v36 = vadd.f32 %v3103_v20, %v3102_v3  ;;  %v1896_v61 = vadd.f32 %v1895_v24, %v4358_v27  ;;  %v3105_v34 = vpop.f32.mrb[114].mxu1  ;;  %v3193_v55 = vpop.f32.mrb[114].mxu0 }
 0x1dc   : > { %v1907_v47 = vadd.f32 %v3193_v55, %v4376_v59  ;;  %v3106_v42 = vpop.f32.mrb[115].mxu1  ;;  %v1898_v17 = vpop.f32.mrb[115].mxu0  ;;  %v2062_v33 = vmul.f32 %v1904_v11, %v1904_v11 }
 0x1dd   : > { %v3107_v10 = vadd.f32 %v3106_v42, %v3105_v34  ;;  %v1899_v62 = vadd.f32 %v1898_v17, %v4364_v25  ;;  %v4462_v41 = vadd.f32 %v3104_v36, %v4355_v15  ;;  %v2060_v27 = vmul.f32 %v1896_v61, %v1896_v61 }
 0x1de   : > { %v2600_v56 = vpack.c.bf16 %v1907_v47, %v1904_v11  ;;  %v2063_v23 = vmul.f32 %v1907_v47, %v1907_v47 }
 0x1df   : > { %v2022_v12 = vadd.f32 %v1899_v62, %v1896_v61  ;;  %v2061_v59 = vmul.f32 %v1899_v62, %v1899_v62  ;;  %v2595_v63 = vpack.c.bf16 %v1899_v62, %v1896_v61  ;;  %v4465_v46 = vadd.f32 %v3107_v10, %v4361_v28 }
 0x1e0   : > { %2687 = vst [vmem:[%s4458_s23 + $0x8] sm:$0xff] %v2600_v56  }
 0x1e1   : > { %v2023_v53 = vadd.f32 %v2022_v12, %v1904_v11  ;;  %v2092_v48 = vadd.f32 %v2061_v59, %v2060_v27  ;;  %2596 = vst [vmem:[%s4458_s23] sm:$0xff] %v2595_v63   ;;  %v3108_v21 = vpop.f32.mrb[116].mxu1  ;;  %v3196_v45 = vpop.f32.mrb[116].mxu0 }
 0x1e2   : > { %v1920_v25 = vadd.f32 %v3196_v45, %v4394_v30  ;;  %v3109_v15 = vpop.f32.mrb[117].mxu1  ;;  %v1911_v29 = vpop.f32.mrb[117].mxu0 }
 0x1e3   : > { %v2093_v43 = vadd.f32 %v2092_v48, %v2062_v33  ;;  %v3110_v50 = vadd.f32 %v3109_v15, %v3108_v21  ;;  %v1912_v39 = vadd.f32 %v1911_v29, %v4382_v2  ;;  %v2024_v37 = vadd.f32 %v2023_v53, %v1907_v47  ;;  %v3111_v28 = vpop.f32.mrb[118].mxu1  ;;  %v3197_v8 = vpop.f32.mrb[118].mxu0 }
 0x1e4   : > { %v1923_v49 = vadd.f32 %v3197_v8, %v4400_v5  ;;  %v3112_v38 = vpop.f32.mrb[119].mxu1  ;;  %v1914_v3 = vpop.f32.mrb[119].mxu0  ;;  %v2066_v10 = vmul.f32 %v1920_v25, %v1920_v25 }
 0x1e5   : > { %v2025_v35 = vadd.f32 %v2024_v37, %v1912_v39  ;;  %v2064_v11 = vmul.f32 %v1912_v39, %v1912_v39  ;;  %v2094_v20 = vadd.f32 %v2093_v43, %v2063_v23  ;;  %v3113_v24 = vadd.f32 %v3112_v38, %v3111_v28 }
 0x1e6   : > { %v2610_v30 = vpack.c.bf16 %v1923_v49, %v1920_v25  ;;  %v1915_v36 = vadd.f32 %v1914_v3, %v4388_v31  ;;  %v4474_v61 = vadd.f32 %v3110_v50, %v4367_v26  ;;  %v2067_v33 = vmul.f32 %v1923_v49, %v1923_v49 }
 0x1e7   : > { %v2095_v2 = vadd.f32 %v2094_v20, %v2064_v11  ;;  %v4477_v34 = vadd.f32 %v3113_v24, %v4373_v0 }
 0x1e8   : > { %2689 = vst [vmem:[%s4458_s23 + $0x18] sm:$0xff] %v2610_v30   ;;  %v2026_v55 = vadd.f32 %v2025_v35, %v1915_v36  ;;  %v2065_v5 = vmul.f32 %v1915_v36, %v1915_v36  ;;  %v2605_v47 = vpack.c.bf16 %v1915_v36, %v1912_v39 }
 0x1e9   : > { %v3114_v42 = vpop.f32.mrb[120].mxu1  ;;  %v3200_v17 = vpop.f32.mrb[120].mxu0 }
 0x1ea   : > { %v2027_v62 = vadd.f32 %v2026_v55, %v1920_v25  ;;  %v2096_v27 = vadd.f32 %v2095_v2, %v2065_v5  ;;  %2688 = vst [vmem:[%s4458_s23 + $0x10] sm:$0xff] %v2605_v47   ;;  %v1936_v56 = vadd.f32 %v3200_v17, %v4418_v44  ;;  %v3115_v31 = vpop.f32.mrb[121].mxu1  ;;  %v1927_v12 = vpop.f32.mrb[121].mxu0 }
 0x1eb   : > { %v3116_v26 = vadd.f32 %v3115_v31, %v3114_v42  ;;  %v1928_v59 = vadd.f32 %v1927_v12, %v4406_v57  ;;  %v3117_v63 = vpop.f32.mrb[122].mxu1  ;;  %v3201_v0 = vpop.f32.mrb[122].mxu0 }
 0x1ec   : > { %v2097_v53 = vadd.f32 %v2096_v27, %v2066_v10  ;;  %v2028_v48 = vadd.f32 %v2027_v62, %v1923_v49  ;;  %v1939_v21 = vadd.f32 %v3201_v0, %v4424_v51  ;;  %v3118_v45 = vpop.f32.mrb[123].mxu1  ;;  %v1930_v23 = vpop.f32.mrb[123].mxu0  ;;  %v2070_v3 = vmul.f32 %v1936_v56, %v1936_v56 }
 0x1ed   : > { %v2068_v25 = vmul.f32 %v1928_v59, %v1928_v59  ;;  %v3119_v15 = vadd.f32 %v3118_v45, %v3117_v63  ;;  %v1931_v44 = vadd.f32 %v1930_v23, %v4412_v9  ;;  %v4486_v29 = vadd.f32 %v3116_v26, %v4379_v14 }
 0x1ee   : > { %v2029_v43 = vadd.f32 %v2028_v48, %v1928_v59  ;;  %v2098_v57 = vadd.f32 %v2097_v53, %v2067_v33  ;;  %v2620_v50 = vpack.c.bf16 %v1939_v21, %v1936_v56 }
 0x1ef   : > { %v2069_v39 = vmul.f32 %v1931_v44, %v1931_v44  ;;  %v2615_v37 = vpack.c.bf16 %v1931_v44, %v1928_v59  ;;  %v4489_v28 = vadd.f32 %v3119_v15, %v4385_v32  ;;  %v2071_v32 = vmul.f32 %v1939_v21, %v1939_v21 }
 0x1f0   : > { %v2099_v8 = vadd.f32 %v2098_v57, %v2068_v25  ;;  %2691 = vst [vmem:[%s4458_s23 + $0x28] sm:$0xff] %v2620_v50   ;;  %v2030_v51 = vadd.f32 %v2029_v43, %v1931_v44 }
 0x1f1   : > { %2690 = vst [vmem:[%s4458_s23 + $0x20] sm:$0xff] %v2615_v37   ;;  %v3120_v49 = vpop.f32.mrb[124].mxu1  ;;  %v3204_v38 = vpop.f32.mrb[124].mxu0 }
 0x1f2   : > { %v2031_v35 = vadd.f32 %v2030_v51, %v1936_v56  ;;  %v2100_v9 = vadd.f32 %v2099_v8, %v2069_v39  ;;  %v1952_v14 = vadd.f32 %v3204_v38, %v4442_v60  ;;  %v3121_v11 = vpop.f32.mrb[125].mxu1  ;;  %v1943_v20 = vpop.f32.mrb[125].mxu0 }
 0x1f3   : > { %v3122_v24 = vadd.f32 %v3121_v11, %v3120_v49  ;;  %v1944_v30 = vadd.f32 %v1943_v20, %v4430_v1  ;;  %v3123_v36 = vpop.f32.mrb[126].mxu1  ;;  %v3205_v2 = vpop.f32.mrb[126].mxu0 }
 0x1f4   : > { %v2101_v55 = vadd.f32 %v2100_v9, %v2070_v3  ;;  %v2032_v5 = vadd.f32 %v2031_v35, %v1939_v21  ;;  %v1955_v47 = vadd.f32 %v3205_v2, %v4448_v13  ;;  %v3124_v42 = vpop.f32.mrb[127].mxu1  ;;  %v1946_v17 = vpop.f32.mrb[127].mxu0  ;;  %v2074_v53 = vmul.f32 %v1952_v14, %v1952_v14 }
 0x1f5   : > { %v2072_v10 = vmul.f32 %v1944_v30, %v1944_v30  ;;  %v3125_v62 = vadd.f32 %v3124_v42, %v3123_v36  ;;  %v1947_v60 = vadd.f32 %v1946_v17, %v4436_v7  ;;  %v1823_v27 = vadd.f32 %v3122_v24, %v4391_v6 }
 0x1f6   : > { %v2033_v56 = vadd.f32 %v2032_v5, %v1944_v30  ;;  %v2102_v31 = vadd.f32 %v2101_v55, %v2071_v32  ;;  %v2630_v1 = vpack.c.bf16 %v1955_v47, %v1952_v14  ;;  %v2075_v43 = vmul.f32 %v1955_v47, %v1955_v47 }
 0x1f7   : > { %v2073_v12 = vmul.f32 %v1947_v60, %v1947_v60  ;;  %v2625_v26 = vpack.c.bf16 %v1947_v60, %v1944_v30  ;;  %v1826_v59 = vadd.f32 %v3125_v62, %v4397_v22 }
 0x1f8   : > { %v2103_v63 = vadd.f32 %v2102_v31, %v2072_v10  ;;  %2693 = vst [vmem:[%s4458_s23 + $0x38] sm:$0xff] %v2630_v1   ;;  %v2034_v0 = vadd.f32 %v2033_v56, %v1947_v60 }
 0x1f9   : > { %2692 = vst [vmem:[%s4458_s23 + $0x30] sm:$0xff] %v2625_v26   ;;  %v3126_v13 = vpop.f32.mrb[128].mxu1  ;;  %v3208_v33 = vpop.f32.mrb[128].mxu0 }
 0x1fa   : > { %v2035_v48 = vadd.f32 %v2034_v0, %v1952_v14  ;;  %v2104_v21 = vadd.f32 %v2103_v63, %v2073_v12  ;;  %v1968_v7 = vadd.f32 %v3208_v33, %v4474_v61  ;;  %v3127_v45 = vpop.f32.mrb[129].mxu1  ;;  %v1959_v6 = vpop.f32.mrb[129].mxu0 }
 0x1fb   : > { %v3128_v23 = vadd.f32 %v3127_v45, %v3126_v13  ;;  %v1960_v25 = vadd.f32 %v1959_v6, %v4462_v41  ;;  %v3129_v15 = vpop.f32.mrb[130].mxu1  ;;  %v3209_v44 = vpop.f32.mrb[130].mxu0 }
 0x1fc   : > { %v2105_v22 = vadd.f32 %v2104_v21, %v2074_v53  ;;  %v2036_v57 = vadd.f32 %v2035_v48, %v1955_v47  ;;  %v1971_v50 = vadd.f32 %v3209_v44, %v4477_v34  ;;  %v3130_v39 = vpop.f32.mrb[131].mxu1  ;;  %v1962_v37 = vpop.f32.mrb[131].mxu0  ;;  %v2078_v30 = vmul.f32 %v1968_v7, %v1968_v7 }
 0x1fd   : > { %v2076_v8 = vmul.f32 %v1960_v25, %v1960_v25  ;;  %v3131_v51 = vadd.f32 %v3130_v39, %v3129_v15  ;;  %v1963_v61 = vadd.f32 %v1962_v37, %v4465_v46  ;;  %v1831_v49 = vadd.f32 %v3128_v23, %v4403_v19 }
 0x1fe   : > { %v2037_v38 = vadd.f32 %v2036_v57, %v1960_v25  ;;  %v2106_v3 = vadd.f32 %v2105_v22, %v2075_v43  ;;  %v2640_v41 = vpack.c.bf16 %v1971_v50, %v1968_v7  ;;  %v2079_v17 = vmul.f32 %v1971_v50, %v1971_v50 }
 0x1ff   : > { %v2077_v35 = vmul.f32 %v1963_v61, %v1963_v61  ;;  %v2635_v9 = vpack.c.bf16 %v1963_v61, %v1960_v25  ;;  %v1834_v14 = vadd.f32 %v3131_v51, %v4409_v54 }
 0x200   : > { %v2107_v11 = vadd.f32 %v2106_v3, %v2076_v8  ;;  %2695 = vst [vmem:[%s4458_s23 + $0x48] sm:$0xff] %v2640_v41   ;;  %v2038_v20 = vadd.f32 %v2037_v38, %v1963_v61 }
 0x201   : > { %2694 = vst [vmem:[%s4458_s23 + $0x40] sm:$0xff] %v2635_v9   ;;  %v3132_v34 = vpop.f32.mrb[132].mxu1  ;;  %v3212_v24 = vpop.f32.mrb[132].mxu0 }
 0x202   : > { %v2039_v36 = vadd.f32 %v2038_v20, %v1968_v7  ;;  %v2108_v2 = vadd.f32 %v2107_v11, %v2077_v35  ;;  %v1984_v32 = vadd.f32 %v3212_v24, %v1823_v27  ;;  %v3133_v46 = vpop.f32.mrb[133].mxu1  ;;  %v1975_v55 = vpop.f32.mrb[133].mxu0 }
 0x203   : > { %v3134_v19 = vadd.f32 %v3133_v46, %v3132_v34  ;;  %v1976_v5 = vadd.f32 %v1975_v55, %v4486_v29  ;;  %v3135_v47 = vpop.f32.mrb[134].mxu1  ;;  %v3213_v42 = vpop.f32.mrb[134].mxu0 }
 0x204   : > { %v2109_v10 = vadd.f32 %v2108_v2, %v2078_v30  ;;  %v2040_v54 = vadd.f32 %v2039_v36, %v1971_v50  ;;  %v1987_v62 = vadd.f32 %v3213_v42, %v1826_v59  ;;  %v3136_v60 = vpop.f32.mrb[135].mxu1  ;;  %v1978_v56 = vpop.f32.mrb[135].mxu0  ;;  %v2082_v7 = vmul.f32 %v1984_v32, %v1984_v32 }
 0x205   : > { %v2080_v31 = vmul.f32 %v1976_v5, %v1976_v5  ;;  %v3137_v1 = vadd.f32 %v3136_v60, %v3135_v47  ;;  %v1979_v12 = vadd.f32 %v1978_v56, %v4489_v28  ;;  %v1839_v27 = vadd.f32 %v3134_v19, %v4415_v4 }
 0x206   : > { %v2041_v26 = vadd.f32 %v2040_v54, %v1976_v5  ;;  %v2110_v63 = vadd.f32 %v2109_v10, %v2079_v17  ;;  %v2650_v0 = vpack.c.bf16 %v1987_v62, %v1984_v32  ;;  %v2083_v22 = vmul.f32 %v1987_v62, %v1987_v62 }
 0x207   : > { %v2081_v29 = vmul.f32 %v1979_v12, %v1979_v12  ;;  %v2645_v13 = vpack.c.bf16 %v1979_v12, %v1976_v5  ;;  %v1842_v33 = vadd.f32 %v3137_v1, %v4421_v18 }
 0x208   : > { %v2111_v53 = vadd.f32 %v2110_v63, %v2080_v31  ;;  %2697 = vst [vmem:[%s4458_s23 + $0x58] sm:$0xff] %v2650_v0   ;;  %v2042_v48 = vadd.f32 %v2041_v26, %v1979_v12 }
 0x209   : > { %2696 = vst [vmem:[%s4458_s23 + $0x50] sm:$0xff] %v2645_v13   ;;  %v3138_v59 = vpop.f32.mrb[136].mxu1  ;;  %v3216_v21 = vpop.f32.mrb[136].mxu0 }
 0x20a   : > { %v2043_v45 = vadd.f32 %v2042_v48, %v1984_v32  ;;  %v2112_v6 = vadd.f32 %v2111_v53, %v2081_v29  ;;  %v2000_v23 = vadd.f32 %v3216_v21, %v1839_v27  ;;  %v3139_v28 = vpop.f32.mrb[137].mxu1  ;;  %v1991_v25 = vpop.f32.mrb[137].mxu0 }
 0x20b   : > { %v3140_v4 = vadd.f32 %v3139_v28, %v3138_v59  ;;  %v1992_v15 = vadd.f32 %v1991_v25, %v1831_v49  ;;  %v3141_v44 = vpop.f32.mrb[138].mxu1  ;;  %v3217_v43 = vpop.f32.mrb[138].mxu0 }
 0x20c   : > { %v2113_v57 = vadd.f32 %v2112_v6, %v2082_v7  ;;  %v2044_v18 = vadd.f32 %v2043_v45, %v1987_v62  ;;  %v2003_v50 = vadd.f32 %v3217_v43, %v1842_v33  ;;  %v3142_v39 = vpop.f32.mrb[139].mxu1  ;;  %v1994_v37 = vpop.f32.mrb[139].mxu0  ;;  %v2086_v36 = vmul.f32 %v2000_v23, %v2000_v23 }
 0x20d   : > { %v2084_v8 = vmul.f32 %v1992_v15, %v1992_v15  ;;  %v3143_v51 = vadd.f32 %v3142_v39, %v3141_v44  ;;  %v1995_v61 = vadd.f32 %v1994_v37, %v1834_v14  ;;  %v1847_v38 = vadd.f32 %v3140_v4, %v4427_v40 }
 0x20e   : > { %v2045_v3 = vadd.f32 %v2044_v18, %v1992_v15  ;;  %v2114_v41 = vadd.f32 %v2113_v57, %v2083_v22  ;;  %v2660_v35 = vpack.c.bf16 %v2003_v50, %v2000_v23  ;;  %v2087_v47 = vmul.f32 %v2003_v50, %v2003_v50 }
 0x20f   : > { %v2085_v9 = vmul.f32 %v1995_v61, %v1995_v61  ;;  %v2655_v49 = vpack.c.bf16 %v1995_v61, %v1992_v15  ;;  %v1850_v11 = vadd.f32 %v3143_v51, %v4433_v58 }
 0x210   : > { %v2115_v20 = vadd.f32 %v2114_v41, %v2084_v8  ;;  %2699 = vst [vmem:[%s4458_s23 + $0x68] sm:$0xff] %v2660_v35   ;;  %v2046_v34 = vadd.f32 %v2045_v3, %v1995_v61 }
 0x211   : > { %2698 = vst [vmem:[%s4458_s23 + $0x60] sm:$0xff] %v2655_v49   ;;  %v3144_v24 = vpop.f32.mrb[140].mxu1  ;;  %v3220_v30 = vpop.f32.mrb[140].mxu0 }
 0x212   : > { %v2047_v2 = vadd.f32 %v2046_v34, %v2000_v23  ;;  %v2116_v32 = vadd.f32 %v2115_v20, %v2085_v9  ;;  %v3145_v46 = vpop.f32.mrb[141].mxu1  ;;  %v2007_v14 = vpop.f32.mrb[141].mxu0 }
 0x213   : > { %v3146_v55 = vadd.f32 %v3145_v46, %v3144_v24  ;;  %v2008_v40 = vadd.f32 %v2007_v14, %v1847_v38  ;;  %v3147_v19 = vpop.f32.mrb[142].mxu1  ;;  %v3221_v5 = vpop.f32.mrb[142].mxu0 }
 0x214   : > { %v2117_v42 = vadd.f32 %v2116_v32, %v2086_v36  ;;  %v2048_v17 = vadd.f32 %v2047_v2, %v2003_v50  ;;  %v3148_v10 = vpop.f32.mrb[143].mxu1  ;;  %v2010_v58 = vpop.f32.mrb[143].mxu0 }
 0x215   : > { %v1855_v54 = vadd.f32 %v3146_v55, %v4439_v52  ;;  %v2088_v62 = vmul.f32 %v2008_v40, %v2008_v40  ;;  %v3149_v60 = vadd.f32 %v3148_v10, %v3147_v19  ;;  %v2011_v56 = vadd.f32 %v2010_v58, %v1850_v11 }
 0x216   : > { %v2049_v31 = vadd.f32 %v2048_v17, %v2008_v40  ;;  %v2118_v1 = vadd.f32 %v2117_v42, %v2087_v47 }
 0x217   : > { %v2016_v12 = vadd.f32 %v3220_v30, %v1855_v54  ;;  %v1858_v27 = vadd.f32 %v3149_v60, %v4445_v16  ;;  %v2089_v26 = vmul.f32 %v2011_v56, %v2011_v56  ;;  %v2665_v63 = vpack.c.bf16 %v2011_v56, %v2008_v40 }
 0x218   : > { %v2119_v0 = vadd.f32 %v2118_v1, %v2088_v62  ;;  %v2050_v29 = vadd.f32 %v2049_v31, %v2011_v56 }
 0x219   : > { %v2090_v13 = vmul.f32 %v2016_v12, %v2016_v12  ;;  %v2019_v33 = vadd.f32 %v3221_v5, %v1858_v27  ;;  %2700 = vst [vmem:[%s4458_s23 + $0x70] sm:$0xff] %v2665_v63  }
 0x21a   : > { %v2051_v53 = vadd.f32 %v2050_v29, %v2016_v12  ;;  %v2120_v48 = vadd.f32 %v2119_v0, %v2089_v26 }
 0x21b   : > { %v2091_v52 = vmul.f32 %v2019_v33, %v2019_v33  ;;  %v2670_v59 = vpack.c.bf16 %v2019_v33, %v2016_v12 }
 0x21c   : > { %v2052_v21 = vadd.f32 %v2051_v53, %v2019_v33  ;;  %v2121_v7 = vadd.f32 %v2120_v48, %v2090_v13 }
 0x21d   : > { %2701 = vst [vmem:[%s4458_s23 + $0x78] sm:$0xff] %v2670_v59  }
 0x21e   : > { %v2053_v45 = vrot.slane %v2052_v21, 4  ;;  %v2122_v6 = vadd.f32 %v2121_v7, %v2091_v52 }
 0x220   : > { %v2054_v23 = vadd.f32 %v2053_v45, %v2052_v21  ;;  %v2123_v28 = vrot.slane %v2122_v6, 4 }
 0x222   : > { %v2055_v16 = vrot.slane %v2054_v23, 2  ;;  %v2124_v25 = vadd.f32 %v2123_v28, %v2122_v6 }
 0x224   : > { %v2056_v4 = vadd.f32 %v2055_v16, %v2054_v23  ;;  %v2125_v15 = vrot.slane %v2124_v25, 2 }
 0x226   : > { %v2057_v44 = vrot.slane %v2056_v4, 1  ;;  %v2126_v43 = vadd.f32 %v2125_v15, %v2124_v25 }
 0x228   : > { %v2058_v22 = vadd.f32 %v2057_v44, %v2056_v4  ;;  %v2127_v57 = vrot.slane %v2126_v43, 1 }
 0x22a   : > { %2059 = vst [vmem:[%s235_s26] sm:$0x1] %v2058_v22  ;;  %v2128_v18 = vadd.f32 %v2127_v57, %v2126_v43 }
 0x22c   : > { %2129 = vst [vmem:[%s235_s26 + $0x1] sm:$0x1] %v2128_v18 }
 0x22d PF: > { %s16_s18 = sadd.s32 1, %s3324_s18  }
 0x22e   : > { %p13_p4 = scmp.ge.s32.totalorder %s16_s18, 4  }
 0x230   :  { %15 = sbr.rel (!%p13_p4) target bundleno = 1 (0x1), region = 78 }

</bundles_post_ra>
